<compile_context>
chip_gen: v6e
topology: v6e:2x2x1
jax: 0.10.0
libtpu: 0.0.40
codegen_flags: <defaults>
</compile_context>

<pallas_src>
import math

import jax
import jax.numpy as jnp
from jax import lax
from jax.experimental import pallas as pl
from jax.experimental.pallas import tpu as pltpu


D_MODEL = 256
N_HEADS = 2
HEAD_DIM = D_MODEL // N_HEADS          # 128
D_FF = 256
N_LAYERS = 2
LN_EPS = 1e-5
NEG_INF = -1e9                         # finite "masked" value -> no NaN risk in softmax


# ----------------------------------------------------------------------------
# Kernel: whole forward pass on a (Bp, Kp) tile of flattened pasts.
# ----------------------------------------------------------------------------
def _layernorm(x, g, b):
    mu = jnp.mean(x, axis=-1, keepdims=True)
    xc = x - mu
    var = jnp.mean(xc * xc, axis=-1, keepdims=True)
    return xc * lax.rsqrt(var + LN_EPS) * g + b


def transformer_kernel(h_ref, mask_ref, wenc_ref,
                       wqkv_ref, bqkv_ref, wo_ref, bo_ref,
                       ln1g_ref, ln1b_ref,
                       w1_ref, b1_ref, w2_ref, b2_ref,
                       ln2g_ref, ln2b_ref,
                       o_ref):
    f32 = jnp.float32
    h = h_ref[...].astype(f32)              # (Bp, Kp)  zero-padded flattened pasts
    mask = mask_ref[...].astype(f32)        # (Bp, Bp)  additive attention mask

    # encode_past (Linear, no bias): padded K columns are zero so result is exact.
    x0 = jnp.dot(h, wenc_ref[...].astype(f32), preferred_element_type=f32)   # (Bp, 256)

    scale = 1.0 / math.sqrt(HEAD_DIM)
    x = x0
    for l in range(N_LAYERS):               # static unroll: both layers stay VMEM-resident
        # ---------------- self attention (2 heads, shared additive mask) ----------------
        qkv = jnp.dot(x, wqkv_ref[l].astype(f32), preferred_element_type=f32)
        qkv = qkv + bqkv_ref[l].astype(f32)                                   # (Bp, 768)
        q = qkv[:, 0:D_MODEL]
        k = qkv[:, D_MODEL:2 * D_MODEL]
        v = qkv[:, 2 * D_MODEL:3 * D_MODEL]

        wo = wo_ref[l].astype(f32)                                            # (256, 256)
        attn_acc = None
        for hh in range(N_HEADS):            # static unroll over heads (128-aligned slices)
            lo, hi = hh * HEAD_DIM, (hh + 1) * HEAD_DIM
            qh, kh, vh = q[:, lo:hi], k[:, lo:hi], v[:, lo:hi]
            # scores = (Q @ K^T) / sqrt(head_dim) + mask   -- contract last dims (no .T copy)
            s = lax.dot_general(qh, kh, (((1,), (1,)), ((), ())),
                                preferred_element_type=f32) * scale + mask    # (Bp, Bp)
            s = s - jnp.max(s, axis=-1, keepdims=True)
            p = jnp.exp(s)
            p = p / jnp.sum(p, axis=-1, keepdims=True)
            oh = jnp.dot(p, vh, preferred_element_type=f32)                   # (Bp, 128)
            # out_proj, head-sliced: avoids any concat / relayout
            proj = jnp.dot(oh, wo[lo:hi, :], preferred_element_type=f32)      # (Bp, 256)
            attn_acc = proj if attn_acc is None else attn_acc + proj
        attn = attn_acc + bo_ref[l].astype(f32)

        # ---------------- post-norm residual (PyTorch default norm_first=False) --------
        x = _layernorm(x + attn, ln1g_ref[l].astype(f32), ln1b_ref[l].astype(f32))

        # ---------------- feed-forward (relu, dim_feedforward=256) ---------------------
        ff = jnp.dot(x, w1_ref[l].astype(f32),
                     preferred_element_type=f32) + b1_ref[l].astype(f32)
        ff = jnp.maximum(ff, 0.0)
        ff = jnp.dot(ff, w2_ref[l].astype(f32),
                     preferred_element_type=f32) + b2_ref[l].astype(f32)
        x = _layernorm(x + ff, ln2g_ref[l].astype(f32), ln2b_ref[l].astype(f32))

    # module output: h_feat + transformer(h_feat)
    o_ref[...] = (x0 + x).astype(o_ref.dtype)


# ----------------------------------------------------------------------------
# Wrapper: padding glue + pallas_call
# ----------------------------------------------------------------------------
def _full_spec(shape):
    nd = len(shape)
    return pl.BlockSpec(shape, lambda i, _nd=nd: (0,) * _nd)


def similarity_social_transformer_forward(params, h, mask):
    """h: (B, t, 1) with t == past_len*3; mask: (B, B) additive float mask.
    Returns (B, 1, 256)."""
    B, t, _ = h.shape
    h_flat = h.reshape(B, t).astype(jnp.float32)

    # Pad the agent (token) dim to a sublane multiple; pad tokens are fully masked.
    Bp = ((B + 7) // 8) * 8
    pad_b = Bp - B
    # Pad the encoder contraction dim to a lane multiple (zeros -> exact result).
    Kp = ((t + 127) // 128) * 128
    pad_k = Kp - t

    h_p = jnp.pad(h_flat, ((0, pad_b), (0, pad_k)))
    mask_p = jnp.pad(mask.astype(jnp.float32), ((0, pad_b), (0, pad_b)),
                     constant_values=NEG_INF)
    w_enc_p = jnp.pad(params["w_enc"], ((0, pad_k), (0, 0)))

    args = (h_p, mask_p, w_enc_p,
            params["w_qkv"], params["b_qkv"], params["w_o"], params["b_o"],
            params["ln1_g"], params["ln1_b"],
            params["w_ff1"], params["b_ff1"], params["w_ff2"], params["b_ff2"],
            params["ln2_g"], params["ln2_b"])

    out_p = pl.pallas_call(
        transformer_kernel,
        out_shape=jax.ShapeDtypeStruct((Bp, D_MODEL), jnp.float32),
        grid=(1,),
        in_specs=[_full_spec(a.shape) for a in args],
        out_specs=_full_spec((Bp, D_MODEL)),
        compiler_params=pltpu.CompilerParams(
            dimension_semantics=("arbitrary",)),
    )(*args)

    return out_p[:B].reshape(B, 1, D_MODEL)


# ----------------------------------------------------------------------------
# Deterministic parameter init (weights stored (in, out); layers stacked on axis 0)
# ----------------------------------------------------------------------------
def init_params(key, past_len):
    t_in = past_len * 3
    k_enc, k_layers = jax.random.split(key)

    def dense(k, fan_in, shape, scale=1.0):
        return jax.random.normal(k, shape, jnp.float32) * (scale / jnp.sqrt(fan_in))

    w_enc = dense(k_enc, t_in, (t_in, D_MODEL))

    def layer_params(k):
        ks = jax.random.split(k, 8)
        return dict(
            w_qkv=dense(ks[0], D_MODEL, (D_MODEL, 3 * D_MODEL)),
            b_qkv=0.1 * jax.random.normal(ks[1], (1, 3 * D_MODEL), jnp.float32),
            w_o=dense(ks[2], D_MODEL, (D_MODEL, D_MODEL)),
            b_o=0.1 * jax.random.normal(ks[3], (1, D_MODEL), jnp.float32),
            ln1_g=jnp.ones((1, D_MODEL), jnp.float32),
            ln1_b=jnp.zeros((1, D_MODEL), jnp.float32),
            w_ff1=dense(ks[4], D_MODEL, (D_MODEL, D_FF)),
            b_ff1=0.1 * jax.random.normal(ks[5], (1, D_FF), jnp.float32),
            w_ff2=dense(ks[6], D_FF, (D_FF, D_MODEL)),
            b_ff2=0.1 * jax.random.normal(ks[7], (1, D_MODEL), jnp.float32),
            ln2_g=jnp.ones((1, D_MODEL), jnp.float32),
            ln2_b=jnp.zeros((1, D_MODEL), jnp.float32),
        )

    per_layer = [layer_params(k) for k in jax.random.split(k_layers, N_LAYERS)]
    stacked = {name: jnp.stack([p[name] for p in per_layer], axis=0)
               for name in per_layer[0]}
    stacked["w_enc"] = w_enc
    return stacked


# ----------------------------------------------------------------------------
# Pure-JAX reference (sanity check of the Pallas kernel)
# ----------------------------------------------------------------------------
def _ln_ref(x, g, b):
    mu = jnp.mean(x, axis=-1, keepdims=True)
    var = jnp.mean((x - mu) ** 2, axis=-1, keepdims=True)
    return (x - mu) * lax.rsqrt(var + LN_EPS) * g + b


def reference_forward(params, h, mask):
    B, t, _ = h.shape
    x0 = h.reshape(B, t) @ params["w_enc"]
    scale = 1.0 / math.sqrt(HEAD_DIM)
    m = mask.astype(jnp.float32)
    x = x0
    for l in range(N_LAYERS):
        qkv = x @ params["w_qkv"][l] + params["b_qkv"][l]
        q, k, v = (qkv[:, :D_MODEL], qkv[:, D_MODEL:2 * D_MODEL],
                   qkv[:, 2 * D_MODEL:])
        outs = []
        for hh in range(N_HEADS):
            lo, hi = hh * HEAD_DIM, (hh + 1) * HEAD_DIM
            s = (q[:, lo:hi] @ k[:, lo:hi].T) * scale + m
            outs.append(jax.nn.softmax(s, axis=-1) @ v[:, lo:hi])
        a = jnp.concatenate(outs, -1) @ params["w_o"][l] + params["b_o"][l]
        x = _ln_ref(x + a, params["ln1_g"][l], params["ln1_b"][l])
        ff = jnp.maximum(x @ params["w_ff1"][l] + params["b_ff1"][l], 0.0)
        ff = ff @ params["w_ff2"][l] + params["b_ff2"][l]
        x = _ln_ref(x + ff, params["ln2_g"][l], params["ln2_b"][l])
    return (x0 + x).reshape(B, 1, D_MODEL)


if __name__ == "__main__":
    key = jax.random.PRNGKey(0)
    kp, kh = jax.random.split(key)

    past_len = 8                 # encode_past input dim = past_len * 3 = 24
    batch = 8                    # agents; attention runs across this dim
    params = init_params(kp, past_len)
    h = jax.random.normal(kh, (batch, past_len * 3, 1), jnp.float32)
    # Additive float attention mask (0 = attend, -1e9 = blocked); e.g. lower-triangular.
    idx = jnp.arange(batch)
    mask = jnp.where(idx[None, :] <= idx[:, None], 0.0, NEG_INF).astype(jnp.float32)
    # TODO(synk): boolean attn_mask / key_padding_mask variants are not implemented
    #             (this kernel takes the additive-float form PyTorch also accepts).

    fwd = jax.jit(similarity_social_transformer_forward)
    out = jax.block_until_ready(fwd(params, h, mask))

    assert out.shape == (batch, 1, D_MODEL)
    ref = reference_forward(params, h, mask)
    assert jnp.allclose(out, ref, atol=1e-2, rtol=1e-2), "mismatch vs reference"

    print("KERNEL_OK")
</pallas_src>

<mosaic_0001>
module attributes {stable_mosaic.version = 11 : i64} {
  func.func @transformer_kernel(%arg0: i32, %arg1: memref<8x128xf32, #tpu.memory_space<vmem>>, %arg2: memref<8x8xf32, #tpu.memory_space<vmem>>, %arg3: memref<128x256xf32, #tpu.memory_space<vmem>>, %arg4: memref<2x256x768xf32, #tpu.memory_space<vmem>>, %arg5: memref<2x1x768xf32, #tpu.memory_space<vmem>>, %arg6: memref<2x256x256xf32, #tpu.memory_space<vmem>>, %arg7: memref<2x1x256xf32, #tpu.memory_space<vmem>>, %arg8: memref<2x1x256xf32, #tpu.memory_space<vmem>>, %arg9: memref<2x1x256xf32, #tpu.memory_space<vmem>>, %arg10: memref<2x256x256xf32, #tpu.memory_space<vmem>>, %arg11: memref<2x1x256xf32, #tpu.memory_space<vmem>>, %arg12: memref<2x256x256xf32, #tpu.memory_space<vmem>>, %arg13: memref<2x1x256xf32, #tpu.memory_space<vmem>>, %arg14: memref<2x1x256xf32, #tpu.memory_space<vmem>>, %arg15: memref<2x1x256xf32, #tpu.memory_space<vmem>>, %arg16: memref<8x256xf32, #tpu.memory_space<vmem>>) attributes {dimension_semantics = [#tpu.dimension_semantics<arbitrary>], iteration_bounds = array<i64: 1>, scalar_prefetch = 0 : i64, scratch_operands = 0 : i64, tpu.core_type = #tpu.core_type<tc>, window_params = [{pipeline_mode = #tpu.pipeline_mode<synchronous>, transform_indices = @transform_0, window_bounds = array<i64: 8, 128>}, {pipeline_mode = #tpu.pipeline_mode<synchronous>, transform_indices = @transform_1, window_bounds = array<i64: 8, 8>}, {pipeline_mode = #tpu.pipeline_mode<synchronous>, transform_indices = @transform_2, window_bounds = array<i64: 128, 256>}, {pipeline_mode = #tpu.pipeline_mode<synchronous>, transform_indices = @transform_3, window_bounds = array<i64: 2, 256, 768>}, {pipeline_mode = #tpu.pipeline_mode<synchronous>, transform_indices = @transform_4, window_bounds = array<i64: 2, 1, 768>}, {pipeline_mode = #tpu.pipeline_mode<synchronous>, transform_indices = @transform_5, window_bounds = array<i64: 2, 256, 256>}, {pipeline_mode = #tpu.pipeline_mode<synchronous>, transform_indices = @transform_6, window_bounds = array<i64: 2, 1, 256>}, {pipeline_mode = #tpu.pipeline_mode<synchronous>, transform_indices = @transform_7, window_bounds = array<i64: 2, 1, 256>}, {pipeline_mode = #tpu.pipeline_mode<synchronous>, transform_indices = @transform_8, window_bounds = array<i64: 2, 1, 256>}, {pipeline_mode = #tpu.pipeline_mode<synchronous>, transform_indices = @transform_9, window_bounds = array<i64: 2, 256, 256>}, {pipeline_mode = #tpu.pipeline_mode<synchronous>, transform_indices = @transform_10, window_bounds = array<i64: 2, 1, 256>}, {pipeline_mode = #tpu.pipeline_mode<synchronous>, transform_indices = @transform_11, window_bounds = array<i64: 2, 256, 256>}, {pipeline_mode = #tpu.pipeline_mode<synchronous>, transform_indices = @transform_12, window_bounds = array<i64: 2, 1, 256>}, {pipeline_mode = #tpu.pipeline_mode<synchronous>, transform_indices = @transform_13, window_bounds = array<i64: 2, 1, 256>}, {pipeline_mode = #tpu.pipeline_mode<synchronous>, transform_indices = @transform_14, window_bounds = array<i64: 2, 1, 256>}, {pipeline_mode = #tpu.pipeline_mode<synchronous>, transform_indices = @transform_15, window_bounds = array<i64: 8, 256>}]} {
    %c0 = arith.constant 0 : index
    %c0_0 = arith.constant 0 : index
    %0 = vector.load %arg1[%c0, %c0_0] : memref<8x128xf32, #tpu.memory_space<vmem>>, vector<8x128xf32>
    %c0_1 = arith.constant 0 : index
    %c0_2 = arith.constant 0 : index
    %1 = vector.load %arg2[%c0_1, %c0_2] : memref<8x8xf32, #tpu.memory_space<vmem>>, vector<8x8xf32>
    %c0_3 = arith.constant 0 : index
    %c0_4 = arith.constant 0 : index
    %2 = vector.load %arg3[%c0_3, %c0_4] : memref<128x256xf32, #tpu.memory_space<vmem>>, vector<128x256xf32>
    %cst = arith.constant dense<0.000000e+00> : vector<8x256xf32>
    %3 = tpu.matmul %0, %2, %cst {dimension_numbers = #tpu.dot_dimension_numbers<[1], [0], [0], [1], [0, 0, 1, 1], [], []>} : vector<8x128xf32>, vector<128x256xf32>, vector<8x256xf32> -> vector<8x256xf32>
    %c0_5 = arith.constant 0 : index
    %c0_6 = arith.constant 0 : index
    %c0_7 = arith.constant 0 : index
    %4 = vector.load %arg4[%c0_5, %c0_6, %c0_7] : memref<2x256x768xf32, #tpu.memory_space<vmem>>, vector<1x256x768xf32>
    %5 = vector.shape_cast %4 : vector<1x256x768xf32> to vector<256x768xf32>
    %cst_8 = arith.constant dense<0.000000e+00> : vector<8x768xf32>
    %6 = tpu.matmul %3, %5, %cst_8 {dimension_numbers = #tpu.dot_dimension_numbers<[1], [0], [0], [1], [0, 0, 1, 1], [], []>} : vector<8x256xf32>, vector<256x768xf32>, vector<8x768xf32> -> vector<8x768xf32>
    %c0_9 = arith.constant 0 : index
    %c0_10 = arith.constant 0 : index
    %c0_11 = arith.constant 0 : index
    %7 = vector.load %arg5[%c0_9, %c0_10, %c0_11] : memref<2x1x768xf32, #tpu.memory_space<vmem>>, vector<1x1x768xf32>
    %8 = vector.shape_cast %7 : vector<1x1x768xf32> to vector<1x768xf32>
    %9 = vector.broadcast %8 : vector<1x768xf32> to vector<8x768xf32>
    %10 = arith.addf %6, %9 : vector<8x768xf32>
    %11 = vector.extract_strided_slice %10 {offsets = [0, 0], sizes = [8, 256], strides = [1, 1]} : vector<8x768xf32> to vector<8x256xf32>
    %12 = vector.extract_strided_slice %10 {offsets = [0, 256], sizes = [8, 256], strides = [1, 1]} : vector<8x768xf32> to vector<8x256xf32>
    %13 = vector.extract_strided_slice %10 {offsets = [0, 512], sizes = [8, 256], strides = [1, 1]} : vector<8x768xf32> to vector<8x256xf32>
    %c0_12 = arith.constant 0 : index
    %c0_13 = arith.constant 0 : index
    %c0_14 = arith.constant 0 : index
    %14 = vector.load %arg6[%c0_12, %c0_13, %c0_14] : memref<2x256x256xf32, #tpu.memory_space<vmem>>, vector<1x256x256xf32>
    %15 = vector.shape_cast %14 : vector<1x256x256xf32> to vector<256x256xf32>
    %16 = vector.extract_strided_slice %11 {offsets = [0, 0], sizes = [8, 128], strides = [1, 1]} : vector<8x256xf32> to vector<8x128xf32>
    %17 = vector.extract_strided_slice %12 {offsets = [0, 0], sizes = [8, 128], strides = [1, 1]} : vector<8x256xf32> to vector<8x128xf32>
    %18 = vector.extract_strided_slice %13 {offsets = [0, 0], sizes = [8, 128], strides = [1, 1]} : vector<8x256xf32> to vector<8x128xf32>
    %cst_15 = arith.constant dense<0.000000e+00> : vector<8x8xf32>
    %19 = tpu.matmul %16, %17, %cst_15 {dimension_numbers = #tpu.dot_dimension_numbers<[1], [1], [0], [0], [0, 0, 1, 0], [], []>} : vector<8x128xf32>, vector<8x128xf32>, vector<8x8xf32> -> vector<8x8xf32>
    %cst_16 = arith.constant 0.0883883461 : f32
    %20 = vector.broadcast %cst_16 : f32 to vector<8x8xf32>
    %21 = arith.mulf %19, %20 : vector<8x8xf32>
    %22 = arith.addf %21, %1 : vector<8x8xf32>
    %cst_17 = arith.constant dense<0xFF800000> : vector<8xf32>
    %23 = vector.multi_reduction <maximumf>, %22, %cst_17 [1] : vector<8x8xf32> to vector<8xf32>
    %24 = vector.shape_cast %23 : vector<8xf32> to vector<8x1xf32>
    %25 = vector.broadcast %24 : vector<8x1xf32> to vector<8x8xf32>
    %26 = arith.subf %22, %25 : vector<8x8xf32>
    %27 = math.exp %26 : vector<8x8xf32>
    %cst_18 = arith.constant dense<0.000000e+00> : vector<8xf32>
    %28 = vector.multi_reduction <add>, %27, %cst_18 [1] : vector<8x8xf32> to vector<8xf32>
    %29 = vector.shape_cast %28 : vector<8xf32> to vector<8x1xf32>
    %30 = vector.broadcast %29 : vector<8x1xf32> to vector<8x8xf32>
    %31 = arith.divf %27, %30 : vector<8x8xf32>
    %cst_19 = arith.constant dense<0.000000e+00> : vector<8x128xf32>
    %32 = tpu.matmul %31, %18, %cst_19 {dimension_numbers = #tpu.dot_dimension_numbers<[1], [0], [0], [1], [0, 0, 1, 1], [], []>} : vector<8x8xf32>, vector<8x128xf32>, vector<8x128xf32> -> vector<8x128xf32>
    %33 = vector.extract_strided_slice %15 {offsets = [0, 0], sizes = [128, 256], strides = [1, 1]} : vector<256x256xf32> to vector<128x256xf32>
    %cst_20 = arith.constant dense<0.000000e+00> : vector<8x256xf32>
    %34 = tpu.matmul %32, %33, %cst_20 {dimension_numbers = #tpu.dot_dimension_numbers<[1], [0], [0], [1], [0, 0, 1, 1], [], []>} : vector<8x128xf32>, vector<128x256xf32>, vector<8x256xf32> -> vector<8x256xf32>
    %35 = vector.extract_strided_slice %11 {offsets = [0, 128], sizes = [8, 128], strides = [1, 1]} : vector<8x256xf32> to vector<8x128xf32>
    %36 = vector.extract_strided_slice %12 {offsets = [0, 128], sizes = [8, 128], strides = [1, 1]} : vector<8x256xf32> to vector<8x128xf32>
    %37 = vector.extract_strided_slice %13 {offsets = [0, 128], sizes = [8, 128], strides = [1, 1]} : vector<8x256xf32> to vector<8x128xf32>
    %cst_21 = arith.constant dense<0.000000e+00> : vector<8x8xf32>
    %38 = tpu.matmul %35, %36, %cst_21 {dimension_numbers = #tpu.dot_dimension_numbers<[1], [1], [0], [0], [0, 0, 1, 0], [], []>} : vector<8x128xf32>, vector<8x128xf32>, vector<8x8xf32> -> vector<8x8xf32>
    %cst_22 = arith.constant 0.0883883461 : f32
    %39 = vector.broadcast %cst_22 : f32 to vector<8x8xf32>
    %40 = arith.mulf %38, %39 : vector<8x8xf32>
    %41 = arith.addf %40, %1 : vector<8x8xf32>
    %cst_23 = arith.constant dense<0xFF800000> : vector<8xf32>
    %42 = vector.multi_reduction <maximumf>, %41, %cst_23 [1] : vector<8x8xf32> to vector<8xf32>
    %43 = vector.shape_cast %42 : vector<8xf32> to vector<8x1xf32>
    %44 = vector.broadcast %43 : vector<8x1xf32> to vector<8x8xf32>
    %45 = arith.subf %41, %44 : vector<8x8xf32>
    %46 = math.exp %45 : vector<8x8xf32>
    %cst_24 = arith.constant dense<0.000000e+00> : vector<8xf32>
    %47 = vector.multi_reduction <add>, %46, %cst_24 [1] : vector<8x8xf32> to vector<8xf32>
    %48 = vector.shape_cast %47 : vector<8xf32> to vector<8x1xf32>
    %49 = vector.broadcast %48 : vector<8x1xf32> to vector<8x8xf32>
    %50 = arith.divf %46, %49 : vector<8x8xf32>
    %cst_25 = arith.constant dense<0.000000e+00> : vector<8x128xf32>
    %51 = tpu.matmul %50, %37, %cst_25 {dimension_numbers = #tpu.dot_dimension_numbers<[1], [0], [0], [1], [0, 0, 1, 1], [], []>} : vector<8x8xf32>, vector<8x128xf32>, vector<8x128xf32> -> vector<8x128xf32>
    %52 = vector.extract_strided_slice %15 {offsets = [128, 0], sizes = [128, 256], strides = [1, 1]} : vector<256x256xf32> to vector<128x256xf32>
    %cst_26 = arith.constant dense<0.000000e+00> : vector<8x256xf32>
    %53 = tpu.matmul %51, %52, %cst_26 {dimension_numbers = #tpu.dot_dimension_numbers<[1], [0], [0], [1], [0, 0, 1, 1], [], []>} : vector<8x128xf32>, vector<128x256xf32>, vector<8x256xf32> -> vector<8x256xf32>
    %54 = arith.addf %34, %53 : vector<8x256xf32>
    %c0_27 = arith.constant 0 : index
    %c0_28 = arith.constant 0 : index
    %c0_29 = arith.constant 0 : index
    %55 = vector.load %arg7[%c0_27, %c0_28, %c0_29] : memref<2x1x256xf32, #tpu.memory_space<vmem>>, vector<1x1x256xf32>
    %56 = vector.shape_cast %55 : vector<1x1x256xf32> to vector<1x256xf32>
    %57 = vector.broadcast %56 : vector<1x256xf32> to vector<8x256xf32>
    %58 = arith.addf %54, %57 : vector<8x256xf32>
    %59 = arith.addf %3, %58 : vector<8x256xf32>
    %c0_30 = arith.constant 0 : index
    %c0_31 = arith.constant 0 : index
    %c0_32 = arith.constant 0 : index
    %60 = vector.load %arg8[%c0_30, %c0_31, %c0_32] : memref<2x1x256xf32, #tpu.memory_space<vmem>>, vector<1x1x256xf32>
    %61 = vector.shape_cast %60 : vector<1x1x256xf32> to vector<1x256xf32>
    %c0_33 = arith.constant 0 : index
    %c0_34 = arith.constant 0 : index
    %c0_35 = arith.constant 0 : index
    %62 = vector.load %arg9[%c0_33, %c0_34, %c0_35] : memref<2x1x256xf32, #tpu.memory_space<vmem>>, vector<1x1x256xf32>
    %63 = vector.shape_cast %62 : vector<1x1x256xf32> to vector<1x256xf32>
    %cst_36 = arith.constant dense<0.000000e+00> : vector<8xf32>
    %64 = vector.multi_reduction <add>, %59, %cst_36 [1] : vector<8x256xf32> to vector<8xf32>
    %65 = vector.shape_cast %64 : vector<8xf32> to vector<8x1xf32>
    %cst_37 = arith.constant 2.560000e+02 : f32
    %66 = vector.broadcast %cst_37 : f32 to vector<8x1xf32>
    %67 = arith.divf %65, %66 : vector<8x1xf32>
    %68 = vector.broadcast %67 : vector<8x1xf32> to vector<8x256xf32>
    %69 = arith.subf %59, %68 : vector<8x256xf32>
    %70 = arith.mulf %69, %69 : vector<8x256xf32>
    %cst_38 = arith.constant dense<0.000000e+00> : vector<8xf32>
    %71 = vector.multi_reduction <add>, %70, %cst_38 [1] : vector<8x256xf32> to vector<8xf32>
    %72 = vector.shape_cast %71 : vector<8xf32> to vector<8x1xf32>
    %cst_39 = arith.constant 2.560000e+02 : f32
    %73 = vector.broadcast %cst_39 : f32 to vector<8x1xf32>
    %74 = arith.divf %72, %73 : vector<8x1xf32>
    %cst_40 = arith.constant 9.99999974E-6 : f32
    %75 = vector.broadcast %cst_40 : f32 to vector<8x1xf32>
    %76 = arith.addf %74, %75 : vector<8x1xf32>
    %77 = math.rsqrt %76 : vector<8x1xf32>
    %78 = vector.broadcast %77 : vector<8x1xf32> to vector<8x256xf32>
    %79 = arith.mulf %69, %78 : vector<8x256xf32>
    %80 = vector.broadcast %61 : vector<1x256xf32> to vector<8x256xf32>
    %81 = arith.mulf %79, %80 : vector<8x256xf32>
    %82 = vector.broadcast %63 : vector<1x256xf32> to vector<8x256xf32>
    %83 = arith.addf %81, %82 : vector<8x256xf32>
    %c0_41 = arith.constant 0 : index
    %c0_42 = arith.constant 0 : index
    %c0_43 = arith.constant 0 : index
    %84 = vector.load %arg10[%c0_41, %c0_42, %c0_43] : memref<2x256x256xf32, #tpu.memory_space<vmem>>, vector<1x256x256xf32>
    %85 = vector.shape_cast %84 : vector<1x256x256xf32> to vector<256x256xf32>
    %cst_44 = arith.constant dense<0.000000e+00> : vector<8x256xf32>
    %86 = tpu.matmul %83, %85, %cst_44 {dimension_numbers = #tpu.dot_dimension_numbers<[1], [0], [0], [1], [0, 0, 1, 1], [], []>} : vector<8x256xf32>, vector<256x256xf32>, vector<8x256xf32> -> vector<8x256xf32>
    %c0_45 = arith.constant 0 : index
    %c0_46 = arith.constant 0 : index
    %c0_47 = arith.constant 0 : index
    %87 = vector.load %arg11[%c0_45, %c0_46, %c0_47] : memref<2x1x256xf32, #tpu.memory_space<vmem>>, vector<1x1x256xf32>
    %88 = vector.shape_cast %87 : vector<1x1x256xf32> to vector<1x256xf32>
    %89 = vector.broadcast %88 : vector<1x256xf32> to vector<8x256xf32>
    %90 = arith.addf %86, %89 : vector<8x256xf32>
    %cst_48 = arith.constant 0.000000e+00 : f32
    %91 = vector.broadcast %cst_48 : f32 to vector<8x256xf32>
    %92 = arith.maximumf %90, %91 : vector<8x256xf32>
    %c0_49 = arith.constant 0 : index
    %c0_50 = arith.constant 0 : index
    %c0_51 = arith.constant 0 : index
    %93 = vector.load %arg12[%c0_49, %c0_50, %c0_51] : memref<2x256x256xf32, #tpu.memory_space<vmem>>, vector<1x256x256xf32>
    %94 = vector.shape_cast %93 : vector<1x256x256xf32> to vector<256x256xf32>
    %cst_52 = arith.constant dense<0.000000e+00> : vector<8x256xf32>
    %95 = tpu.matmul %92, %94, %cst_52 {dimension_numbers = #tpu.dot_dimension_numbers<[1], [0], [0], [1], [0, 0, 1, 1], [], []>} : vector<8x256xf32>, vector<256x256xf32>, vector<8x256xf32> -> vector<8x256xf32>
    %c0_53 = arith.constant 0 : index
    %c0_54 = arith.constant 0 : index
    %c0_55 = arith.constant 0 : index
    %96 = vector.load %arg13[%c0_53, %c0_54, %c0_55] : memref<2x1x256xf32, #tpu.memory_space<vmem>>, vector<1x1x256xf32>
    %97 = vector.shape_cast %96 : vector<1x1x256xf32> to vector<1x256xf32>
    %98 = vector.broadcast %97 : vector<1x256xf32> to vector<8x256xf32>
    %99 = arith.addf %95, %98 : vector<8x256xf32>
    %100 = arith.addf %83, %99 : vector<8x256xf32>
    %c0_56 = arith.constant 0 : index
    %c0_57 = arith.constant 0 : index
    %c0_58 = arith.constant 0 : index
    %101 = vector.load %arg14[%c0_56, %c0_57, %c0_58] : memref<2x1x256xf32, #tpu.memory_space<vmem>>, vector<1x1x256xf32>
    %102 = vector.shape_cast %101 : vector<1x1x256xf32> to vector<1x256xf32>
    %c0_59 = arith.constant 0 : index
    %c0_60 = arith.constant 0 : index
    %c0_61 = arith.constant 0 : index
    %103 = vector.load %arg15[%c0_59, %c0_60, %c0_61] : memref<2x1x256xf32, #tpu.memory_space<vmem>>, vector<1x1x256xf32>
    %104 = vector.shape_cast %103 : vector<1x1x256xf32> to vector<1x256xf32>
    %cst_62 = arith.constant dense<0.000000e+00> : vector<8xf32>
    %105 = vector.multi_reduction <add>, %100, %cst_62 [1] : vector<8x256xf32> to vector<8xf32>
    %106 = vector.shape_cast %105 : vector<8xf32> to vector<8x1xf32>
    %cst_63 = arith.constant 2.560000e+02 : f32
    %107 = vector.broadcast %cst_63 : f32 to vector<8x1xf32>
    %108 = arith.divf %106, %107 : vector<8x1xf32>
    %109 = vector.broadcast %108 : vector<8x1xf32> to vector<8x256xf32>
    %110 = arith.subf %100, %109 : vector<8x256xf32>
    %111 = arith.mulf %110, %110 : vector<8x256xf32>
    %cst_64 = arith.constant dense<0.000000e+00> : vector<8xf32>
    %112 = vector.multi_reduction <add>, %111, %cst_64 [1] : vector<8x256xf32> to vector<8xf32>
    %113 = vector.shape_cast %112 : vector<8xf32> to vector<8x1xf32>
    %cst_65 = arith.constant 2.560000e+02 : f32
    %114 = vector.broadcast %cst_65 : f32 to vector<8x1xf32>
    %115 = arith.divf %113, %114 : vector<8x1xf32>
    %cst_66 = arith.constant 9.99999974E-6 : f32
    %116 = vector.broadcast %cst_66 : f32 to vector<8x1xf32>
    %117 = arith.addf %115, %116 : vector<8x1xf32>
    %118 = math.rsqrt %117 : vector<8x1xf32>
    %119 = vector.broadcast %118 : vector<8x1xf32> to vector<8x256xf32>
    %120 = arith.mulf %110, %119 : vector<8x256xf32>
    %121 = vector.broadcast %102 : vector<1x256xf32> to vector<8x256xf32>
    %122 = arith.mulf %120, %121 : vector<8x256xf32>
    %123 = vector.broadcast %104 : vector<1x256xf32> to vector<8x256xf32>
    %124 = arith.addf %122, %123 : vector<8x256xf32>
    %c1 = arith.constant 1 : index
    %c0_67 = arith.constant 0 : index
    %c0_68 = arith.constant 0 : index
    %125 = vector.load %arg4[%c1, %c0_67, %c0_68] : memref<2x256x768xf32, #tpu.memory_space<vmem>>, vector<1x256x768xf32>
    %126 = vector.shape_cast %125 : vector<1x256x768xf32> to vector<256x768xf32>
    %cst_69 = arith.constant dense<0.000000e+00> : vector<8x768xf32>
    %127 = tpu.matmul %124, %126, %cst_69 {dimension_numbers = #tpu.dot_dimension_numbers<[1], [0], [0], [1], [0, 0, 1, 1], [], []>} : vector<8x256xf32>, vector<256x768xf32>, vector<8x768xf32> -> vector<8x768xf32>
    %c1_70 = arith.constant 1 : index
    %c0_71 = arith.constant 0 : index
    %c0_72 = arith.constant 0 : index
    %128 = vector.load %arg5[%c1_70, %c0_71, %c0_72] : memref<2x1x768xf32, #tpu.memory_space<vmem>>, vector<1x1x768xf32>
    %129 = vector.shape_cast %128 : vector<1x1x768xf32> to vector<1x768xf32>
    %130 = vector.broadcast %129 : vector<1x768xf32> to vector<8x768xf32>
    %131 = arith.addf %127, %130 : vector<8x768xf32>
    %132 = vector.extract_strided_slice %131 {offsets = [0, 0], sizes = [8, 256], strides = [1, 1]} : vector<8x768xf32> to vector<8x256xf32>
    %133 = vector.extract_strided_slice %131 {offsets = [0, 256], sizes = [8, 256], strides = [1, 1]} : vector<8x768xf32> to vector<8x256xf32>
    %134 = vector.extract_strided_slice %131 {offsets = [0, 512], sizes = [8, 256], strides = [1, 1]} : vector<8x768xf32> to vector<8x256xf32>
    %c1_73 = arith.constant 1 : index
    %c0_74 = arith.constant 0 : index
    %c0_75 = arith.constant 0 : index
    %135 = vector.load %arg6[%c1_73, %c0_74, %c0_75] : memref<2x256x256xf32, #tpu.memory_space<vmem>>, vector<1x256x256xf32>
    %136 = vector.shape_cast %135 : vector<1x256x256xf32> to vector<256x256xf32>
    %137 = vector.extract_strided_slice %132 {offsets = [0, 0], sizes = [8, 128], strides = [1, 1]} : vector<8x256xf32> to vector<8x128xf32>
    %138 = vector.extract_strided_slice %133 {offsets = [0, 0], sizes = [8, 128], strides = [1, 1]} : vector<8x256xf32> to vector<8x128xf32>
    %139 = vector.extract_strided_slice %134 {offsets = [0, 0], sizes = [8, 128], strides = [1, 1]} : vector<8x256xf32> to vector<8x128xf32>
    %cst_76 = arith.constant dense<0.000000e+00> : vector<8x8xf32>
    %140 = tpu.matmul %137, %138, %cst_76 {dimension_numbers = #tpu.dot_dimension_numbers<[1], [1], [0], [0], [0, 0, 1, 0], [], []>} : vector<8x128xf32>, vector<8x128xf32>, vector<8x8xf32> -> vector<8x8xf32>
    %cst_77 = arith.constant 0.0883883461 : f32
    %141 = vector.broadcast %cst_77 : f32 to vector<8x8xf32>
    %142 = arith.mulf %140, %141 : vector<8x8xf32>
    %143 = arith.addf %142, %1 : vector<8x8xf32>
    %cst_78 = arith.constant dense<0xFF800000> : vector<8xf32>
    %144 = vector.multi_reduction <maximumf>, %143, %cst_78 [1] : vector<8x8xf32> to vector<8xf32>
    %145 = vector.shape_cast %144 : vector<8xf32> to vector<8x1xf32>
    %146 = vector.broadcast %145 : vector<8x1xf32> to vector<8x8xf32>
    %147 = arith.subf %143, %146 : vector<8x8xf32>
    %148 = math.exp %147 : vector<8x8xf32>
    %cst_79 = arith.constant dense<0.000000e+00> : vector<8xf32>
    %149 = vector.multi_reduction <add>, %148, %cst_79 [1] : vector<8x8xf32> to vector<8xf32>
    %150 = vector.shape_cast %149 : vector<8xf32> to vector<8x1xf32>
    %151 = vector.broadcast %150 : vector<8x1xf32> to vector<8x8xf32>
    %152 = arith.divf %148, %151 : vector<8x8xf32>
    %cst_80 = arith.constant dense<0.000000e+00> : vector<8x128xf32>
    %153 = tpu.matmul %152, %139, %cst_80 {dimension_numbers = #tpu.dot_dimension_numbers<[1], [0], [0], [1], [0, 0, 1, 1], [], []>} : vector<8x8xf32>, vector<8x128xf32>, vector<8x128xf32> -> vector<8x128xf32>
    %154 = vector.extract_strided_slice %136 {offsets = [0, 0], sizes = [128, 256], strides = [1, 1]} : vector<256x256xf32> to vector<128x256xf32>
    %cst_81 = arith.constant dense<0.000000e+00> : vector<8x256xf32>
    %155 = tpu.matmul %153, %154, %cst_81 {dimension_numbers = #tpu.dot_dimension_numbers<[1], [0], [0], [1], [0, 0, 1, 1], [], []>} : vector<8x128xf32>, vector<128x256xf32>, vector<8x256xf32> -> vector<8x256xf32>
    %156 = vector.extract_strided_slice %132 {offsets = [0, 128], sizes = [8, 128], strides = [1, 1]} : vector<8x256xf32> to vector<8x128xf32>
    %157 = vector.extract_strided_slice %133 {offsets = [0, 128], sizes = [8, 128], strides = [1, 1]} : vector<8x256xf32> to vector<8x128xf32>
    %158 = vector.extract_strided_slice %134 {offsets = [0, 128], sizes = [8, 128], strides = [1, 1]} : vector<8x256xf32> to vector<8x128xf32>
    %cst_82 = arith.constant dense<0.000000e+00> : vector<8x8xf32>
    %159 = tpu.matmul %156, %157, %cst_82 {dimension_numbers = #tpu.dot_dimension_numbers<[1], [1], [0], [0], [0, 0, 1, 0], [], []>} : vector<8x128xf32>, vector<8x128xf32>, vector<8x8xf32> -> vector<8x8xf32>
    %cst_83 = arith.constant 0.0883883461 : f32
    %160 = vector.broadcast %cst_83 : f32 to vector<8x8xf32>
    %161 = arith.mulf %159, %160 : vector<8x8xf32>
    %162 = arith.addf %161, %1 : vector<8x8xf32>
    %cst_84 = arith.constant dense<0xFF800000> : vector<8xf32>
    %163 = vector.multi_reduction <maximumf>, %162, %cst_84 [1] : vector<8x8xf32> to vector<8xf32>
    %164 = vector.shape_cast %163 : vector<8xf32> to vector<8x1xf32>
    %165 = vector.broadcast %164 : vector<8x1xf32> to vector<8x8xf32>
    %166 = arith.subf %162, %165 : vector<8x8xf32>
    %167 = math.exp %166 : vector<8x8xf32>
    %cst_85 = arith.constant dense<0.000000e+00> : vector<8xf32>
    %168 = vector.multi_reduction <add>, %167, %cst_85 [1] : vector<8x8xf32> to vector<8xf32>
    %169 = vector.shape_cast %168 : vector<8xf32> to vector<8x1xf32>
    %170 = vector.broadcast %169 : vector<8x1xf32> to vector<8x8xf32>
    %171 = arith.divf %167, %170 : vector<8x8xf32>
    %cst_86 = arith.constant dense<0.000000e+00> : vector<8x128xf32>
    %172 = tpu.matmul %171, %158, %cst_86 {dimension_numbers = #tpu.dot_dimension_numbers<[1], [0], [0], [1], [0, 0, 1, 1], [], []>} : vector<8x8xf32>, vector<8x128xf32>, vector<8x128xf32> -> vector<8x128xf32>
    %173 = vector.extract_strided_slice %136 {offsets = [128, 0], sizes = [128, 256], strides = [1, 1]} : vector<256x256xf32> to vector<128x256xf32>
    %cst_87 = arith.constant dense<0.000000e+00> : vector<8x256xf32>
    %174 = tpu.matmul %172, %173, %cst_87 {dimension_numbers = #tpu.dot_dimension_numbers<[1], [0], [0], [1], [0, 0, 1, 1], [], []>} : vector<8x128xf32>, vector<128x256xf32>, vector<8x256xf32> -> vector<8x256xf32>
    %175 = arith.addf %155, %174 : vector<8x256xf32>
    %c1_88 = arith.constant 1 : index
    %c0_89 = arith.constant 0 : index
    %c0_90 = arith.constant 0 : index
    %176 = vector.load %arg7[%c1_88, %c0_89, %c0_90] : memref<2x1x256xf32, #tpu.memory_space<vmem>>, vector<1x1x256xf32>
    %177 = vector.shape_cast %176 : vector<1x1x256xf32> to vector<1x256xf32>
    %178 = vector.broadcast %177 : vector<1x256xf32> to vector<8x256xf32>
    %179 = arith.addf %175, %178 : vector<8x256xf32>
    %180 = arith.addf %124, %179 : vector<8x256xf32>
    %c1_91 = arith.constant 1 : index
    %c0_92 = arith.constant 0 : index
    %c0_93 = arith.constant 0 : index
    %181 = vector.load %arg8[%c1_91, %c0_92, %c0_93] : memref<2x1x256xf32, #tpu.memory_space<vmem>>, vector<1x1x256xf32>
    %182 = vector.shape_cast %181 : vector<1x1x256xf32> to vector<1x256xf32>
    %c1_94 = arith.constant 1 : index
    %c0_95 = arith.constant 0 : index
    %c0_96 = arith.constant 0 : index
    %183 = vector.load %arg9[%c1_94, %c0_95, %c0_96] : memref<2x1x256xf32, #tpu.memory_space<vmem>>, vector<1x1x256xf32>
    %184 = vector.shape_cast %183 : vector<1x1x256xf32> to vector<1x256xf32>
    %cst_97 = arith.constant dense<0.000000e+00> : vector<8xf32>
    %185 = vector.multi_reduction <add>, %180, %cst_97 [1] : vector<8x256xf32> to vector<8xf32>
    %186 = vector.shape_cast %185 : vector<8xf32> to vector<8x1xf32>
    %cst_98 = arith.constant 2.560000e+02 : f32
    %187 = vector.broadcast %cst_98 : f32 to vector<8x1xf32>
    %188 = arith.divf %186, %187 : vector<8x1xf32>
    %189 = vector.broadcast %188 : vector<8x1xf32> to vector<8x256xf32>
    %190 = arith.subf %180, %189 : vector<8x256xf32>
    %191 = arith.mulf %190, %190 : vector<8x256xf32>
    %cst_99 = arith.constant dense<0.000000e+00> : vector<8xf32>
    %192 = vector.multi_reduction <add>, %191, %cst_99 [1] : vector<8x256xf32> to vector<8xf32>
    %193 = vector.shape_cast %192 : vector<8xf32> to vector<8x1xf32>
    %cst_100 = arith.constant 2.560000e+02 : f32
    %194 = vector.broadcast %cst_100 : f32 to vector<8x1xf32>
    %195 = arith.divf %193, %194 : vector<8x1xf32>
    %cst_101 = arith.constant 9.99999974E-6 : f32
    %196 = vector.broadcast %cst_101 : f32 to vector<8x1xf32>
    %197 = arith.addf %195, %196 : vector<8x1xf32>
    %198 = math.rsqrt %197 : vector<8x1xf32>
    %199 = vector.broadcast %198 : vector<8x1xf32> to vector<8x256xf32>
    %200 = arith.mulf %190, %199 : vector<8x256xf32>
    %201 = vector.broadcast %182 : vector<1x256xf32> to vector<8x256xf32>
    %202 = arith.mulf %200, %201 : vector<8x256xf32>
    %203 = vector.broadcast %184 : vector<1x256xf32> to vector<8x256xf32>
    %204 = arith.addf %202, %203 : vector<8x256xf32>
    %c1_102 = arith.constant 1 : index
    %c0_103 = arith.constant 0 : index
    %c0_104 = arith.constant 0 : index
    %205 = vector.load %arg10[%c1_102, %c0_103, %c0_104] : memref<2x256x256xf32, #tpu.memory_space<vmem>>, vector<1x256x256xf32>
    %206 = vector.shape_cast %205 : vector<1x256x256xf32> to vector<256x256xf32>
    %cst_105 = arith.constant dense<0.000000e+00> : vector<8x256xf32>
    %207 = tpu.matmul %204, %206, %cst_105 {dimension_numbers = #tpu.dot_dimension_numbers<[1], [0], [0], [1], [0, 0, 1, 1], [], []>} : vector<8x256xf32>, vector<256x256xf32>, vector<8x256xf32> -> vector<8x256xf32>
    %c1_106 = arith.constant 1 : index
    %c0_107 = arith.constant 0 : index
    %c0_108 = arith.constant 0 : index
    %208 = vector.load %arg11[%c1_106, %c0_107, %c0_108] : memref<2x1x256xf32, #tpu.memory_space<vmem>>, vector<1x1x256xf32>
    %209 = vector.shape_cast %208 : vector<1x1x256xf32> to vector<1x256xf32>
    %210 = vector.broadcast %209 : vector<1x256xf32> to vector<8x256xf32>
    %211 = arith.addf %207, %210 : vector<8x256xf32>
    %cst_109 = arith.constant 0.000000e+00 : f32
    %212 = vector.broadcast %cst_109 : f32 to vector<8x256xf32>
    %213 = arith.maximumf %211, %212 : vector<8x256xf32>
    %c1_110 = arith.constant 1 : index
    %c0_111 = arith.constant 0 : index
    %c0_112 = arith.constant 0 : index
    %214 = vector.load %arg12[%c1_110, %c0_111, %c0_112] : memref<2x256x256xf32, #tpu.memory_space<vmem>>, vector<1x256x256xf32>
    %215 = vector.shape_cast %214 : vector<1x256x256xf32> to vector<256x256xf32>
    %cst_113 = arith.constant dense<0.000000e+00> : vector<8x256xf32>
    %216 = tpu.matmul %213, %215, %cst_113 {dimension_numbers = #tpu.dot_dimension_numbers<[1], [0], [0], [1], [0, 0, 1, 1], [], []>} : vector<8x256xf32>, vector<256x256xf32>, vector<8x256xf32> -> vector<8x256xf32>
    %c1_114 = arith.constant 1 : index
    %c0_115 = arith.constant 0 : index
    %c0_116 = arith.constant 0 : index
    %217 = vector.load %arg13[%c1_114, %c0_115, %c0_116] : memref<2x1x256xf32, #tpu.memory_space<vmem>>, vector<1x1x256xf32>
    %218 = vector.shape_cast %217 : vector<1x1x256xf32> to vector<1x256xf32>
    %219 = vector.broadcast %218 : vector<1x256xf32> to vector<8x256xf32>
    %220 = arith.addf %216, %219 : vector<8x256xf32>
    %221 = arith.addf %204, %220 : vector<8x256xf32>
    %c1_117 = arith.constant 1 : index
    %c0_118 = arith.constant 0 : index
    %c0_119 = arith.constant 0 : index
    %222 = vector.load %arg14[%c1_117, %c0_118, %c0_119] : memref<2x1x256xf32, #tpu.memory_space<vmem>>, vector<1x1x256xf32>
    %223 = vector.shape_cast %222 : vector<1x1x256xf32> to vector<1x256xf32>
    %c1_120 = arith.constant 1 : index
    %c0_121 = arith.constant 0 : index
    %c0_122 = arith.constant 0 : index
    %224 = vector.load %arg15[%c1_120, %c0_121, %c0_122] : memref<2x1x256xf32, #tpu.memory_space<vmem>>, vector<1x1x256xf32>
    %225 = vector.shape_cast %224 : vector<1x1x256xf32> to vector<1x256xf32>
    %cst_123 = arith.constant dense<0.000000e+00> : vector<8xf32>
    %226 = vector.multi_reduction <add>, %221, %cst_123 [1] : vector<8x256xf32> to vector<8xf32>
    %227 = vector.shape_cast %226 : vector<8xf32> to vector<8x1xf32>
    %cst_124 = arith.constant 2.560000e+02 : f32
    %228 = vector.broadcast %cst_124 : f32 to vector<8x1xf32>
    %229 = arith.divf %227, %228 : vector<8x1xf32>
    %230 = vector.broadcast %229 : vector<8x1xf32> to vector<8x256xf32>
    %231 = arith.subf %221, %230 : vector<8x256xf32>
    %232 = arith.mulf %231, %231 : vector<8x256xf32>
    %cst_125 = arith.constant dense<0.000000e+00> : vector<8xf32>
    %233 = vector.multi_reduction <add>, %232, %cst_125 [1] : vector<8x256xf32> to vector<8xf32>
    %234 = vector.shape_cast %233 : vector<8xf32> to vector<8x1xf32>
    %cst_126 = arith.constant 2.560000e+02 : f32
    %235 = vector.broadcast %cst_126 : f32 to vector<8x1xf32>
    %236 = arith.divf %234, %235 : vector<8x1xf32>
    %cst_127 = arith.constant 9.99999974E-6 : f32
    %237 = vector.broadcast %cst_127 : f32 to vector<8x1xf32>
    %238 = arith.addf %236, %237 : vector<8x1xf32>
    %239 = math.rsqrt %238 : vector<8x1xf32>
    %240 = vector.broadcast %239 : vector<8x1xf32> to vector<8x256xf32>
    %241 = arith.mulf %231, %240 : vector<8x256xf32>
    %242 = vector.broadcast %223 : vector<1x256xf32> to vector<8x256xf32>
    %243 = arith.mulf %241, %242 : vector<8x256xf32>
    %244 = vector.broadcast %225 : vector<1x256xf32> to vector<8x256xf32>
    %245 = arith.addf %243, %244 : vector<8x256xf32>
    %246 = arith.addf %3, %245 : vector<8x256xf32>
    %c0_128 = arith.constant 0 : index
    %c0_129 = arith.constant 0 : index
    %247 = vector.load %arg16[%c0_128, %c0_129] : memref<8x256xf32, #tpu.memory_space<vmem>>, vector<8x256xf32>
    tpu.vector_store %arg16[%c0_128, %c0_129], %246 {strides = array<i32>} : memref<8x256xf32, #tpu.memory_space<vmem>>, vector<8x256xf32>,
    return
  }
  func.func @transform_0(%arg0: i32) -> (i32, i32) {
    %c0_i32 = arith.constant 0 : i32
    %c0_i32_0 = arith.constant 0 : i32
    %c0_i32_1 = arith.constant 0 : i32
    return %c0_i32, %c0_i32_0 : i32, i32
  }
  func.func @transform_1(%arg0: i32) -> (i32, i32) {
    %c0_i32 = arith.constant 0 : i32
    %c0_i32_0 = arith.constant 0 : i32
    %c0_i32_1 = arith.constant 0 : i32
    return %c0_i32, %c0_i32_0 : i32, i32
  }
  func.func @transform_2(%arg0: i32) -> (i32, i32) {
    %c0_i32 = arith.constant 0 : i32
    %c0_i32_0 = arith.constant 0 : i32
    %c0_i32_1 = arith.constant 0 : i32
    return %c0_i32, %c0_i32_0 : i32, i32
  }
  func.func @transform_3(%arg0: i32) -> (i32, i32, i32) {
    %c0_i32 = arith.constant 0 : i32
    %c0_i32_0 = arith.constant 0 : i32
    %c0_i32_1 = arith.constant 0 : i32
    %c0_i32_2 = arith.constant 0 : i32
    return %c0_i32, %c0_i32_0, %c0_i32_1 : i32, i32, i32
  }
  func.func @transform_4(%arg0: i32) -> (i32, i32, i32) {
    %c0_i32 = arith.constant 0 : i32
    %c0_i32_0 = arith.constant 0 : i32
    %c0_i32_1 = arith.constant 0 : i32
    %c0_i32_2 = arith.constant 0 : i32
    return %c0_i32, %c0_i32_0, %c0_i32_1 : i32, i32, i32
  }
  func.func @transform_5(%arg0: i32) -> (i32, i32, i32) {
    %c0_i32 = arith.constant 0 : i32
    %c0_i32_0 = arith.constant 0 : i32
    %c0_i32_1 = arith.constant 0 : i32
    %c0_i32_2 = arith.constant 0 : i32
    return %c0_i32, %c0_i32_0, %c0_i32_1 : i32, i32, i32
  }
  func.func @transform_6(%arg0: i32) -> (i32, i32, i32) {
    %c0_i32 = arith.constant 0 : i32
    %c0_i32_0 = arith.constant 0 : i32
    %c0_i32_1 = arith.constant 0 : i32
    %c0_i32_2 = arith.constant 0 : i32
    return %c0_i32, %c0_i32_0, %c0_i32_1 : i32, i32, i32
  }
  func.func @transform_7(%arg0: i32) -> (i32, i32, i32) {
    %c0_i32 = arith.constant 0 : i32
    %c0_i32_0 = arith.constant 0 : i32
    %c0_i32_1 = arith.constant 0 : i32
    %c0_i32_2 = arith.constant 0 : i32
    return %c0_i32, %c0_i32_0, %c0_i32_1 : i32, i32, i32
  }
  func.func @transform_8(%arg0: i32) -> (i32, i32, i32) {
    %c0_i32 = arith.constant 0 : i32
    %c0_i32_0 = arith.constant 0 : i32
    %c0_i32_1 = arith.constant 0 : i32
    %c0_i32_2 = arith.constant 0 : i32
    return %c0_i32, %c0_i32_0, %c0_i32_1 : i32, i32, i32
  }
  func.func @transform_9(%arg0: i32) -> (i32, i32, i32) {
    %c0_i32 = arith.constant 0 : i32
    %c0_i32_0 = arith.constant 0 : i32
    %c0_i32_1 = arith.constant 0 : i32
    %c0_i32_2 = arith.constant 0 : i32
    return %c0_i32, %c0_i32_0, %c0_i32_1 : i32, i32, i32
  }
  func.func @transform_10(%arg0: i32) -> (i32, i32, i32) {
    %c0_i32 = arith.constant 0 : i32
    %c0_i32_0 = arith.constant 0 : i32
    %c0_i32_1 = arith.constant 0 : i32
    %c0_i32_2 = arith.constant 0 : i32
    return %c0_i32, %c0_i32_0, %c0_i32_1 : i32, i32, i32
  }
  func.func @transform_11(%arg0: i32) -> (i32, i32, i32) {
    %c0_i32 = arith.constant 0 : i32
    %c0_i32_0 = arith.constant 0 : i32
    %c0_i32_1 = arith.constant 0 : i32
    %c0_i32_2 = arith.constant 0 : i32
    return %c0_i32, %c0_i32_0, %c0_i32_1 : i32, i32, i32
  }
  func.func @transform_12(%arg0: i32) -> (i32, i32, i32) {
    %c0_i32 = arith.constant 0 : i32
    %c0_i32_0 = arith.constant 0 : i32
    %c0_i32_1 = arith.constant 0 : i32
    %c0_i32_2 = arith.constant 0 : i32
    return %c0_i32, %c0_i32_0, %c0_i32_1 : i32, i32, i32
  }
  func.func @transform_13(%arg0: i32) -> (i32, i32, i32) {
    %c0_i32 = arith.constant 0 : i32
    %c0_i32_0 = arith.constant 0 : i32
    %c0_i32_1 = arith.constant 0 : i32
    %c0_i32_2 = arith.constant 0 : i32
    return %c0_i32, %c0_i32_0, %c0_i32_1 : i32, i32, i32
  }
  func.func @transform_14(%arg0: i32) -> (i32, i32, i32) {
    %c0_i32 = arith.constant 0 : i32
    %c0_i32_0 = arith.constant 0 : i32
    %c0_i32_1 = arith.constant 0 : i32
    %c0_i32_2 = arith.constant 0 : i32
    return %c0_i32, %c0_i32_0, %c0_i32_1 : i32, i32, i32
  }
  func.func @transform_15(%arg0: i32) -> (i32, i32) {
    %c0_i32 = arith.constant 0 : i32
    %c0_i32_0 = arith.constant 0 : i32
    %c0_i32_1 = arith.constant 0 : i32
    return %c0_i32, %c0_i32_0 : i32, i32
  }
}

</mosaic_0001>

<bundles_post_ra>
// kernel: similarity_social_transformer_forward.1
= control target key start
LH: loop header
LB: loop body
LE: loop exit
PB: predicated region body
PF: predicated region fallthrough
CT: control target
= control target key end

     0   :  { %20 = vsyncpa [#allocation3], 0  ;;  %s3941_s0 = inlined_call_operand.vmem [shape: f32[8,128], index: 0, kind: input, shape index: {}]   ;;  %s3942_s1 = inlined_call_operand.hbm [shape: f32[8,8], index: 1, kind: input, shape index: {}]   ;;  %s3943_s2 = inlined_call_operand.vmem [shape: f32[128,256], index: 2, kind: input, shape index: {}]   ;;  %s3944_s3 = inlined_call_operand.hbm [shape: f32[2,256,768], index: 3, kind: input, shape index: {}]   ;;  %s3945_s4 = inlined_call_operand.hbm [shape: f32[2,1,768], index: 4, kind: input, shape index: {}]   ;;  %s3946_s5 = inlined_call_operand.hbm [shape: f32[2,256,256], index: 5, kind: input, shape index: {}]   ;;  %s3947_s6 = inlined_call_operand.hbm [shape: f32[2,1,256], index: 6, kind: input, shape index: {}]   ;;  %s3948_s7 = inlined_call_operand.hbm [shape: f32[2,1,256], index: 7, kind: input, shape index: {}]   ;;  %s3949_s8 = inlined_call_operand.hbm [shape: f32[2,1,256], index: 8, kind: input, shape index: {}]   ;;  %s3950_s9 = inlined_call_operand.hbm [shape: f32[2,256,256], index: 9, kind: input, shape index: {}]   ;;  %s3951_s10 = inlined_call_operand.hbm [shape: f32[2,1,256], index: 10, kind: input, shape index: {}]   ;;  %s3952_s11 = inlined_call_operand.hbm [shape: f32[2,256,256], index: 11, kind: input, shape index: {}]   ;;  %s3953_s12 = inlined_call_operand.hbm [shape: f32[2,1,256], index: 12, kind: input, shape index: {}]   ;;  %s3954_s13 = inlined_call_operand.hbm [shape: f32[2,1,256], index: 13, kind: input, shape index: {}]   ;;  %s3955_s14 = inlined_call_operand.hbm [shape: f32[2,1,256], index: 14, kind: input, shape index: {}]   ;;  %s3956_s15 = inlined_call_operand.vmem [shape: f32[8,256], index: 15, kind: output, shape index: {}]  }
   0x1   :  { %21 = vsyncpa [#allocation5], 0 }
   0x2   :  { %22 = vsyncpa [#allocation8], 0 }
   0x3   :  { %23 = vsyncpa [#allocation11], 0 }
   0x4   :  { %24 = vsyncpa [#allocation14], 0 }
   0x5   :  { %25 = vsyncpa [#allocation17], 0 }
   0x6   :  { %26 = vsyncpa [#allocation20], 0  ;;  %s3454_s18 = smov [#allocation4]  }
   0x7   :  { %s46_s19 = sshll.u32 %s3454_s18, 4  ;;  %s47_s19 = int_to_ptr.vmem [resolvable:$true] %s46_s19 }
   0x8   :  { %s3188_s20 = scalar_lea.vmem %s47_s19, 49152  ;;  %p3193_p1 = scmp.lt.s32.totalorder %s47_s19, %s47_s19 }
   0x9   :  { %p3189_p0 = scmp.ne.s32.totalorder %s47_s19, %s3188_s20  ;;  %p3194_p2 = scmp.lt.s32.totalorder %s3188_s20, %s3188_s20 }
   0xb   :  { %p3195_p3 = por %p3194_p2, %p3193_p1 }
   0xd   :  { %p3196_p4 = pnand %p3195_p3, %p3189_p0 }
   0xf   :  { %3199 = shalt.err (!%p3196_p4)
}
  0x10   :  { %s3455_s21 = smov 768   ;;  %s3456_s22 = smov 48  }
  0x11   :  { %52 = dma.hbm_to_vmem [thread:$0]  %s3944_s3, 49152, %s47_s19, [#allocation5], %s3455_s21, %s3455_s21, %s3456_s22  }
  0x12   :  { %s3457_s25 = smov [#allocation7]  }
  0x13   :  { %s70_s26 = sshll.u32 %s3457_s25, 4  ;;  %s71_s26 = int_to_ptr.vmem [resolvable:$true] %s70_s26 }
  0x14   :  { %s3208_s27 = scalar_lea.vmem %s71_s26, 16384  ;;  %p3213_p6 = scmp.lt.s32.totalorder %s71_s26, %s71_s26 }
  0x15   :  { %p3209_p5 = scmp.ne.s32.totalorder %s71_s26, %s3208_s27  ;;  %p3214_p7 = scmp.lt.s32.totalorder %s3208_s27, %s3208_s27 }
  0x17   :  { %p3215_p8 = por %p3214_p7, %p3213_p6 }
  0x19   :  { %p3216_p9 = pnand %p3215_p8, %p3209_p5 }
  0x1b   :  { %3219 = shalt.err (!%p3216_p9)
}
  0x1c   :  { %s3458_s28 = smov 256   ;;  %s3459_s29 = smov 16  }
  0x1d   :  { %76 = dma.hbm_to_vmem [thread:$0]  %s3946_s5, 16384, %s71_s26, [#allocation8], %s3458_s28, %s3458_s28, %s3459_s29  }
  0x1e   :  { %s3460_s3 = smov [#allocation10]   ;;  %s3461_s18 = smov [#allocation13]  }
  0x1f   :  { %s94_s17 = sshll.u32 %s3460_s3, 4  ;;  %s118_s19 = sshll.u32 %s3461_s18, 4  ;;  %s95_s17 = int_to_ptr.vmem [resolvable:$true] %s94_s17  ;;  %s119_s19 = int_to_ptr.vmem [resolvable:$true] %s118_s19 }
  0x20   :  { %s3228_s20 = scalar_lea.vmem %s95_s17, 64  ;;  %p3233_p11 = scmp.lt.s32.totalorder %s95_s17, %s95_s17 }
  0x21   :  { %p3229_p10 = scmp.ne.s32.totalorder %s95_s17, %s3228_s20  ;;  %p3234_p12 = scmp.lt.s32.totalorder %s3228_s20, %s3228_s20 }
  0x23   :  { %p3235_p13 = por %p3234_p12, %p3233_p11 }
  0x25   :  { %p3236_p0 = pnand %p3235_p13, %p3229_p10 }
  0x27   :  { %3239 = shalt.err (!%p3236_p0)
}
  0x28   :  { %s3462_s21 = smov 32   ;;  %s3463_s22 = smov 2  }
  0x29   :  { %100 = dma.hbm_to_vmem [thread:$0]  %s3948_s7, 64, %s95_s17, [#allocation11], %s3462_s21, %s3462_s21, %s3463_s22  }
  0x2a   :  { %s3248_s24 = scalar_lea.vmem %s119_s19, 16384  ;;  %p3253_p2 = scmp.lt.s32.totalorder %s119_s19, %s119_s19 }
  0x2b   :  { %p3249_p1 = scmp.ne.s32.totalorder %s119_s19, %s3248_s24  ;;  %p3254_p3 = scmp.lt.s32.totalorder %s3248_s24, %s3248_s24 }
  0x2d   :  { %p3255_p4 = por %p3254_p3, %p3253_p2 }
  0x2f   :  { %p3256_p5 = pnand %p3255_p4, %p3249_p1 }
  0x31   :  { %3259 = shalt.err (!%p3256_p5)
}
  0x32   :  { %124 = dma.hbm_to_vmem [thread:$0]  %s3950_s9, 16384, %s119_s19, [#allocation14], %s3458_s28, %s3458_s28, %s3459_s29  }
  0x33   :  { %s3464_s27 = smov [#allocation16]   ;;  %s3465_s16 = smov [#allocation19]  }
  0x34   :  { %s142_s30 = sshll.u32 %s3464_s27, 4  ;;  %s166_s3 = sshll.u32 %s3465_s16, 4  ;;  %s143_s30 = int_to_ptr.vmem [resolvable:$true] %s142_s30  ;;  %s167_s3 = int_to_ptr.vmem [resolvable:$true] %s166_s3 }
  0x35   :  { %s3268_s7 = scalar_lea.vmem %s143_s30, 16384  ;;  %p3273_p7 = scmp.lt.s32.totalorder %s143_s30, %s143_s30 }
  0x36   :  { %p3269_p6 = scmp.ne.s32.totalorder %s143_s30, %s3268_s7  ;;  %p3274_p8 = scmp.lt.s32.totalorder %s3268_s7, %s3268_s7 }
  0x38   :  { %p3275_p9 = por %p3274_p8, %p3273_p7 }
  0x3a   :  { %p3276_p10 = pnand %p3275_p9, %p3269_p6 }
  0x3c   :  { %3279 = shalt.err (!%p3276_p10)
}
  0x3d   :  { %148 = dma.hbm_to_vmem [thread:$0]  %s3952_s11, 16384, %s143_s30, [#allocation17], %s3458_s28, %s3458_s28, %s3459_s29  }
  0x3e   :  { %s3288_s9 = scalar_lea.vmem %s167_s3, 64  ;;  %p3293_p12 = scmp.lt.s32.totalorder %s167_s3, %s167_s3 }
  0x3f   :  { %p3289_p11 = scmp.ne.s32.totalorder %s167_s3, %s3288_s9  ;;  %p3294_p13 = scmp.lt.s32.totalorder %s3288_s9, %s3288_s9 }
  0x41   :  { %p3295_p0 = por %p3294_p13, %p3293_p12 }
  0x43   :  { %p3296_p1 = pnand %p3295_p0, %p3289_p11 }
  0x45   :  { %3299 = shalt.err (!%p3296_p1)
}
  0x46   :  { %172 = dma.hbm_to_vmem [thread:$0]  %s3954_s13, 64, %s167_s3, [#allocation20], %s3462_s21, %s3462_s21, %s3463_s22  }
  0x47   :  { %s3466_s23 = smov [#allocation2]   ;;  %s3467_s24 = smov [#allocation6]  }
  0x48   :  { %s35_s5 = sshll.u32 %s3466_s23, 4  ;;  %s58_s25 = sshll.u32 %s3467_s24, 4  ;;  %s36_s5 = int_to_ptr.vmem [resolvable:$true] %s35_s5  ;;  %s59_s25 = int_to_ptr.vmem [resolvable:$true] %s58_s25 }
  0x49   :  { %s3308_s11 = scalar_lea.vmem %s36_s5, 128  ;;  %p3313_p3 = scmp.lt.s32.totalorder %s36_s5, %s36_s5 }
  0x4a   :  { %p3309_p2 = scmp.ne.s32.totalorder %s36_s5, %s3308_s11  ;;  %p3314_p4 = scmp.lt.s32.totalorder %s3308_s11, %s3308_s11 }
  0x4c   :  { %p3315_p5 = por %p3314_p4, %p3313_p3 }
  0x4e   :  { %p3316_p6 = pnand %p3315_p5, %p3309_p2 }
  0x50   :  { %3319 = shalt.err (!%p3316_p6)
}
  0x51   :  { %38 = dma.hbm_to_vmem [thread:$0]  %s3942_s1, 128, %s36_s5, [#allocation3]  }
  0x52   :  { %s3328_s26 = scalar_lea.vmem %s59_s25, 192  ;;  %p3333_p8 = scmp.lt.s32.totalorder %s59_s25, %s59_s25 }
  0x53   :  { %p3329_p7 = scmp.ne.s32.totalorder %s59_s25, %s3328_s26  ;;  %p3334_p9 = scmp.lt.s32.totalorder %s3328_s26, %s3328_s26 }
  0x55   :  { %p3335_p10 = por %p3334_p9, %p3333_p8 }
  0x57   :  { %p3336_p11 = pnand %p3335_p10, %p3329_p7 }
  0x59   :  { %3339 = shalt.err (!%p3336_p11)
}
  0x5a   :  { %s3468_s13 = smov 96   ;;  %s3469_s27 = smov 6  }
  0x5b   :  { %64 = dma.hbm_to_vmem [thread:$0]  %s3945_s4, 192, %s59_s25, [#allocation5], %s3468_s13, %s3468_s13, %s3469_s27  }
  0x5c   :  { %s3470_s3 = smov [#allocation9]   ;;  %s3471_s17 = smov [#allocation12]  }
  0x5d   :  { %s82_s7 = sshll.u32 %s3470_s3, 4  ;;  %s106_s18 = sshll.u32 %s3471_s17, 4  ;;  %s83_s7 = int_to_ptr.vmem [resolvable:$true] %s82_s7  ;;  %s107_s18 = int_to_ptr.vmem [resolvable:$true] %s106_s18 }
  0x5e   :  { %s3348_s1 = scalar_lea.vmem %s83_s7, 64  ;;  %p3353_p13 = scmp.lt.s32.totalorder %s83_s7, %s83_s7 }
  0x5f   :  { %p3349_p12 = scmp.ne.s32.totalorder %s83_s7, %s3348_s1  ;;  %p3354_p0 = scmp.lt.s32.totalorder %s3348_s1, %s3348_s1 }
  0x61   :  { %p3355_p1 = por %p3354_p0, %p3353_p13 }
  0x63   :  { %p3356_p2 = pnand %p3355_p1, %p3349_p12 }
  0x65   :  { %3359 = shalt.err (!%p3356_p2)
}
  0x66   :  { %88 = dma.hbm_to_vmem [thread:$0]  %s3947_s6, 64, %s83_s7, [#allocation8], %s3462_s21, %s3462_s21, %s3463_s22  }
  0x67   :  { %s3368_s4 = scalar_lea.vmem %s107_s18, 64  ;;  %p3373_p4 = scmp.lt.s32.totalorder %s107_s18, %s107_s18 }
  0x68   :  { %p3369_p3 = scmp.ne.s32.totalorder %s107_s18, %s3368_s4  ;;  %p3374_p5 = scmp.lt.s32.totalorder %s3368_s4, %s3368_s4 }
  0x6a   :  { %p3375_p6 = por %p3374_p5, %p3373_p4 }
  0x6c   :  { %p3376_p7 = pnand %p3375_p6, %p3369_p3 }
  0x6e   :  { %3379 = shalt.err (!%p3376_p7)
}
  0x6f   :  { %112 = dma.hbm_to_vmem [thread:$0]  %s3949_s8, 64, %s107_s18, [#allocation11], %s3462_s21, %s3462_s21, %s3463_s22  }
  0x70   :  { %s3472_s5 = smov [#allocation15]   ;;  %s3473_s25 = smov [#allocation18]  }
  0x71   :  { %s130_s24 = sshll.u32 %s3472_s5, 4  ;;  %s154_s11 = sshll.u32 %s3473_s25, 4  ;;  %s131_s24 = int_to_ptr.vmem [resolvable:$true] %s130_s24  ;;  %s155_s11 = int_to_ptr.vmem [resolvable:$true] %s154_s11 }
  0x72   :  { %s3388_s6 = scalar_lea.vmem %s131_s24, 64  ;;  %p3393_p9 = scmp.lt.s32.totalorder %s131_s24, %s131_s24 }
  0x73   :  { %p3389_p8 = scmp.ne.s32.totalorder %s131_s24, %s3388_s6  ;;  %p3394_p10 = scmp.lt.s32.totalorder %s3388_s6, %s3388_s6 }
  0x75   :  { %p3395_p11 = por %p3394_p10, %p3393_p9 }
  0x77   :  { %p3396_p12 = pnand %p3395_p11, %p3389_p8 }
  0x79   :  { %3399 = shalt.err (!%p3396_p12)
}
  0x7a   :  { %136 = dma.hbm_to_vmem [thread:$0]  %s3951_s10, 64, %s131_s24, [#allocation14], %s3462_s21, %s3462_s21, %s3463_s22  }
  0x7b   :  { %s3408_s8 = scalar_lea.vmem %s155_s11, 64  ;;  %p3413_p0 = scmp.lt.s32.totalorder %s155_s11, %s155_s11 }
  0x7c   :  { %p3409_p13 = scmp.ne.s32.totalorder %s155_s11, %s3408_s8  ;;  %p3414_p1 = scmp.lt.s32.totalorder %s3408_s8, %s3408_s8 }
  0x7e   :  { %p3415_p2 = por %p3414_p1, %p3413_p0 }
  0x80   :  { %p3416_p3 = pnand %p3415_p2, %p3409_p13 }
  0x82   :  { %3419 = shalt.err (!%p3416_p3)
}
  0x83   :  { %160 = dma.hbm_to_vmem [thread:$0]  %s3953_s12, 64, %s155_s11, [#allocation17], %s3462_s21, %s3462_s21, %s3463_s22  }
  0x84   :  { %s3474_s27 = smov [#allocation21]  }
  0x85   :  { %s178_s30 = sshll.u32 %s3474_s27, 4  ;;  %s179_s30 = int_to_ptr.vmem [resolvable:$true] %s178_s30 }
  0x86   :  { %s3428_s16 = scalar_lea.vmem %s179_s30, 64  ;;  %p3433_p5 = scmp.lt.s32.totalorder %s179_s30, %s179_s30 }
  0x87   :  { %p3429_p4 = scmp.ne.s32.totalorder %s179_s30, %s3428_s16  ;;  %p3434_p6 = scmp.lt.s32.totalorder %s3428_s16, %s3428_s16 }
  0x89   :  { %p3435_p7 = por %p3434_p6, %p3433_p5 }
  0x8b   :  { %p3436_p8 = pnand %p3435_p7, %p3429_p4 }
  0x8d   :  { %3439 = shalt.err (!%p3436_p8)
}
  0x8e   :  { %184 = dma.hbm_to_vmem [thread:$0]  %s3955_s14, 64, %s179_s30, [#allocation20], %s3462_s21, %s3462_s21, %s3463_s22  }
  0x8f   :  { %3440 = dma.done.wait [#allocation3], 128  }
  0x90   :  { %3441 = vsyncadd [#allocation3], 4294967168 }
  0x91   :  { %3442 = dma.done.wait [#allocation5], 49344  }
  0x92   :  { %3443 = vsyncadd [#allocation5], 4294917952 }
  0x93   :  { %3444 = dma.done.wait [#allocation8], 16448  }
  0x94   :  { %3445 = vsyncadd [#allocation8], 4294950848 }
  0x95   :  { %3446 = dma.done.wait [#allocation11], 128  }
  0x96   :  { %3447 = vsyncadd [#allocation11], 4294967168 }
  0x97   :  { %3448 = dma.done.wait [#allocation14], 16448  }
  0x98   :  { %3449 = vsyncadd [#allocation14], 4294950848 }
  0x99   :  { %3450 = dma.done.wait [#allocation17], 16448  }
  0x9a   :  { %3451 = vsyncadd [#allocation17], 4294950848 }
  0x9b   :  { %3452 = dma.done.wait [#allocation20], 128  }
  0x9c   :  { %3453 = vsyncadd [#allocation20], 4294967168  ;;  %v3475_v0 = vmov 0.0   ;;  %v257_v1 = vld [vmem:[%s3943_s2 + $0xf8] sm:$0xff]  ;;  %v256_v2 = vld [vmem:[%s3943_s2 + $0xf0] sm:$0xff]  ;;  %vm3476_vm0 = vmmov 0  }
  0x9d   :  { %322 = vmatprep.mubr.f32.mxu0 %v3475_v0  ;;  %v255_v3 = vld [vmem:[%s3943_s2 + $0xe8] sm:$0xff]  ;;  %258 = vmatprep.subr.mxu0 %v257_v1  ;;  %v254_v4 = vld [vmem:[%s3943_s2 + $0xe0] sm:$0xff]  ;;  %v253_v5 = vld [vmem:[%s3943_s2 + $0xd8] sm:$0xff]  ;;  %vm902_vm1 = vcmask 64512  }
  0x9e   :  { %259 = vmatpush1.msra.mxu0 %v256_v2  ;;  %v252_v6 = vld [vmem:[%s3943_s2 + $0xd0] sm:$0xff]  ;;  %v251_v7 = vld [vmem:[%s3943_s2 + $0xc8] sm:$0xff]  ;;  %v250_v8 = vld [vmem:[%s3943_s2 + $0xc0] sm:$0xff] }
  0x9f   :  { %260 = vmatprep.subr.mxu0 %v255_v3  ;;  %v249_v9 = vld [vmem:[%s3943_s2 + $0xb8] sm:$0xff]  ;;  %v248_v10 = vld [vmem:[%s3943_s2 + $0xb0] sm:$0xff]  ;;  %v247_v11 = vld [vmem:[%s3943_s2 + $0xa8] sm:$0xff] }
  0xa0   :  { %261 = vmatpush1.msra.mxu0 %v254_v4  ;;  %v246_v12 = vld [vmem:[%s3943_s2 + $0xa0] sm:$0xff]  ;;  %v245_v13 = vld [vmem:[%s3943_s2 + $0x98] sm:$0xff]  ;;  %v244_v14 = vld [vmem:[%s3943_s2 + $0x90] sm:$0xff] }
  0xa1   :  { %262 = vmatprep.subr.mxu0 %v253_v5  ;;  %v420_v15 = vld [vmem:[#allocation4 + $0x2d8] sm:$0xff]  ;;  %v419_v16 = vld [vmem:[#allocation4 + $0x2d0] sm:$0xff]  ;;  %v243_v17 = vld [vmem:[%s3943_s2 + $0x88] sm:$0xff] }
  0xa2   :  { %263 = vmatpush1.msra.mxu0 %v252_v6  ;;  %553 = vmatprep.subr.mxu1 %v420_v15  ;;  %v414_v18 = vld [vmem:[#allocation4 + $0x2a8] sm:$0xff]  ;;  %v413_v19 = vld [vmem:[#allocation4 + $0x2a0] sm:$0xff]  ;;  %v242_v20 = vld [vmem:[%s3943_s2 + $0x80] sm:$0xff] }
  0xa3   :  { %264 = vmatprep.subr.mxu0 %v251_v7  ;;  %554 = vmatpush1.msra.mxu1 %v419_v16  ;;  %v408_v21 = vld [vmem:[#allocation4 + $0x278] sm:$0xff]  ;;  %v241_v22 = vld [vmem:[%s3943_s2 + $0x78] sm:$0xff]  ;;  %v240_v24 = vld [vmem:[%s3943_s2 + $0x70] sm:$0xff] }
  0xa4   :  { %265 = vmatpush1.msra.mxu0 %v250_v8  ;;  %555 = vmatprep.subr.mxu1 %v414_v18  ;;  %v407_v23 = vld [vmem:[#allocation4 + $0x270] sm:$0xff]  ;;  %v402_v25 = vld [vmem:[#allocation4 + $0x248] sm:$0xff]  ;;  %v239_v26 = vld [vmem:[%s3943_s2 + $0x68] sm:$0xff] }
  0xa5   :  { %266 = vmatprep.subr.mxu0 %v249_v9  ;;  %556 = vmatpush1.msra.mxu1 %v413_v19  ;;  %v401_v27 = vld [vmem:[#allocation4 + $0x240] sm:$0xff]  ;;  %v238_v28 = vld [vmem:[%s3943_s2 + $0x60] sm:$0xff]  ;;  %v237_v30 = vld [vmem:[%s3943_s2 + $0x58] sm:$0xff] }
  0xa6   :  { %267 = vmatpush1.msra.mxu0 %v248_v10  ;;  %557 = vmatprep.subr.mxu1 %v408_v21  ;;  %v396_v29 = vld [vmem:[#allocation4 + $0x218] sm:$0xff]  ;;  %v395_v31 = vld [vmem:[#allocation4 + $0x210] sm:$0xff]  ;;  %v236_v32 = vld [vmem:[%s3943_s2 + $0x50] sm:$0xff] }
  0xa7   :  { %268 = vmatprep.subr.mxu0 %v247_v11  ;;  %558 = vmatpush1.msra.mxu1 %v407_v23  ;;  %v390_v33 = vld [vmem:[#allocation4 + $0x1e8] sm:$0xff]  ;;  %v235_v34 = vld [vmem:[%s3943_s2 + $0x48] sm:$0xff]  ;;  %v234_v36 = vld [vmem:[%s3943_s2 + $0x40] sm:$0xff] }
  0xa8   :  { %269 = vmatpush1.msra.mxu0 %v246_v12  ;;  %559 = vmatprep.subr.mxu1 %v402_v25  ;;  %v389_v35 = vld [vmem:[#allocation4 + $0x1e0] sm:$0xff]  ;;  %v384_v37 = vld [vmem:[#allocation4 + $0x1b8] sm:$0xff]  ;;  %v233_v38 = vld [vmem:[%s3943_s2 + $0x38] sm:$0xff] }
  0xa9   :  { %270 = vmatprep.subr.mxu0 %v245_v13  ;;  %560 = vmatpush1.msra.mxu1 %v401_v27  ;;  %v383_v39 = vld [vmem:[#allocation4 + $0x1b0] sm:$0xff]  ;;  %v232_v40 = vld [vmem:[%s3943_s2 + $0x30] sm:$0xff]  ;;  %v231_v42 = vld [vmem:[%s3943_s2 + $0x28] sm:$0xff] }
  0xaa   :  { %271 = vmatpush1.msra.mxu0 %v244_v14  ;;  %561 = vmatprep.subr.mxu1 %v396_v29  ;;  %v378_v41 = vld [vmem:[#allocation4 + $0x188] sm:$0xff]  ;;  %v377_v43 = vld [vmem:[#allocation4 + $0x180] sm:$0xff]  ;;  %v230_v44 = vld [vmem:[%s3943_s2 + $0x20] sm:$0xff] }
  0xab   :  { %272 = vmatprep.subr.mxu0 %v243_v17  ;;  %562 = vmatpush1.msra.mxu1 %v395_v31  ;;  %v372_v45 = vld [vmem:[#allocation4 + $0x158] sm:$0xff]  ;;  %v229_v46 = vld [vmem:[%s3943_s2 + $0x18] sm:$0xff]  ;;  %v228_v48 = vld [vmem:[%s3943_s2 + $0x10] sm:$0xff] }
  0xac   :  { %273 = vmatpush1.msra.mxu0 %v242_v20  ;;  %563 = vmatprep.subr.mxu1 %v390_v33  ;;  %v371_v47 = vld [vmem:[#allocation4 + $0x150] sm:$0xff]  ;;  %v366_v49 = vld [vmem:[#allocation4 + $0x128] sm:$0xff]  ;;  %v227_v50 = vld [vmem:[%s3943_s2 + $0x8] sm:$0xff] }
  0xad   :  { %274 = vmatprep.subr.mxu0 %v241_v22  ;;  %564 = vmatpush1.msra.mxu1 %v389_v35  ;;  %v365_v51 = vld [vmem:[#allocation4 + $0x120] sm:$0xff]  ;;  %v226_v52 = vld [vmem:[%s3943_s2] sm:$0xff]  ;;  %v422_v55 = vld [vmem:[#allocation4 + $0x2e8] sm:$0xff] }
  0xae   :  { %275 = vmatpush1.msra.mxu0 %v240_v24  ;;  %565 = vmatprep.subr.mxu1 %v384_v37  ;;  %v360_v53 = vld [vmem:[#allocation4 + $0xf8] sm:$0xff]  ;;  %v421_v56 = vld [vmem:[#allocation4 + $0x2e0] sm:$0xff]  ;;  %v359_v57 = vld [vmem:[#allocation4 + $0xf0] sm:$0xff] }
  0xaf   :  { %276 = vmatprep.subr.mxu0 %v239_v26  ;;  %566 = vmatpush1.msra.mxu1 %v383_v39  ;;  %v224_v54 = vld [vmem:[%s3941_s0] sm:$0xff]  ;;  %v354_v59 = vld [vmem:[#allocation4 + $0xc8] sm:$0xff]  ;;  %v415_v60 = vld [vmem:[#allocation4 + $0x2b0] sm:$0xff] }
  0xb0   :  { %277 = vmatpush1.msra.mxu0 %v238_v28  ;;  %567 = vmatprep.subr.mxu1 %v378_v41  ;;  %v416_v58 = vld [vmem:[#allocation4 + $0x2b8] sm:$0xff]  ;;  %v353_v61 = vld [vmem:[#allocation4 + $0xc0] sm:$0xff]  ;;  %v410_v62 = vld [vmem:[#allocation4 + $0x288] sm:$0xff] }
  0xb1   :  { %278 = vmatprep.subr.mxu0 %v237_v30  ;;  %568 = vmatpush1.msra.mxu1 %v377_v43  ;;  %v348_v63 = vld [vmem:[#allocation4 + $0x98] sm:$0xff]  ;;  %v409_v1 = vld [vmem:[#allocation4 + $0x280] sm:$0xff]  ;;  %v347_v2 = vld [vmem:[#allocation4 + $0x90] sm:$0xff] }
  0xb2   :  { %279 = vmatpush1.msra.mxu0 %v236_v32  ;;  %569 = vmatprep.subr.mxu1 %v372_v45  ;;  %v404_v3 = vld [vmem:[#allocation4 + $0x258] sm:$0xff]  ;;  %v342_v4 = vld [vmem:[#allocation4 + $0x68] sm:$0xff]  ;;  %v403_v5 = vld [vmem:[#allocation4 + $0x250] sm:$0xff] }
  0xb3   :  { %280 = vmatprep.subr.mxu0 %v235_v34  ;;  %570 = vmatpush1.msra.mxu1 %v371_v47  ;;  %v341_v6 = vld [vmem:[#allocation4 + $0x60] sm:$0xff]  ;;  %v398_v7 = vld [vmem:[#allocation4 + $0x228] sm:$0xff]  ;;  %v336_v8 = vld [vmem:[#allocation4 + $0x38] sm:$0xff] }
  0xb4   :  { %281 = vmatpush1.msra.mxu0 %v234_v36  ;;  %571 = vmatprep.subr.mxu1 %v366_v49  ;;  %v397_v9 = vld [vmem:[#allocation4 + $0x220] sm:$0xff]  ;;  %v335_v10 = vld [vmem:[#allocation4 + $0x30] sm:$0xff]  ;;  %v392_v11 = vld [vmem:[#allocation4 + $0x1f8] sm:$0xff] }
  0xb5   :  { %282 = vmatprep.subr.mxu0 %v233_v38  ;;  %572 = vmatpush1.msra.mxu1 %v365_v51  ;;  %v330_v12 = vld [vmem:[#allocation4 + $0x8] sm:$0xff]  ;;  %v391_v13 = vld [vmem:[#allocation4 + $0x1f0] sm:$0xff]  ;;  %v329_v14 = vld [vmem:[#allocation4] sm:$0xff] }
  0xb6   :  { %283 = vmatpush1.msra.mxu0 %v232_v40  ;;  %573 = vmatprep.subr.mxu1 %v360_v53  ;;  %v386_v15 = vld [vmem:[#allocation4 + $0x1c8] sm:$0xff]  ;;  %v516_v16 = vld [vmem:[#allocation4 + $0x5d8] sm:$0xff]  ;;  %v385_v17 = vld [vmem:[#allocation4 + $0x1c0] sm:$0xff] }
  0xb7   :  { %284 = vmatprep.subr.mxu0 %v231_v42  ;;  %574 = vmatpush1.msra.mxu1 %v359_v57  ;;  %v515_v18 = vld [vmem:[#allocation4 + $0x5d0] sm:$0xff]  ;;  %v380_v19 = vld [vmem:[#allocation4 + $0x198] sm:$0xff]  ;;  %v510_v20 = vld [vmem:[#allocation4 + $0x5a8] sm:$0xff] }
  0xb8   :  { %285 = vmatpush1.msra.mxu0 %v230_v44  ;;  %575 = vmatprep.subr.mxu1 %v354_v59  ;;  %v379_v21 = vld [vmem:[#allocation4 + $0x190] sm:$0xff]  ;;  %v509_v22 = vld [vmem:[#allocation4 + $0x5a0] sm:$0xff]  ;;  %v374_v23 = vld [vmem:[#allocation4 + $0x168] sm:$0xff] }
  0xb9   :  { %286 = vmatprep.subr.mxu0 %v229_v46  ;;  %576 = vmatpush1.msra.mxu1 %v353_v61  ;;  %v504_v24 = vld [vmem:[#allocation4 + $0x578] sm:$0xff]  ;;  %v373_v25 = vld [vmem:[#allocation4 + $0x160] sm:$0xff]  ;;  %v503_v26 = vld [vmem:[#allocation4 + $0x570] sm:$0xff] }
  0xba   :  { %287 = vmatpush1.msra.mxu0 %v228_v48  ;;  %577 = vmatprep.subr.mxu1 %v348_v63  ;;  %v368_v27 = vld [vmem:[#allocation4 + $0x138] sm:$0xff]  ;;  %v498_v28 = vld [vmem:[#allocation4 + $0x548] sm:$0xff]  ;;  %v367_v29 = vld [vmem:[#allocation4 + $0x130] sm:$0xff] }
  0xbb   :  { %288 = vmatprep.subr.mxu0 %v227_v50  ;;  %578 = vmatpush1.msra.mxu1 %v347_v2  ;;  %v497_v30 = vld [vmem:[#allocation4 + $0x540] sm:$0xff]  ;;  %v362_v31 = vld [vmem:[#allocation4 + $0x108] sm:$0xff]  ;;  %v492_v32 = vld [vmem:[#allocation4 + $0x518] sm:$0xff] }
  0xbc   :  { %289 = vmatpush1.msra.mxu0 %v226_v52  ;;  %579 = vmatprep.subr.mxu1 %v342_v4  ;;  %v361_v33 = vld [vmem:[#allocation4 + $0x100] sm:$0xff]  ;;  %v491_v34 = vld [vmem:[#allocation4 + $0x510] sm:$0xff]  ;;  %v356_v35 = vld [vmem:[#allocation4 + $0xd8] sm:$0xff] }
  0xbd   :  { %323 = vmatmul.mubr.f32.vlgmr.msra.gmra.mxu0 %v224_v54  ;;  %624 = vmatprep.subr.mxu0 %v422_v55  ;;  %v486_v36 = vld [vmem:[#allocation4 + $0x4e8] sm:$0xff]  ;;  %v355_v37 = vld [vmem:[#allocation4 + $0xd0] sm:$0xff]  ;;  %v485_v38 = vld [vmem:[#allocation4 + $0x4e0] sm:$0xff] }
  0xbe   :  { %625 = vmatpush1.msra.mxu0 %v421_v56  ;;  %580 = vmatpush1.msra.mxu1 %v341_v6  ;;  %v350_v39 = vld [vmem:[#allocation4 + $0xa8] sm:$0xff]  ;;  %v480_v40 = vld [vmem:[#allocation4 + $0x4b8] sm:$0xff]  ;;  %v349_v41 = vld [vmem:[#allocation4 + $0xa0] sm:$0xff] }
  0xbf   :  { %626 = vmatprep.subr.mxu0 %v416_v58  ;;  %581 = vmatprep.subr.mxu1 %v336_v8  ;;  %v479_v42 = vld [vmem:[#allocation4 + $0x4b0] sm:$0xff]  ;;  %v344_v43 = vld [vmem:[#allocation4 + $0x78] sm:$0xff]  ;;  %v474_v44 = vld [vmem:[#allocation4 + $0x488] sm:$0xff] }
  0xc0   :  { %627 = vmatpush1.msra.mxu0 %v415_v60  ;;  %582 = vmatpush1.msra.mxu1 %v335_v10  ;;  %v343_v45 = vld [vmem:[#allocation4 + $0x70] sm:$0xff]  ;;  %v473_v46 = vld [vmem:[#allocation4 + $0x480] sm:$0xff]  ;;  %v338_v47 = vld [vmem:[#allocation4 + $0x48] sm:$0xff] }
  0xc1   :  { %628 = vmatprep.subr.mxu0 %v410_v62  ;;  %583 = vmatprep.subr.mxu1 %v330_v12  ;;  %v468_v48 = vld [vmem:[#allocation4 + $0x458] sm:$0xff]  ;;  %v337_v49 = vld [vmem:[#allocation4 + $0x40] sm:$0xff]  ;;  %v467_v50 = vld [vmem:[#allocation4 + $0x450] sm:$0xff] }
  0xc2   :  { %629 = vmatpush1.msra.mxu0 %v409_v1  ;;  %584 = vmatpush1.msra.mxu1 %v329_v14  ;;  %v332_v51 = vld [vmem:[#allocation4 + $0x18] sm:$0xff]  ;;  %v462_v52 = vld [vmem:[#allocation4 + $0x428] sm:$0xff]  ;;  %v331_v53 = vld [vmem:[#allocation4 + $0x10] sm:$0xff] }
  0xc3   :  { %630 = vmatprep.subr.mxu0 %v404_v3  ;;  %585 = vmatprep.subr.mxu1 %v516_v16  ;;  %v461_v54 = vld [vmem:[#allocation4 + $0x420] sm:$0xff]  ;;  %v518_v55 = vld [vmem:[#allocation4 + $0x5e8] sm:$0xff]  ;;  %v456_v56 = vld [vmem:[#allocation4 + $0x3f8] sm:$0xff] }
  0xc4   :  { %631 = vmatpush1.msra.mxu0 %v403_v5  ;;  %586 = vmatpush2.msra.mxu1 %v515_v18  ;;  %v517_v57 = vld [vmem:[#allocation4 + $0x5e0] sm:$0xff]  ;;  %v455_v58 = vld [vmem:[#allocation4 + $0x3f0] sm:$0xff]  ;;  %v512_v59 = vld [vmem:[#allocation4 + $0x5b8] sm:$0xff] }
  0xc5   :  { %632 = vmatprep.subr.mxu0 %v398_v7  ;;  %587 = vmatprep.subr.mxu1 %v510_v20  ;;  %v450_v60 = vld [vmem:[#allocation4 + $0x3c8] sm:$0xff]  ;;  %v511_v61 = vld [vmem:[#allocation4 + $0x5b0] sm:$0xff]  ;;  %v449_v62 = vld [vmem:[#allocation4 + $0x3c0] sm:$0xff] }
  0xc6   :  { %633 = vmatpush1.msra.mxu0 %v397_v9  ;;  %588 = vmatpush2.msra.mxu1 %v509_v22  ;;  %v506_v63 = vld [vmem:[#allocation4 + $0x588] sm:$0xff]  ;;  %v444_v1 = vld [vmem:[#allocation4 + $0x398] sm:$0xff]  ;;  %v505_v2 = vld [vmem:[#allocation4 + $0x580] sm:$0xff] }
  0xc7   :  { %634 = vmatprep.subr.mxu0 %v392_v11  ;;  %589 = vmatprep.subr.mxu1 %v504_v24  ;;  %v443_v3 = vld [vmem:[#allocation4 + $0x390] sm:$0xff]  ;;  %v500_v4 = vld [vmem:[#allocation4 + $0x558] sm:$0xff]  ;;  %v438_v5 = vld [vmem:[#allocation4 + $0x368] sm:$0xff] }
  0xc8   :  { %635 = vmatpush1.msra.mxu0 %v391_v13  ;;  %590 = vmatpush2.msra.mxu1 %v503_v26  ;;  %v499_v6 = vld [vmem:[#allocation4 + $0x550] sm:$0xff]  ;;  %v437_v7 = vld [vmem:[#allocation4 + $0x360] sm:$0xff]  ;;  %v494_v8 = vld [vmem:[#allocation4 + $0x528] sm:$0xff] }
  0xc9   :  { %636 = vmatprep.subr.mxu0 %v386_v15  ;;  %591 = vmatprep.subr.mxu1 %v498_v28  ;;  %v432_v9 = vld [vmem:[#allocation4 + $0x338] sm:$0xff]  ;;  %v493_v10 = vld [vmem:[#allocation4 + $0x520] sm:$0xff]  ;;  %v487_v12 = vld [vmem:[#allocation4 + $0x4f0] sm:$0xff] }
  0xca   :  { %637 = vmatpush1.msra.mxu0 %v385_v17  ;;  %592 = vmatpush2.msra.mxu1 %v497_v30  ;;  %v488_v11 = vld [vmem:[#allocation4 + $0x4f8] sm:$0xff]  ;;  %v482_v13 = vld [vmem:[#allocation4 + $0x4c8] sm:$0xff]  ;;  %v481_v14 = vld [vmem:[#allocation4 + $0x4c0] sm:$0xff] }
  0xcb   :  { %638 = vmatprep.subr.mxu0 %v380_v19  ;;  %593 = vmatprep.subr.mxu1 %v492_v32  ;;  %v476_v15 = vld [vmem:[#allocation4 + $0x498] sm:$0xff]  ;;  %v475_v16 = vld [vmem:[#allocation4 + $0x490] sm:$0xff]  ;;  %v470_v17 = vld [vmem:[#allocation4 + $0x468] sm:$0xff] }
  0xcc   :  { %639 = vmatpush1.msra.mxu0 %v379_v21  ;;  %594 = vmatpush2.msra.mxu1 %v491_v34  ;;  %v469_v18 = vld [vmem:[#allocation4 + $0x460] sm:$0xff]  ;;  %v464_v19 = vld [vmem:[#allocation4 + $0x438] sm:$0xff]  ;;  %v463_v20 = vld [vmem:[#allocation4 + $0x430] sm:$0xff] }
  0xcd   :  { %640 = vmatprep.subr.mxu0 %v374_v23  ;;  %595 = vmatprep.subr.mxu1 %v486_v36  ;;  %v458_v21 = vld [vmem:[#allocation4 + $0x408] sm:$0xff]  ;;  %v457_v22 = vld [vmem:[#allocation4 + $0x400] sm:$0xff]  ;;  %v452_v23 = vld [vmem:[#allocation4 + $0x3d8] sm:$0xff] }
  0xce   :  { %641 = vmatpush1.msra.mxu0 %v373_v25  ;;  %596 = vmatpush2.msra.mxu1 %v485_v38  ;;  %v451_v24 = vld [vmem:[#allocation4 + $0x3d0] sm:$0xff]  ;;  %v446_v25 = vld [vmem:[#allocation4 + $0x3a8] sm:$0xff]  ;;  %v445_v26 = vld [vmem:[#allocation4 + $0x3a0] sm:$0xff] }
  0xcf   :  { %642 = vmatprep.subr.mxu0 %v368_v27  ;;  %597 = vmatprep.subr.mxu1 %v480_v40  ;;  %v440_v27 = vld [vmem:[#allocation4 + $0x378] sm:$0xff]  ;;  %v439_v28 = vld [vmem:[#allocation4 + $0x370] sm:$0xff]  ;;  %v434_v30 = vld [vmem:[#allocation4 + $0x348] sm:$0xff] }
  0xd0   :  { %643 = vmatpush1.msra.mxu0 %v367_v29  ;;  %598 = vmatpush2.msra.mxu1 %v479_v42  ;;  %v431_v29 = vld [vmem:[#allocation4 + $0x330] sm:$0xff]  ;;  %v433_v32 = vld [vmem:[#allocation4 + $0x340] sm:$0xff]  ;;  %v428_v34 = vld [vmem:[#allocation4 + $0x318] sm:$0xff] }
  0xd1   :  { %644 = vmatprep.subr.mxu0 %v362_v31  ;;  %599 = vmatprep.subr.mxu1 %v474_v44  ;;  %v426_v31 = vld [vmem:[#allocation4 + $0x308] sm:$0xff]  ;;  %v424_v36 = vld [vmem:[#allocation4 + $0x2f8] sm:$0xff] }
  0xd2   :  { %645 = vmatpush1.msra.mxu0 %v361_v33  ;;  %600 = vmatpush2.msra.mxu1 %v473_v46  ;;  %v425_v33 = vld [vmem:[#allocation4 + $0x300] sm:$0xff]  ;;  %v418_v40 = vld [vmem:[#allocation4 + $0x2c8] sm:$0xff]  ;;  %v412_v42 = vld [vmem:[#allocation4 + $0x298] sm:$0xff] }
  0xd3   :  { %646 = vmatprep.subr.mxu0 %v356_v35  ;;  %601 = vmatprep.subr.mxu1 %v468_v48  ;;  %v427_v35 = vld [vmem:[#allocation4 + $0x310] sm:$0xff]  ;;  %v406_v44 = vld [vmem:[#allocation4 + $0x268] sm:$0xff]  ;;  %v400_v46 = vld [vmem:[#allocation4 + $0x238] sm:$0xff] }
  0xd4   :  { %647 = vmatpush1.msra.mxu0 %v355_v37  ;;  %602 = vmatpush2.msra.mxu1 %v467_v50  ;;  %v394_v48 = vld [vmem:[#allocation4 + $0x208] sm:$0xff]  ;;  %v388_v50 = vld [vmem:[#allocation4 + $0x1d8] sm:$0xff] }
  0xd5   :  { %648 = vmatprep.subr.mxu0 %v350_v39  ;;  %603 = vmatprep.subr.mxu1 %v462_v52  ;;  %v423_v39 = vld [vmem:[#allocation4 + $0x2f0] sm:$0xff]  ;;  %v382_v52 = vld [vmem:[#allocation4 + $0x1a8] sm:$0xff] }
  0xd6   :  { %649 = vmatpush1.msra.mxu0 %v349_v41  ;;  %604 = vmatpush2.msra.mxu1 %v461_v54  ;;  %v417_v41 = vld [vmem:[#allocation4 + $0x2c0] sm:$0xff]  ;;  %v376_v54 = vld [vmem:[#allocation4 + $0x178] sm:$0xff] }
  0xd7   :  { %650 = vmatprep.subr.mxu0 %v344_v43  ;;  %605 = vmatprep.subr.mxu1 %v456_v56  ;;  %v411_v43 = vld [vmem:[#allocation4 + $0x290] sm:$0xff]  ;;  %v370_v56 = vld [vmem:[#allocation4 + $0x148] sm:$0xff] }
  0xd8   :  { %651 = vmatpush1.msra.mxu0 %v343_v45  ;;  %606 = vmatpush2.msra.mxu1 %v455_v58  ;;  %v405_v45 = vld [vmem:[#allocation4 + $0x260] sm:$0xff]  ;;  %v364_v58 = vld [vmem:[#allocation4 + $0x118] sm:$0xff] }
  0xd9   :  { %652 = vmatprep.subr.mxu0 %v338_v47  ;;  %607 = vmatprep.subr.mxu1 %v450_v60  ;;  %v399_v47 = vld [vmem:[#allocation4 + $0x230] sm:$0xff]  ;;  %v358_v60 = vld [vmem:[#allocation4 + $0xe8] sm:$0xff] }
  0xda   :  { %653 = vmatpush1.msra.mxu0 %v337_v49  ;;  %608 = vmatpush2.msra.mxu1 %v449_v62  ;;  %v393_v49 = vld [vmem:[#allocation4 + $0x200] sm:$0xff]  ;;  %v352_v62 = vld [vmem:[#allocation4 + $0xb8] sm:$0xff] }
  0xdb   :  { %654 = vmatprep.subr.mxu0 %v332_v51  ;;  %609 = vmatprep.subr.mxu1 %v444_v1  ;;  %v387_v51 = vld [vmem:[#allocation4 + $0x1d0] sm:$0xff]  ;;  %v346_v1 = vld [vmem:[#allocation4 + $0x88] sm:$0xff] }
  0xdc   :  { %655 = vmatpush1.msra.mxu0 %v331_v53  ;;  %610 = vmatpush2.msra.mxu1 %v443_v3  ;;  %v381_v53 = vld [vmem:[#allocation4 + $0x1a0] sm:$0xff]  ;;  %v340_v3 = vld [vmem:[#allocation4 + $0x58] sm:$0xff] }
  0xdd   :  { %656 = vmatprep.subr.mxu0 %v518_v55  ;;  %611 = vmatprep.subr.mxu1 %v438_v5  ;;  %v375_v55 = vld [vmem:[#allocation4 + $0x170] sm:$0xff]  ;;  %v334_v5 = vld [vmem:[#allocation4 + $0x28] sm:$0xff] }
  0xde   :  { %657 = vmatpush2.msra.mxu0 %v517_v57  ;;  %612 = vmatpush2.msra.mxu1 %v437_v7  ;;  %v369_v57 = vld [vmem:[#allocation4 + $0x140] sm:$0xff]  ;;  %v520_v7 = vld [vmem:[#allocation4 + $0x5f8] sm:$0xff] }
  0xdf   :  { %658 = vmatprep.subr.mxu0 %v512_v59  ;;  %613 = vmatprep.subr.mxu1 %v432_v9  ;;  %v363_v59 = vld [vmem:[#allocation4 + $0x110] sm:$0xff]  ;;  %v514_v9 = vld [vmem:[#allocation4 + $0x5c8] sm:$0xff] }
  0xe0   :  { %659 = vmatpush2.msra.mxu0 %v511_v61  ;;  %614 = vmatpush2.msra.mxu1 %v431_v29  ;;  %v357_v61 = vld [vmem:[#allocation4 + $0xe0] sm:$0xff]  ;;  %v454_v29 = vld [vmem:[#allocation4 + $0x3e8] sm:$0xff] }
  0xe1   :  { %660 = vmatprep.subr.mxu0 %v506_v63  ;;  %615 = vmatprep.subr.mxu1 %v426_v31  ;;  %v351_v63 = vld [vmem:[#allocation4 + $0xb0] sm:$0xff]  ;;  %v448_v31 = vld [vmem:[#allocation4 + $0x3b8] sm:$0xff] }
  0xe2   :  { %661 = vmatpush2.msra.mxu0 %v505_v2  ;;  %616 = vmatpush2.msra.mxu1 %v425_v33  ;;  %v345_v2 = vld [vmem:[#allocation4 + $0x80] sm:$0xff]  ;;  %v442_v33 = vld [vmem:[#allocation4 + $0x388] sm:$0xff] }
  0xe3   :  { %662 = vmatprep.subr.mxu0 %v500_v4  ;;  %695 = vmatprep.subr.mxu1 %v424_v36  ;;  %v339_v4 = vld [vmem:[#allocation4 + $0x50] sm:$0xff] }
  0xe4   :  { %663 = vmatpush2.msra.mxu0 %v499_v6  ;;  %v333_v6 = vld [vmem:[#allocation4 + $0x20] sm:$0xff]  ;;  %v435_v36 = vld [vmem:[#allocation4 + $0x350] sm:$0xff] }
  0xe5   :  { %664 = vmatprep.subr.mxu0 %v494_v8  ;;  %v519_v8 = vld [vmem:[#allocation4 + $0x5f0] sm:$0xff] }
  0xe6   :  { %665 = vmatpush2.msra.mxu0 %v493_v10  ;;  %v513_v10 = vld [vmem:[#allocation4 + $0x5c0] sm:$0xff] }
  0xe7   :  { %666 = vmatprep.subr.mxu0 %v488_v11  ;;  %v508_v11 = vld [vmem:[#allocation4 + $0x598] sm:$0xff] }
  0xe8   :  { %667 = vmatpush2.msra.mxu0 %v487_v12  ;;  %v507_v12 = vld [vmem:[#allocation4 + $0x590] sm:$0xff] }
  0xe9   :  { %668 = vmatprep.subr.mxu0 %v482_v13  ;;  %v502_v13 = vld [vmem:[#allocation4 + $0x568] sm:$0xff] }
  0xea   :  { %669 = vmatpush2.msra.mxu0 %v481_v14  ;;  %v501_v14 = vld [vmem:[#allocation4 + $0x560] sm:$0xff] }
  0xeb   :  { %670 = vmatprep.subr.mxu0 %v476_v15  ;;  %v496_v15 = vld [vmem:[#allocation4 + $0x538] sm:$0xff] }
  0xec   :  { %671 = vmatpush2.msra.mxu0 %v475_v16  ;;  %v495_v16 = vld [vmem:[#allocation4 + $0x530] sm:$0xff] }
  0xed   :  { %672 = vmatprep.subr.mxu0 %v470_v17  ;;  %v490_v17 = vld [vmem:[#allocation4 + $0x508] sm:$0xff] }
  0xee   :  { %673 = vmatpush2.msra.mxu0 %v469_v18  ;;  %v489_v18 = vld [vmem:[#allocation4 + $0x500] sm:$0xff] }
  0xef   :  { %674 = vmatprep.subr.mxu0 %v464_v19  ;;  %v484_v19 = vld [vmem:[#allocation4 + $0x4d8] sm:$0xff] }
  0xf0   :  { %675 = vmatpush2.msra.mxu0 %v463_v20  ;;  %v483_v20 = vld [vmem:[#allocation4 + $0x4d0] sm:$0xff] }
  0xf1   :  { %676 = vmatprep.subr.mxu0 %v458_v21  ;;  %v478_v21 = vld [vmem:[#allocation4 + $0x4a8] sm:$0xff] }
  0xf2   :  { %677 = vmatpush2.msra.mxu0 %v457_v22  ;;  %v477_v22 = vld [vmem:[#allocation4 + $0x4a0] sm:$0xff] }
  0xf3   :  { %678 = vmatprep.subr.mxu0 %v452_v23  ;;  %v472_v23 = vld [vmem:[#allocation4 + $0x478] sm:$0xff] }
  0xf4   :  { %679 = vmatpush2.msra.mxu0 %v451_v24  ;;  %v471_v24 = vld [vmem:[#allocation4 + $0x470] sm:$0xff] }
  0xf5   :  { %680 = vmatprep.subr.mxu0 %v446_v25  ;;  %v466_v25 = vld [vmem:[#allocation4 + $0x448] sm:$0xff] }
  0xf6   :  { %681 = vmatpush2.msra.mxu0 %v445_v26  ;;  %v465_v26 = vld [vmem:[#allocation4 + $0x440] sm:$0xff] }
  0xf7   :  { %682 = vmatprep.subr.mxu0 %v440_v27  ;;  %v460_v27 = vld [vmem:[#allocation4 + $0x418] sm:$0xff] }
  0xf8   :  { %683 = vmatpush2.msra.mxu0 %v439_v28  ;;  %v459_v28 = vld [vmem:[#allocation4 + $0x410] sm:$0xff] }
  0xf9   :  { %684 = vmatprep.subr.mxu0 %v434_v30  ;;  %v453_v30 = vld [vmem:[#allocation4 + $0x3e0] sm:$0xff] }
  0xfa   :  { %685 = vmatpush2.msra.mxu0 %v433_v32  ;;  %v447_v32 = vld [vmem:[#allocation4 + $0x3b0] sm:$0xff] }
  0xfb   :  { %686 = vmatprep.subr.mxu0 %v428_v34  ;;  %v441_v34 = vld [vmem:[#allocation4 + $0x380] sm:$0xff] }
  0xfc   :  { %687 = vmatpush2.msra.mxu0 %v427_v35  ;;  %v436_v35 = vld [vmem:[#allocation4 + $0x358] sm:$0xff] }
 0x17d   :  { %v3726_v37 = vpop.f32.mrf.mxu0 }
 0x17f   :  { %v3728_v38 = vpop.f32.mrf.mxu0 }
 0x180   :  { %617 = vmatprep.mubr.f32.mxu1 %v3728_v38  ;;  %688 = vmatprep.mubr.f32.mxu0 %v3728_v38 }
 0x181   :  { %618 = vmatmul.mubr.f32.vlgmr.msra.gmra.mxu1 %v3726_v37  ;;  %689 = vmatmul.mubr.f32.vlgmr.msra.gmra.mxu0 %v3726_v37 }
 0x182   :  { %696 = vmatpush1.msra.mxu1 %v423_v39  ;;  %759 = vmatprep.mubr.f32.mxu1 %v3728_v38  ;;  %v430_v39 = vld [vmem:[#allocation4 + $0x328] sm:$0xff] }
 0x183   :  { %697 = vmatprep.subr.mxu1 %v418_v40  ;;  %1207 = vmatprep.mubr.f32.mxu0 %v3475_v0  ;;  %v429_v40 = vld [vmem:[#allocation4 + $0x320] sm:$0xff] }
 0x184   :  { %698 = vmatpush1.msra.mxu1 %v417_v41  ;;  %v523_v41 = vlaneseq }
 0x185   :  { %699 = vmatprep.subr.mxu1 %v412_v42 }
 0x186   :  { %700 = vmatpush1.msra.mxu1 %v411_v43  ;;  %v3740_v42 = vshrl.u32 %v523_v41, 7  ;;  %v822_v41 = vld [vmem:[#allocation7 + $0x1c0] sm:$0xff] }
 0x187   :  { %701 = vmatprep.subr.mxu1 %v406_v44  ;;  %v521_v44 = vld [vmem:[#allocation6] sm:$0x3f] }
 0x188   :  { %702 = vmatpush1.msra.mxu1 %v405_v45  ;;  %v533_v43 = vsub.s32 2, %v3740_v42  ;;  %v3744_v45 = vsub.s32 0, %v3740_v42 }
 0x189   :  { %703 = vmatprep.subr.mxu1 %v400_v46 }
 0x18a   :  { %704 = vmatpush1.msra.mxu1 %v399_v47  ;;  %v534_v46 = vrot.slane %v521_v44, %v533_v43  ;;  %v526_v47 = vrot.slane %v521_v44, %v3744_v45 }
 0x18b   :  { %705 = vmatprep.subr.mxu1 %v394_v48 }
 0x18c   :  { %706 = vmatpush1.msra.mxu1 %v393_v49 }
 0x18d   :  { %707 = vmatprep.subr.mxu1 %v388_v50 }
 0x18e   :  { %708 = vmatpush1.msra.mxu1 %v387_v51 }
 0x18f   :  { %709 = vmatprep.subr.mxu1 %v382_v52  ;;  %v541_v52 = vsub.s32 4, %v3740_v42 }
 0x190   :  { %710 = vmatpush1.msra.mxu1 %v381_v53 }
 0x191   :  { %711 = vmatprep.subr.mxu1 %v376_v54  ;;  %v542_v53 = vrot.slane %v521_v44, %v541_v52 }
 0x192   :  { %712 = vmatpush1.msra.mxu1 %v375_v55 }
 0x193   :  { %713 = vmatprep.subr.mxu1 %v370_v56 }
 0x194   :  { %714 = vmatpush1.msra.mxu1 %v369_v57 }
 0x195   :  { %715 = vmatprep.subr.mxu1 %v364_v58 }
 0x196   :  { %716 = vmatpush1.msra.mxu1 %v363_v59  ;;  %v225_v59 = vld [vmem:[#allocation2] sm:$0xff] }
 0x197   :  { %717 = vmatprep.subr.mxu1 %v358_v60 }
 0x198   :  { %718 = vmatpush1.msra.mxu1 %v357_v61 }
 0x199   :  { %719 = vmatprep.subr.mxu1 %v352_v62 }
 0x19a   :  { %720 = vmatpush1.msra.mxu1 %v351_v63 }
 0x19b   :  { %721 = vmatprep.subr.mxu1 %v346_v1 }
 0x19c   :  { %722 = vmatpush1.msra.mxu1 %v345_v2 }
 0x19d   :  { %723 = vmatprep.subr.mxu1 %v340_v3 }
 0x19e   :  { %724 = vmatpush1.msra.mxu1 %v339_v4 }
 0x19f   :  { %725 = vmatprep.subr.mxu1 %v334_v5 }
 0x1a0   :  { %726 = vmatpush1.msra.mxu1 %v333_v6 }
 0x1a1   :  { %727 = vmatprep.subr.mxu1 %v520_v7  ;;  %v537_v7 = vsub.s32 3, %v3740_v42 }
 0x1a2   :  { %728 = vmatpush2.msra.mxu1 %v519_v8  ;;  %v3760_v8 = vsub.s32 1, %v3740_v42 }
 0x1a3   :  { %729 = vmatprep.subr.mxu1 %v514_v9  ;;  %v538_v9 = vrot.slane %v521_v44, %v537_v7 }
 0x1a4   :  { %730 = vmatpush2.msra.mxu1 %v513_v10  ;;  %v545_v10 = vsub.s32 5, %v3740_v42  ;;  %v2128_v42 = vld [vmem:[#allocation7 + $0x200] sm:$0xff] }
 0x1a5   :  { %731 = vmatprep.subr.mxu1 %v508_v11 }
 0x1a6   :  { %732 = vmatpush2.msra.mxu1 %v507_v12 }
 0x1a7   :  { %733 = vmatprep.subr.mxu1 %v502_v13  ;;  %v530_v13 = vrot.slane %v521_v44, %v3760_v8 }
 0x1a8   :  { %734 = vmatpush2.msra.mxu1 %v501_v14 }
 0x1a9   :  { %735 = vmatprep.subr.mxu1 %v496_v15 }
 0x1aa   :  { %736 = vmatpush2.msra.mxu1 %v495_v16  ;;  %v546_v16 = vrot.slane %v521_v44, %v545_v10  ;;  %v821_v44 = vld [vmem:[#allocation7 + $0x1b8] sm:$0xff] }
 0x1ab   :  { %737 = vmatprep.subr.mxu1 %v490_v17 }
 0x1ac   :  { %738 = vmatpush2.msra.mxu1 %v489_v18 }
 0x1ad   :  { %739 = vmatprep.subr.mxu1 %v484_v19 }
 0x1ae   :  { %740 = vmatpush2.msra.mxu1 %v483_v20 }
 0x1af   :  { %741 = vmatprep.subr.mxu1 %v478_v21 }
 0x1b0   :  { %742 = vmatpush2.msra.mxu1 %v477_v22 }
 0x1b1   :  { %743 = vmatprep.subr.mxu1 %v472_v23 }
 0x1b2   :  { %744 = vmatpush2.msra.mxu1 %v471_v24 }
 0x1b3   :  { %745 = vmatprep.subr.mxu1 %v466_v25 }
 0x1b4   :  { %746 = vmatpush2.msra.mxu1 %v465_v26 }
 0x1b5   :  { %747 = vmatprep.subr.mxu1 %v460_v27 }
 0x1b6   :  { %748 = vmatpush2.msra.mxu1 %v459_v28 }
 0x1b7   :  { %749 = vmatprep.subr.mxu1 %v454_v29 }
 0x1b8   :  { %750 = vmatpush2.msra.mxu1 %v453_v30 }
 0x1b9   :  { %751 = vmatprep.subr.mxu1 %v448_v31  ;;  %v797_v31 = vld [vmem:[#allocation7 + $0xf8] sm:$0xff] }
 0x1ba   :  { %752 = vmatpush2.msra.mxu1 %v447_v32  ;;  %v829_v32 = vld [vmem:[#allocation7 + $0x1f8] sm:$0xff] }
 0x1bb   :  { %753 = vmatprep.subr.mxu1 %v442_v33  ;;  %v828_v33 = vld [vmem:[#allocation7 + $0x1f0] sm:$0xff]  ;;  %1143 = vmatprep.subr.mxu0 %v829_v32  ;;  %v777_v32 = vld [vmem:[#allocation7 + $0x58] sm:$0xff] }
 0x1bc   :  { %754 = vmatpush2.msra.mxu1 %v441_v34  ;;  %v827_v34 = vld [vmem:[#allocation7 + $0x1e8] sm:$0xff]  ;;  %1144 = vmatpush1.msra.mxu0 %v828_v33  ;;  %v776_v33 = vld [vmem:[#allocation7 + $0x50] sm:$0xff] }
 0x1bd   :  { %755 = vmatprep.subr.mxu1 %v436_v35  ;;  %v826_v35 = vld [vmem:[#allocation7 + $0x1e0] sm:$0xff]  ;;  %1145 = vmatprep.subr.mxu0 %v827_v34  ;;  %v775_v34 = vld [vmem:[#allocation7 + $0x48] sm:$0xff] }
 0x1be   :  { %756 = vmatpush2.msra.mxu1 %v435_v36  ;;  %v825_v36 = vld [vmem:[#allocation7 + $0x1d8] sm:$0xff]  ;;  %1146 = vmatpush1.msra.mxu0 %v826_v35  ;;  %v774_v35 = vld [vmem:[#allocation7 + $0x40] sm:$0xff] }
 0x1bf   :  { %757 = vmatprep.subr.mxu1 %v430_v39  ;;  %v824_v39 = vld [vmem:[#allocation7 + $0x1d0] sm:$0xff]  ;;  %1147 = vmatprep.subr.mxu0 %v825_v36  ;;  %v773_v36 = vld [vmem:[#allocation7 + $0x38] sm:$0xff] }
 0x1c0   :  { %758 = vmatpush2.msra.mxu1 %v429_v40  ;;  %v823_v40 = vld [vmem:[#allocation7 + $0x1c8] sm:$0xff]  ;;  %1148 = vmatpush1.msra.mxu0 %v824_v39  ;;  %v772_v39 = vld [vmem:[#allocation7 + $0x30] sm:$0xff] }
 0x1c1   :  { %760 = vmatmul.mubr.f32.vlgmr.msra.gmra.mxu1 %v3726_v37  ;;  %3092 = vmatprep.subr.mxu1 %v3475_v0 }
 0x1c2   :  { %3094 = vmatprep.mubr.msk.f32.mxu1 %vm3476_vm0, %v3475_v0  ;;  %1149 = vmatprep.subr.mxu0 %v823_v40  ;;  %v771_v40 = vld [vmem:[#allocation7 + $0x28] sm:$0xff] }
 0x1c3   :  { %1150 = vmatpush1.msra.mxu0 %v822_v41  ;;  %v770_v41 = vld [vmem:[#allocation7 + $0x20] sm:$0xff] }
 0x1c4   :  { %1151 = vmatprep.subr.mxu0 %v821_v44  ;;  %v769_v44 = vld [vmem:[#allocation7 + $0x18] sm:$0xff] }
 0x241   :  { %v690_v48 = vpop.f32.mrf.mxu0  ;;  %v619_v49 = vpop.f32.mrf.mxu1 }
 0x242   :  { %v691_v50 = vadd.f32 %v690_v48, %v534_v46  ;;  %v620_v51 = vadd.f32 %v619_v49, %v526_v47  ;;  %v820_v46 = vld [vmem:[#allocation7 + $0x1b0] sm:$0xff]  ;;  %v819_v47 = vld [vmem:[#allocation7 + $0x1a8] sm:$0xff]  ;;  %v818_v48 = vld [vmem:[#allocation7 + $0x1a0] sm:$0xff] }
 0x243   :  { %v621_v54 = vpop.f32.mrf.mxu1  ;;  %v692_v11 = vpop.f32.mrf.mxu0  ;;  %1152 = vmatpush1.msra.mxu0 %v820_v46  ;;  %v817_v49 = vld [vmem:[#allocation7 + $0x198] sm:$0xff]  ;;  %v768_v46 = vld [vmem:[#allocation7 + $0x10] sm:$0xff] }
 0x244   :  { %3093 = vmatpush3.xpose.msra.mxu1 %v691_v50  ;;  %v693_v15 = vadd.f32 %v692_v11, %v538_v9  ;;  %v622_v17 = vadd.f32 %v621_v54, %v530_v13  ;;  %1153 = vmatprep.subr.mxu0 %v819_v47  ;;  %v816_v50 = vld [vmem:[#allocation7 + $0x190] sm:$0xff]  ;;  %v813_v54 = vld [vmem:[#allocation7 + $0x178] sm:$0xff]  ;;  %v795_v13 = vld [vmem:[#allocation7 + $0xe8] sm:$0xff] }
 0x245   :  { %3097 = vmatprep.subr.mxu1 %v3475_v0  ;;  %1154 = vmatpush1.msra.mxu0 %v818_v48  ;;  %v767_v47 = vld [vmem:[#allocation7 + $0x8] sm:$0xff]  ;;  %v766_v48 = vld [vmem:[#allocation7] sm:$0xff] }
 0x246   :  { %1155 = vmatprep.subr.mxu0 %v817_v49  ;;  %v798_v49 = vld [vmem:[#allocation7 + $0x100] sm:$0xff] }
 0x247   :  { %3095 = vmatmul.mubr.f32.vlgmr.msra.gmra.mxu1 %v620_v51  ;;  %v815_v51 = vld [vmem:[#allocation7 + $0x188] sm:$0xff]  ;;  %1156 = vmatpush1.msra.mxu0 %v816_v50 }
 0x248   :  { %3099 = vmatprep.mubr.msk.f32.mxu1 %vm3476_vm0, %v3475_v0  ;;  %1157 = vmatprep.subr.mxu0 %v815_v51 }
 0x281   :  { %v761_v55 = vpop.f32.mrf.mxu1 }
 0x282   :  { %v762_v56 = vadd.f32 %v761_v55, %v542_v53  ;;  %v814_v53 = vld [vmem:[#allocation7 + $0x180] sm:$0xff]  ;;  %v812_v55 = vld [vmem:[#allocation7 + $0x170] sm:$0xff] }
 0x283   :  { %v763_v57 = vpop.f32.mrf.mxu1  ;;  %1158 = vmatpush1.msra.mxu0 %v814_v53  ;;  %v1285_v53 = vld [vmem:[#allocation9] sm:$0x3] }
 0x284   :  { %3098 = vmatpush3.msra.mxu1 %v762_v56  ;;  %v764_v18 = vadd.f32 %v763_v57, %v546_v16  ;;  %v811_v56 = vld [vmem:[#allocation7 + $0x168] sm:$0xff]  ;;  %1159 = vmatprep.subr.mxu0 %v813_v54  ;;  %v810_v57 = vld [vmem:[#allocation7 + $0x160] sm:$0xff]  ;;  %v792_v16 = vld [vmem:[#allocation7 + $0xd0] sm:$0xff] }
 0x285   :  { %3102 = vmatprep.subr.mxu1 %v3475_v0  ;;  %1160 = vmatpush1.msra.mxu0 %v812_v55  ;;  %v1290_v55 = vrot.slane %v1285_v53, %v3744_v45 }
 0x286   :  { %1161 = vmatprep.subr.mxu0 %v811_v56 }
 0x287   :  { %1162 = vmatpush1.msra.mxu0 %v810_v57 }
 0x307   :  { %v896_v58 = vpop.f32.mrf.mxu1 }
 0x308   :  { %v900_v60 = vmul.f32 0.088388346, %v896_v58  ;;  %v809_v58 = vld [vmem:[#allocation7 + $0x158] sm:$0xff] }
 0x309   :  { %v3096_v61 = vpop.f32.mrf.mxu1  ;;  %1163 = vmatprep.subr.mxu0 %v809_v58  ;;  %v1294_v58 = vrot.slane %v1285_v53, %v3760_v8 }
 0x30a   :  { %v901_v62 = vadd.f32 %v900_v60, %v225_v59  ;;  %v807_v60 = vld [vmem:[#allocation7 + $0x148] sm:$0xff]  ;;  %v806_v61 = vld [vmem:[#allocation7 + $0x140] sm:$0xff] }
 0x30c   :  { %v903_v63 = vsel %vm902_vm1, %v901_v62, -inf }
 0x30d   :  { %904 = vmax.xlane.f32.xlu0 %v903_v63  ;;  %v804_v63 = vld [vmem:[#allocation7 + $0x130] sm:$0xff] }
 0x396   :  { %v905_v1 = vpop.xlane.xlu0 %904 }
 0x397   :  { %v906_v2 = vsub.f32 %v901_v62, %v905_v1  ;;  %v805_v62 = vld [vmem:[#allocation7 + $0x138] sm:$0xff]  ;;  %v803_v1 = vld [vmem:[#allocation7 + $0x128] sm:$0xff] }
 0x399   :  { %v907_v3 = vmul.f32 1.442695, %v906_v2  ;;  %v802_v2 = vld [vmem:[#allocation7 + $0x120] sm:$0xff] }
 0x39b   :  { %3155 = vpow2.f32 %v907_v3  ;;  %v801_v3 = vld [vmem:[#allocation7 + $0x118] sm:$0xff] }
 0x3a8   :  { %v3156_v4 = vpop.eup %3155 }
 0x3a9   :  { %v909_v5 = vsel %vm902_vm1, %v3156_v4, 0.0 }
 0x3aa   :  { %910 = vadd.xlane.f32.xlu0 %v909_v5  ;;  %v799_v5 = vld [vmem:[#allocation7 + $0x108] sm:$0xff] }
 0x433   :  { %v911_v6 = vpop.xlane.xlu0 %910 }
 0x434   :  { %3157 = vrcp.f32 %v911_v6 }
 0x441   :  { %v3158_v12 = vpop.eup %3157 }
 0x442   :  { %v913_v14 = vmul.f32 %v3158_v12, %v3156_v4  ;;  %v800_v4 = vld [vmem:[#allocation7 + $0x110] sm:$0xff] }
 0x443   :  { %v796_v12 = vld [vmem:[#allocation7 + $0xf0] sm:$0xff] }
 0x444   :  { %3100 = vmatmul.mubr.msk.f32.vlgmr.msra.gmra.mxu1 %vm902_vm1, %v913_v14  ;;  %v794_v14 = vld [vmem:[#allocation7 + $0xe0] sm:$0xff] }
 0x445   :  { %3103 = vmatpush3.xpose.msra.mxu1 %v693_v15  ;;  %3104 = vmatprep.mubr.msk.f32.mxu1 %vm3476_vm0, %v3475_v0  ;;  %v793_v15 = vld [vmem:[#allocation7 + $0xd8] sm:$0xff] }
 0x446   :  { %3107 = vmatprep.subr.mxu1 %v3475_v0 }
 0x448   :  { %3105 = vmatmul.mubr.f32.vlgmr.msra.gmra.mxu1 %v622_v17  ;;  %v791_v17 = vld [vmem:[#allocation7 + $0xc8] sm:$0xff] }
 0x449   :  { %3108 = vmatpush3.msra.mxu1 %v764_v18  ;;  %3109 = vmatprep.mubr.msk.f32.mxu1 %vm3476_vm0, %v3475_v0  ;;  %v790_v18 = vld [vmem:[#allocation7 + $0xc0] sm:$0xff] }
 0x44a   :  { %1214 = vmatprep.subr.mxu1 %v797_v31  ;;  %v778_v31 = vld [vmem:[#allocation7 + $0x60] sm:$0xff] }
 0x504   :  { %v3774_v19 = vpop.f32.mrf.mxu1 }
 0x506   :  { %v3101_v20 = vpop.f32.mrf.mxu1 }
 0x507   :  { %v789_v20 = vld [vmem:[#allocation7 + $0xb8] sm:$0xff] }
 0x508   :  { %v1053_v21 = vpop.f32.mrf.mxu1 }
 0x509   :  { %v1057_v22 = vmul.f32 0.088388346, %v1053_v21  ;;  %v788_v21 = vld [vmem:[#allocation7 + $0xb0] sm:$0xff] }
 0x50a   :  { %v3106_v23 = vpop.f32.mrf.mxu1 }
 0x50b   :  { %v1058_v24 = vadd.f32 %v1057_v22, %v225_v59  ;;  %v808_v59 = vld [vmem:[#allocation7 + $0x150] sm:$0xff]  ;;  %v787_v22 = vld [vmem:[#allocation7 + $0xa8] sm:$0xff]  ;;  %v786_v23 = vld [vmem:[#allocation7 + $0xa0] sm:$0xff] }
 0x50c   :  { %1164 = vmatpush1.msra.mxu0 %v808_v59 }
 0x50d   :  { %v1059_v25 = vsel %vm902_vm1, %v1058_v24, -inf  ;;  %1165 = vmatprep.subr.mxu0 %v807_v60 }
 0x50e   :  { %1060 = vmax.xlane.f32.xlu1 %v1059_v25  ;;  %1166 = vmatpush1.msra.mxu0 %v806_v61  ;;  %v784_v25 = vld [vmem:[#allocation7 + $0x90] sm:$0xff] }
 0x50f   :  { %1167 = vmatprep.subr.mxu0 %v805_v62 }
 0x510   :  { %1168 = vmatpush1.msra.mxu0 %v804_v63 }
 0x511   :  { %1169 = vmatprep.subr.mxu0 %v803_v1 }
 0x512   :  { %1170 = vmatpush1.msra.mxu0 %v802_v2 }
 0x513   :  { %1171 = vmatprep.subr.mxu0 %v801_v3  ;;  %v1377_v3 = vld [vmem:[#allocation13 + $0xf8] sm:$0xff] }
 0x514   :  { %1172 = vmatpush1.msra.mxu0 %v800_v4  ;;  %v1376_v4 = vld [vmem:[#allocation13 + $0xf0] sm:$0xff] }
 0x515   :  { %1173 = vmatprep.subr.mxu0 %v799_v5  ;;  %v1375_v5 = vld [vmem:[#allocation13 + $0xe8] sm:$0xff] }
 0x516   :  { %1174 = vmatpush1.msra.mxu0 %v798_v49  ;;  %v1404_v49 = vld [vmem:[#allocation13 + $0x1d0] sm:$0xff] }
 0x517   :  { %1422 = vmatprep.subr.mxu0 %v1377_v3  ;;  %v1394_v3 = vld [vmem:[#allocation13 + $0x180] sm:$0xff] }
 0x597   :  { %v1061_v26 = vpop.xlane.xlu1 %1060 }
 0x598   :  { %v1062_v27 = vsub.f32 %v1058_v24, %v1061_v26  ;;  %v785_v24 = vld [vmem:[#allocation7 + $0x98] sm:$0xff]  ;;  %v783_v26 = vld [vmem:[#allocation7 + $0x88] sm:$0xff] }
 0x59a   :  { %v1063_v28 = vmul.f32 1.442695, %v1062_v27  ;;  %v782_v27 = vld [vmem:[#allocation7 + $0x80] sm:$0xff] }
 0x59c   :  { %3159 = vpow2.f32 %v1063_v28  ;;  %v781_v28 = vld [vmem:[#allocation7 + $0x78] sm:$0xff] }
 0x5a9   :  { %v3777_v29 = vpop.eup %3159 }
 0x5aa   :  { %v1065_v30 = vsel %vm902_vm1, %v3777_v29, 0.0 }
 0x5ab   :  { %1066 = vadd.xlane.f32.xlu1 %v1065_v30  ;;  %v779_v30 = vld [vmem:[#allocation7 + $0x68] sm:$0xff] }
 0x634   :  { %v1067_v6 = vpop.xlane.xlu1 %1066 }
 0x635   :  { %3161 = vrcp.f32 %v1067_v6  ;;  %v1374_v6 = vld [vmem:[#allocation13 + $0xe0] sm:$0xff] }
 0x642   :  { %v3162_v9 = vpop.eup %3161 }
 0x643   :  { %v1069_v11 = vmul.f32 %v3162_v9, %v3777_v29  ;;  %v780_v29 = vld [vmem:[#allocation7 + $0x70] sm:$0xff]  ;;  %v1373_v9 = vld [vmem:[#allocation13 + $0xd8] sm:$0xff] }
 0x645   :  { %3110 = vmatmul.mubr.msk.f32.vlgmr.msra.gmra.mxu1 %vm902_vm1, %v1069_v11  ;;  %v1372_v11 = vld [vmem:[#allocation13 + $0xd0] sm:$0xff] }
 0x646   :  { %1215 = vmatpush1.msra.mxu1 %v796_v12  ;;  %1278 = vmatprep.mubr.f32.mxu1 %v3475_v0  ;;  %v1371_v12 = vld [vmem:[#allocation13 + $0xc8] sm:$0xff] }
 0x647   :  { %1216 = vmatprep.subr.mxu1 %v795_v13  ;;  %v1370_v13 = vld [vmem:[#allocation13 + $0xc0] sm:$0xff] }
 0x648   :  { %1217 = vmatpush1.msra.mxu1 %v794_v14  ;;  %v1369_v14 = vld [vmem:[#allocation13 + $0xb8] sm:$0xff] }
 0x649   :  { %1218 = vmatprep.subr.mxu1 %v793_v15  ;;  %v1368_v15 = vld [vmem:[#allocation13 + $0xb0] sm:$0xff] }
 0x64a   :  { %1219 = vmatpush1.msra.mxu1 %v792_v16  ;;  %v1367_v16 = vld [vmem:[#allocation13 + $0xa8] sm:$0xff] }
 0x64b   :  { %1220 = vmatprep.subr.mxu1 %v791_v17  ;;  %v1366_v17 = vld [vmem:[#allocation13 + $0xa0] sm:$0xff] }
 0x64c   :  { %1221 = vmatpush1.msra.mxu1 %v790_v18  ;;  %v1365_v18 = vld [vmem:[#allocation13 + $0x98] sm:$0xff] }
 0x64d   :  { %1222 = vmatprep.subr.mxu1 %v789_v20  ;;  %v1364_v20 = vld [vmem:[#allocation13 + $0x90] sm:$0xff] }
 0x64e   :  { %1223 = vmatpush1.msra.mxu1 %v788_v21  ;;  %v1363_v21 = vld [vmem:[#allocation13 + $0x88] sm:$0xff] }
 0x64f   :  { %1224 = vmatprep.subr.mxu1 %v787_v22  ;;  %v1362_v22 = vld [vmem:[#allocation13 + $0x80] sm:$0xff] }
 0x650   :  { %1225 = vmatpush1.msra.mxu1 %v786_v23  ;;  %v1361_v23 = vld [vmem:[#allocation13 + $0x78] sm:$0xff] }
 0x651   :  { %1226 = vmatprep.subr.mxu1 %v785_v24  ;;  %v1360_v24 = vld [vmem:[#allocation13 + $0x70] sm:$0xff] }
 0x652   :  { %1227 = vmatpush1.msra.mxu1 %v784_v25  ;;  %v1359_v25 = vld [vmem:[#allocation13 + $0x68] sm:$0xff] }
 0x653   :  { %1228 = vmatprep.subr.mxu1 %v783_v26  ;;  %v1358_v26 = vld [vmem:[#allocation13 + $0x60] sm:$0xff] }
 0x654   :  { %1229 = vmatpush1.msra.mxu1 %v782_v27  ;;  %v1357_v27 = vld [vmem:[#allocation13 + $0x58] sm:$0xff] }
 0x655   :  { %1230 = vmatprep.subr.mxu1 %v781_v28  ;;  %v1356_v28 = vld [vmem:[#allocation13 + $0x50] sm:$0xff] }
 0x656   :  { %1231 = vmatpush1.msra.mxu1 %v780_v29  ;;  %v1355_v29 = vld [vmem:[#allocation13 + $0x48] sm:$0xff] }
 0x657   :  { %1232 = vmatprep.subr.mxu1 %v779_v30  ;;  %v1354_v30 = vld [vmem:[#allocation13 + $0x40] sm:$0xff] }
 0x658   :  { %1233 = vmatpush1.msra.mxu1 %v778_v31  ;;  %v1353_v31 = vld [vmem:[#allocation13 + $0x38] sm:$0xff] }
 0x659   :  { %1234 = vmatprep.subr.mxu1 %v777_v32  ;;  %v1352_v32 = vld [vmem:[#allocation13 + $0x30] sm:$0xff] }
 0x65a   :  { %1235 = vmatpush1.msra.mxu1 %v776_v33  ;;  %v1351_v33 = vld [vmem:[#allocation13 + $0x28] sm:$0xff] }
 0x65b   :  { %1236 = vmatprep.subr.mxu1 %v775_v34  ;;  %v1350_v34 = vld [vmem:[#allocation13 + $0x20] sm:$0xff] }
 0x65c   :  { %1237 = vmatpush1.msra.mxu1 %v774_v35  ;;  %v1349_v35 = vld [vmem:[#allocation13 + $0x18] sm:$0xff] }
 0x65d   :  { %1238 = vmatprep.subr.mxu1 %v773_v36  ;;  %v1348_v36 = vld [vmem:[#allocation13 + $0x10] sm:$0xff] }
 0x65e   :  { %1239 = vmatpush1.msra.mxu1 %v772_v39  ;;  %v1347_v39 = vld [vmem:[#allocation13 + $0x8] sm:$0xff] }
 0x65f   :  { %1240 = vmatprep.subr.mxu1 %v771_v40  ;;  %v1346_v40 = vld [vmem:[#allocation13] sm:$0xff] }
 0x660   :  { %1241 = vmatpush1.msra.mxu1 %v770_v41  ;;  %v1409_v41 = vld [vmem:[#allocation13 + $0x1f8] sm:$0xff] }
 0x661   :  { %1242 = vmatprep.subr.mxu1 %v769_v44  ;;  %v1408_v44 = vld [vmem:[#allocation13 + $0x1f0] sm:$0xff] }
 0x662   :  { %1243 = vmatpush1.msra.mxu1 %v768_v46  ;;  %v1407_v46 = vld [vmem:[#allocation13 + $0x1e8] sm:$0xff] }
 0x663   :  { %1244 = vmatprep.subr.mxu1 %v767_v47  ;;  %v1406_v47 = vld [vmem:[#allocation13 + $0x1e0] sm:$0xff] }
 0x664   :  { %1245 = vmatpush1.msra.mxu1 %v766_v48  ;;  %v1405_v48 = vld [vmem:[#allocation13 + $0x1d8] sm:$0xff] }
 0x665   :  { %1279 = vmatmul.mubr.f32.vlgmr.msra.gmra.mxu1 %v3774_v19 }
 0x705   :  { %v1139_v50 = vpop.f32.mrf.mxu1 }
 0x706   :  { %1208 = vmatmul.mubr.f32.vlgmr.msra.gmra.mxu0 %v1139_v50  ;;  %v1403_v50 = vld [vmem:[#allocation13 + $0x1c8] sm:$0xff] }
 0x707   :  { %v3111_v51 = vpop.f32.mrf.mxu1  ;;  %1423 = vmatpush1.msra.mxu0 %v1376_v4  ;;  %v1393_v4 = vld [vmem:[#allocation13 + $0x178] sm:$0xff] }
 0x708   :  { %1424 = vmatprep.subr.mxu0 %v1375_v5  ;;  %v1392_v5 = vld [vmem:[#allocation13 + $0x170] sm:$0xff] }
 0x709   :  { %1425 = vmatpush1.msra.mxu0 %v1374_v6  ;;  %v1391_v6 = vld [vmem:[#allocation13 + $0x168] sm:$0xff] }
 0x70a   :  { %1426 = vmatprep.subr.mxu0 %v1373_v9  ;;  %v1390_v9 = vld [vmem:[#allocation13 + $0x160] sm:$0xff] }
 0x70b   :  { %1427 = vmatpush1.msra.mxu0 %v1372_v11  ;;  %v1389_v11 = vld [vmem:[#allocation13 + $0x158] sm:$0xff] }
 0x70c   :  { %1428 = vmatprep.subr.mxu0 %v1371_v12  ;;  %v1388_v12 = vld [vmem:[#allocation13 + $0x150] sm:$0xff] }
 0x70d   :  { %1429 = vmatpush1.msra.mxu0 %v1370_v13  ;;  %v1387_v13 = vld [vmem:[#allocation13 + $0x148] sm:$0xff] }
 0x70e   :  { %1430 = vmatprep.subr.mxu0 %v1369_v14  ;;  %v1386_v14 = vld [vmem:[#allocation13 + $0x140] sm:$0xff] }
 0x70f   :  { %1431 = vmatpush1.msra.mxu0 %v1368_v15  ;;  %v1385_v15 = vld [vmem:[#allocation13 + $0x138] sm:$0xff] }
 0x710   :  { %1432 = vmatprep.subr.mxu0 %v1367_v16  ;;  %v1384_v16 = vld [vmem:[#allocation13 + $0x130] sm:$0xff] }
 0x711   :  { %1433 = vmatpush1.msra.mxu0 %v1366_v17  ;;  %v1383_v17 = vld [vmem:[#allocation13 + $0x128] sm:$0xff] }
 0x712   :  { %1434 = vmatprep.subr.mxu0 %v1365_v18  ;;  %v1382_v18 = vld [vmem:[#allocation13 + $0x120] sm:$0xff] }
 0x713   :  { %1435 = vmatpush1.msra.mxu0 %v1364_v20  ;;  %v1381_v20 = vld [vmem:[#allocation13 + $0x118] sm:$0xff] }
 0x714   :  { %1436 = vmatprep.subr.mxu0 %v1363_v21  ;;  %v1380_v21 = vld [vmem:[#allocation13 + $0x110] sm:$0xff] }
 0x715   :  { %1437 = vmatpush1.msra.mxu0 %v1362_v22  ;;  %v1379_v22 = vld [vmem:[#allocation13 + $0x108] sm:$0xff] }
 0x716   :  { %1438 = vmatprep.subr.mxu0 %v1361_v23  ;;  %v1378_v23 = vld [vmem:[#allocation13 + $0x100] sm:$0xff] }
 0x717   :  { %1439 = vmatpush1.msra.mxu0 %v1360_v24  ;;  %v1526_v24 = vld [vmem:[#allocation16 + $0xf8] sm:$0xff] }
 0x718   :  { %1440 = vmatprep.subr.mxu0 %v1359_v25  ;;  %v1525_v25 = vld [vmem:[#allocation16 + $0xf0] sm:$0xff]  ;;  %1571 = vmatprep.subr.mxu1 %v1526_v24  ;;  %v1538_v24 = vld [vmem:[#allocation16 + $0x158] sm:$0xff] }
 0x719   :  { %1441 = vmatpush1.msra.mxu0 %v1358_v26  ;;  %v1524_v26 = vld [vmem:[#allocation16 + $0xe8] sm:$0xff]  ;;  %1572 = vmatpush1.msra.mxu1 %v1525_v25  ;;  %v1537_v25 = vld [vmem:[#allocation16 + $0x150] sm:$0xff] }
 0x71a   :  { %1442 = vmatprep.subr.mxu0 %v1357_v27  ;;  %v1523_v27 = vld [vmem:[#allocation16 + $0xe0] sm:$0xff]  ;;  %1573 = vmatprep.subr.mxu1 %v1524_v26  ;;  %v1536_v26 = vld [vmem:[#allocation16 + $0x148] sm:$0xff] }
 0x71b   :  { %1443 = vmatpush1.msra.mxu0 %v1356_v28  ;;  %v1522_v28 = vld [vmem:[#allocation16 + $0xd8] sm:$0xff]  ;;  %1574 = vmatpush1.msra.mxu1 %v1523_v27  ;;  %v1535_v27 = vld [vmem:[#allocation16 + $0x140] sm:$0xff] }
 0x71c   :  { %1444 = vmatprep.subr.mxu0 %v1355_v29  ;;  %v1521_v29 = vld [vmem:[#allocation16 + $0xd0] sm:$0xff]  ;;  %1575 = vmatprep.subr.mxu1 %v1522_v28 }
 0x71d   :  { %1445 = vmatpush1.msra.mxu0 %v1354_v30  ;;  %v1520_v30 = vld [vmem:[#allocation16 + $0xc8] sm:$0xff]  ;;  %1576 = vmatpush1.msra.mxu1 %v1521_v29 }
 0x71e   :  { %1446 = vmatprep.subr.mxu0 %v1353_v31  ;;  %v1519_v31 = vld [vmem:[#allocation16 + $0xc0] sm:$0xff]  ;;  %1577 = vmatprep.subr.mxu1 %v1520_v30 }
 0x71f   :  { %1447 = vmatpush1.msra.mxu0 %v1352_v32  ;;  %v1518_v32 = vld [vmem:[#allocation16 + $0xb8] sm:$0xff]  ;;  %1578 = vmatpush1.msra.mxu1 %v1519_v31  ;;  %v1301_v31 = vld [vmem:[#allocation10] sm:$0x3] }
 0x720   :  { %1448 = vmatprep.subr.mxu0 %v1351_v33  ;;  %v1517_v33 = vld [vmem:[#allocation16 + $0xb0] sm:$0xff]  ;;  %1579 = vmatprep.subr.mxu1 %v1518_v32  ;;  %v1302_v32 = vld [vmem:[#allocation12] sm:$0x3] }
 0x721   :  { %1449 = vmatpush1.msra.mxu0 %v1350_v34  ;;  %v1516_v34 = vld [vmem:[#allocation16 + $0xa8] sm:$0xff]  ;;  %1580 = vmatpush1.msra.mxu1 %v1517_v33  ;;  %v1324_v33 = vrot.slane %v1301_v31, %v3744_v45 }
 0x722   :  { %1450 = vmatprep.subr.mxu0 %v1349_v35  ;;  %v1515_v35 = vld [vmem:[#allocation16 + $0xa0] sm:$0xff]  ;;  %1581 = vmatprep.subr.mxu1 %v1516_v34  ;;  %v1328_v34 = vrot.slane %v1301_v31, %v3760_v8 }
 0x723   :  { %1451 = vmatpush1.msra.mxu0 %v1348_v36  ;;  %v1514_v36 = vld [vmem:[#allocation16 + $0x98] sm:$0xff]  ;;  %1582 = vmatpush1.msra.mxu1 %v1515_v35  ;;  %v1761_v31 = vld [vmem:[#allocation4 + $0x840] sm:$0xff] }
 0x724   :  { %1452 = vmatprep.subr.mxu0 %v1347_v39  ;;  %v1513_v39 = vld [vmem:[#allocation16 + $0x90] sm:$0xff]  ;;  %1583 = vmatprep.subr.mxu1 %v1514_v36 }
 0x725   :  { %v1280_v54 = vpop.f32.mrf.mxu1  ;;  %1453 = vmatpush1.msra.mxu0 %v1346_v40  ;;  %v1512_v40 = vld [vmem:[#allocation16 + $0x88] sm:$0xff]  ;;  %1584 = vmatpush1.msra.mxu1 %v1513_v39  ;;  %v1337_v39 = vrot.slane %v1302_v32, %v3744_v45 }
 0x726   :  { %1454 = vmatprep.subr.mxu0 %v1409_v41  ;;  %v1511_v41 = vld [vmem:[#allocation16 + $0x80] sm:$0xff]  ;;  %1585 = vmatprep.subr.mxu1 %v1512_v40  ;;  %v1341_v40 = vrot.slane %v1302_v32, %v3760_v8  ;;  %v1763_v32 = vld [vmem:[#allocation4 + $0x850] sm:$0xff] }
 0x727   :  { %v1282_v59 = vpop.f32.mrf.mxu1  ;;  %1455 = vmatpush2.msra.mxu0 %v1408_v44  ;;  %v1510_v44 = vld [vmem:[#allocation16 + $0x78] sm:$0xff]  ;;  %1586 = vmatpush1.msra.mxu1 %v1511_v41 }
 0x728   :  { %1456 = vmatprep.subr.mxu0 %v1407_v46  ;;  %v1509_v46 = vld [vmem:[#allocation16 + $0x70] sm:$0xff]  ;;  %1587 = vmatprep.subr.mxu1 %v1510_v44 }
 0x729   :  { %1457 = vmatpush2.msra.mxu0 %v1406_v47  ;;  %v1508_v47 = vld [vmem:[#allocation16 + $0x68] sm:$0xff]  ;;  %1588 = vmatpush1.msra.mxu1 %v1509_v46 }
 0x72a   :  { %1458 = vmatprep.subr.mxu0 %v1405_v48  ;;  %v1507_v48 = vld [vmem:[#allocation16 + $0x60] sm:$0xff]  ;;  %1589 = vmatprep.subr.mxu1 %v1508_v47 }
 0x72b   :  { %1459 = vmatpush2.msra.mxu0 %v1404_v49  ;;  %v1506_v49 = vld [vmem:[#allocation16 + $0x58] sm:$0xff]  ;;  %1590 = vmatpush1.msra.mxu1 %v1507_v48 }
 0x72c   :  { %1460 = vmatprep.subr.mxu0 %v1403_v50  ;;  %v1505_v50 = vld [vmem:[#allocation16 + $0x50] sm:$0xff]  ;;  %1591 = vmatprep.subr.mxu1 %v1506_v49  ;;  %v1534_v49 = vld [vmem:[#allocation16 + $0x138] sm:$0xff] }
 0x72d   :  { %1592 = vmatpush1.msra.mxu1 %v1505_v50  ;;  %v1533_v50 = vld [vmem:[#allocation16 + $0x130] sm:$0xff] }
 0x7c6   :  { %v1209_v56 = vpop.f32.mrf.mxu0 }
 0x7c7   :  { %v1281_v57 = vadd.f32 %v1280_v54, %v1209_v56 }
 0x7c8   :  { %v1211_v60 = vpop.f32.mrf.mxu0 }
 0x7c9   :  { %v1297_v61 = vadd.f32 %v1290_v55, %v1281_v57  ;;  %v1283_v62 = vadd.f32 %v1282_v59, %v1211_v60  ;;  %v1402_v59 = vld [vmem:[#allocation13 + $0x1c0] sm:$0xff]  ;;  %v1401_v60 = vld [vmem:[#allocation13 + $0x1b8] sm:$0xff] }
 0x7ca   :  { %1461 = vmatpush2.msra.mxu0 %v1402_v59  ;;  %v1499_v59 = vld [vmem:[#allocation16 + $0x20] sm:$0xff] }
 0x7cb   :  { %v1298_v63 = vadd.f32 %v1294_v58, %v1283_v62  ;;  %v3788_v19 = vadd.f32 %v1297_v61, %v3726_v37  ;;  %1462 = vmatprep.subr.mxu0 %v1401_v60  ;;  %v1400_v61 = vld [vmem:[#allocation13 + $0x1b0] sm:$0xff]  ;;  %v1399_v62 = vld [vmem:[#allocation13 + $0x1a8] sm:$0xff]  ;;  %v1498_v60 = vld [vmem:[#allocation16 + $0x18] sm:$0xff] }
 0x7cc   :  { %1463 = vmatpush2.msra.mxu0 %v1400_v61  ;;  %v1497_v61 = vld [vmem:[#allocation16 + $0x10] sm:$0xff] }
 0x7cd   :  { %v3791_v1 = vadd.f32 %v1298_v63, %v3728_v38  ;;  %1464 = vmatprep.subr.mxu0 %v1399_v62  ;;  %v1398_v63 = vld [vmem:[#allocation13 + $0x1a0] sm:$0xff]  ;;  %v1496_v62 = vld [vmem:[#allocation16 + $0x8] sm:$0xff] }
 0x7ce   :  { %1465 = vmatpush2.msra.mxu0 %v1398_v63  ;;  %v1495_v63 = vld [vmem:[#allocation16] sm:$0xff] }
 0x7cf   :  { %v1303_v2 = vadd.f32 %v3791_v1, %v3788_v19 }
 0x7d1   :  { %1304 = vadd.xlane.f32.xlu0 %v1303_v2  ;;  %v1395_v2 = vld [vmem:[#allocation13 + $0x188] sm:$0xff] }
 0x85a   :  { %v1305_v51 = vpop.xlane.xlu0 %1304 }
 0x85b   :  { %v1307_v53 = vmul.f32 0.00390625, %v1305_v51  ;;  %v1504_v51 = vld [vmem:[#allocation16 + $0x48] sm:$0xff] }
 0x85c   :  { %1593 = vmatprep.subr.mxu1 %v1504_v51  ;;  %v1532_v51 = vld [vmem:[#allocation16 + $0x128] sm:$0xff] }
 0x85d   :  { %v3796_v54 = vsub.f32 %v3788_v19, %v1307_v53  ;;  %v3799_v55 = vsub.f32 %v3791_v1, %v1307_v53  ;;  %v1397_v19 = vld [vmem:[#allocation13 + $0x198] sm:$0xff]  ;;  %v1396_v1 = vld [vmem:[#allocation13 + $0x190] sm:$0xff]  ;;  %v1503_v53 = vld [vmem:[#allocation16 + $0x40] sm:$0xff] }
 0x85e   :  { %1466 = vmatprep.subr.mxu0 %v1397_v19  ;;  %1594 = vmatpush1.msra.mxu1 %v1503_v53  ;;  %v1558_v19 = vld [vmem:[#allocation16 + $0x1f8] sm:$0xff]  ;;  %v1531_v53 = vld [vmem:[#allocation16 + $0x120] sm:$0xff] }
 0x85f   :  { %v1310_v56 = vmul.f32 %v3796_v54, %v3796_v54  ;;  %v1311_v57 = vmul.f32 %v3799_v55, %v3799_v55  ;;  %1467 = vmatpush2.msra.mxu0 %v1396_v1  ;;  %v1557_v1 = vld [vmem:[#allocation16 + $0x1f0] sm:$0xff] }
 0x860   :  { %1468 = vmatprep.subr.mxu0 %v1395_v2  ;;  %v1556_v2 = vld [vmem:[#allocation16 + $0x1e8] sm:$0xff] }
 0x861   :  { %v1312_v58 = vadd.f32 %v1311_v57, %v1310_v56  ;;  %1469 = vmatpush2.msra.mxu0 %v1394_v3  ;;  %v1502_v56 = vld [vmem:[#allocation16 + $0x38] sm:$0xff]  ;;  %v1501_v57 = vld [vmem:[#allocation16 + $0x30] sm:$0xff]  ;;  %v1555_v3 = vld [vmem:[#allocation16 + $0x1e0] sm:$0xff] }
 0x862   :  { %1470 = vmatprep.subr.mxu0 %v1393_v4  ;;  %1595 = vmatprep.subr.mxu1 %v1502_v56  ;;  %v1554_v4 = vld [vmem:[#allocation16 + $0x1d8] sm:$0xff]  ;;  %v1529_v56 = vld [vmem:[#allocation16 + $0x110] sm:$0xff] }
 0x863   :  { %1313 = vadd.xlane.f32.xlu1 %v1312_v58  ;;  %1471 = vmatpush2.msra.mxu0 %v1392_v5  ;;  %v1500_v58 = vld [vmem:[#allocation16 + $0x28] sm:$0xff]  ;;  %v1553_v5 = vld [vmem:[#allocation16 + $0x1d0] sm:$0xff] }
 0x864   :  { %1472 = vmatprep.subr.mxu0 %v1391_v6  ;;  %1596 = vmatpush1.msra.mxu1 %v1501_v57  ;;  %v1552_v6 = vld [vmem:[#allocation16 + $0x1c8] sm:$0xff] }
 0x865   :  { %1473 = vmatpush2.msra.mxu0 %v1390_v9  ;;  %1597 = vmatprep.subr.mxu1 %v1500_v58  ;;  %v1551_v9 = vld [vmem:[#allocation16 + $0x1c0] sm:$0xff]  ;;  %v1528_v57 = vld [vmem:[#allocation16 + $0x108] sm:$0xff] }
 0x866   :  { %1474 = vmatprep.subr.mxu0 %v1389_v11  ;;  %1598 = vmatpush1.msra.mxu1 %v1499_v59  ;;  %v1550_v11 = vld [vmem:[#allocation16 + $0x1b8] sm:$0xff]  ;;  %v1527_v58 = vld [vmem:[#allocation16 + $0x100] sm:$0xff] }
 0x867   :  { %1475 = vmatpush2.msra.mxu0 %v1388_v12  ;;  %1599 = vmatprep.subr.mxu1 %v1498_v60  ;;  %v1549_v12 = vld [vmem:[#allocation16 + $0x1b0] sm:$0xff] }
 0x868   :  { %1476 = vmatprep.subr.mxu0 %v1387_v13  ;;  %1600 = vmatpush1.msra.mxu1 %v1497_v61  ;;  %v1548_v13 = vld [vmem:[#allocation16 + $0x1a8] sm:$0xff] }
 0x869   :  { %1477 = vmatpush2.msra.mxu0 %v1386_v14  ;;  %1601 = vmatprep.subr.mxu1 %v1496_v62  ;;  %v1547_v14 = vld [vmem:[#allocation16 + $0x1a0] sm:$0xff] }
 0x86a   :  { %1478 = vmatprep.subr.mxu0 %v1385_v15  ;;  %1602 = vmatpush1.msra.mxu1 %v1495_v63  ;;  %v1546_v15 = vld [vmem:[#allocation16 + $0x198] sm:$0xff] }
 0x86b   :  { %1479 = vmatpush2.msra.mxu0 %v1384_v16  ;;  %1603 = vmatprep.subr.mxu1 %v1558_v19  ;;  %v1545_v16 = vld [vmem:[#allocation16 + $0x190] sm:$0xff] }
 0x86c   :  { %1480 = vmatprep.subr.mxu0 %v1383_v17  ;;  %1604 = vmatpush2.msra.mxu1 %v1557_v1  ;;  %v1544_v17 = vld [vmem:[#allocation16 + $0x188] sm:$0xff] }
 0x86d   :  { %1481 = vmatpush2.msra.mxu0 %v1382_v18  ;;  %1605 = vmatprep.subr.mxu1 %v1556_v2  ;;  %v1543_v18 = vld [vmem:[#allocation16 + $0x180] sm:$0xff] }
 0x86e   :  { %1482 = vmatprep.subr.mxu0 %v1381_v20  ;;  %1606 = vmatpush2.msra.mxu1 %v1555_v3  ;;  %v1542_v20 = vld [vmem:[#allocation16 + $0x178] sm:$0xff]  ;;  %v1559_v3 = vld [vmem:[#allocation18] sm:$0x3] }
 0x86f   :  { %1483 = vmatpush2.msra.mxu0 %v1380_v21  ;;  %1607 = vmatprep.subr.mxu1 %v1554_v4  ;;  %v1541_v21 = vld [vmem:[#allocation16 + $0x170] sm:$0xff]  ;;  %v1564_v4 = vrot.slane %v1559_v3, %v3744_v45 }
 0x870   :  { %1484 = vmatprep.subr.mxu0 %v1379_v22  ;;  %1608 = vmatpush2.msra.mxu1 %v1553_v5  ;;  %v1540_v22 = vld [vmem:[#allocation16 + $0x168] sm:$0xff]  ;;  %v1568_v5 = vrot.slane %v1559_v3, %v3760_v8 }
 0x871   :  { %1485 = vmatpush2.msra.mxu0 %v1378_v23  ;;  %1609 = vmatprep.subr.mxu1 %v1552_v6  ;;  %v1539_v23 = vld [vmem:[#allocation16 + $0x160] sm:$0xff]  ;;  %v1714_v3 = vld [vmem:[#allocation4 + $0x6c8] sm:$0xff] }
 0x872   :  { %1610 = vmatpush2.msra.mxu1 %v1551_v9 }
 0x873   :  { %1611 = vmatprep.subr.mxu1 %v1550_v11 }
 0x874   :  { %1612 = vmatpush2.msra.mxu1 %v1549_v12 }
 0x875   :  { %1613 = vmatprep.subr.mxu1 %v1548_v13 }
 0x876   :  { %1614 = vmatpush2.msra.mxu1 %v1547_v14 }
 0x877   :  { %1615 = vmatprep.subr.mxu1 %v1546_v15 }
 0x878   :  { %1616 = vmatpush2.msra.mxu1 %v1545_v16  ;;  %v1780_v16 = vld [vmem:[#allocation4 + $0x8d8] sm:$0xff] }
 0x879   :  { %1617 = vmatprep.subr.mxu1 %v1544_v17  ;;  %v1779_v17 = vld [vmem:[#allocation4 + $0x8d0] sm:$0xff]  ;;  %1914 = vmatprep.subr.mxu0 %v1780_v16  ;;  %v1702_v16 = vld [vmem:[#allocation4 + $0x668] sm:$0xff] }
 0x87a   :  { %1618 = vmatpush2.msra.mxu1 %v1543_v18  ;;  %v1782_v18 = vld [vmem:[#allocation4 + $0x8e8] sm:$0xff] }
 0x87b   :  { %1619 = vmatprep.subr.mxu1 %v1542_v20  ;;  %v1774_v20 = vld [vmem:[#allocation4 + $0x8a8] sm:$0xff] }
 0x87c   :  { %1620 = vmatpush2.msra.mxu1 %v1541_v21  ;;  %v1781_v21 = vld [vmem:[#allocation4 + $0x8e0] sm:$0xff] }
 0x87d   :  { %1621 = vmatprep.subr.mxu1 %v1540_v22  ;;  %v1773_v22 = vld [vmem:[#allocation4 + $0x8a0] sm:$0xff] }
 0x87e   :  { %1622 = vmatpush2.msra.mxu1 %v1539_v23  ;;  %v1776_v23 = vld [vmem:[#allocation4 + $0x8b8] sm:$0xff] }
 0x87f   :  { %1623 = vmatprep.subr.mxu1 %v1538_v24  ;;  %v1768_v24 = vld [vmem:[#allocation4 + $0x878] sm:$0xff] }
 0x880   :  { %1624 = vmatpush2.msra.mxu1 %v1537_v25  ;;  %v1775_v25 = vld [vmem:[#allocation4 + $0x8b0] sm:$0xff] }
 0x881   :  { %1625 = vmatprep.subr.mxu1 %v1536_v26  ;;  %v1767_v26 = vld [vmem:[#allocation4 + $0x870] sm:$0xff] }
 0x882   :  { %1626 = vmatpush2.msra.mxu1 %v1535_v27  ;;  %v1770_v27 = vld [vmem:[#allocation4 + $0x888] sm:$0xff] }
 0x883   :  { %1627 = vmatprep.subr.mxu1 %v1534_v49  ;;  %v1745_v49 = vld [vmem:[#allocation4 + $0x7c0] sm:$0xff] }
 0x884   :  { %1628 = vmatpush2.msra.mxu1 %v1533_v50  ;;  %v1738_v50 = vld [vmem:[#allocation4 + $0x788] sm:$0xff] }
 0x885   :  { %1629 = vmatprep.subr.mxu1 %v1532_v51  ;;  %v1740_v51 = vld [vmem:[#allocation4 + $0x798] sm:$0xff] }
 0x886   :  { %1630 = vmatpush2.msra.mxu1 %v1531_v53  ;;  %v1737_v53 = vld [vmem:[#allocation4 + $0x780] sm:$0xff] }
 0x8ec   :  { %v1314_v28 = vpop.xlane.xlu1 %1313 }
 0x8ed   :  { %v1315_v29 = vmul.f32 0.00390625, %v1314_v28  ;;  %v1762_v28 = vld [vmem:[#allocation4 + $0x848] sm:$0xff] }
 0x8ef   :  { %v1316_v30 = vadd.f32 1e-05, %v1315_v29  ;;  %v1769_v29 = vld [vmem:[#allocation4 + $0x880] sm:$0xff] }
 0x8f1   :  { %3163 = vrsqrt.f32 %v1316_v30  ;;  %v1764_v30 = vld [vmem:[#allocation4 + $0x858] sm:$0xff] }
 0x8fe   :  { %v3164_v35 = vpop.eup %3163 }
 0x8ff   :  { %v1319_v36 = vmul.f32 %v3164_v35, %v3799_v55  ;;  %v1318_v41 = vmul.f32 %v3164_v35, %v3796_v54  ;;  %v1530_v55 = vld [vmem:[#allocation16 + $0x118] sm:$0xff] }
 0x900   :  { %1631 = vmatprep.subr.mxu1 %v1530_v55  ;;  %v1410_v54 = vld [vmem:[#allocation15] sm:$0x3]  ;;  %v1755_v35 = vld [vmem:[#allocation4 + $0x810] sm:$0xff] }
 0x901   :  { %v1332_v44 = vmul.f32 %v1328_v34, %v1319_v36  ;;  %v1331_v46 = vmul.f32 %v1324_v33, %v1318_v41  ;;  %1632 = vmatpush2.msra.mxu1 %v1529_v56  ;;  %v1415_v59 = vrot.slane %v1410_v54, %v3744_v45  ;;  %v1419_v60 = vrot.slane %v1410_v54, %v3760_v8  ;;  %v1756_v33 = vld [vmem:[#allocation4 + $0x818] sm:$0xff]  ;;  %v1758_v34 = vld [vmem:[#allocation4 + $0x828] sm:$0xff]  ;;  %v1757_v36 = vld [vmem:[#allocation4 + $0x820] sm:$0xff] }
 0x902   :  { %1633 = vmatprep.subr.mxu1 %v1528_v57  ;;  %v1749_v41 = vld [vmem:[#allocation4 + $0x7e0] sm:$0xff]  ;;  %v1739_v55 = vld [vmem:[#allocation4 + $0x790] sm:$0xff]  ;;  %v1732_v56 = vld [vmem:[#allocation4 + $0x758] sm:$0xff] }
 0x903   :  { %v1345_v47 = vadd.f32 %v1341_v40, %v1332_v44  ;;  %v1344_v48 = vadd.f32 %v1337_v39, %v1331_v46  ;;  %1634 = vmatpush2.msra.mxu1 %v1527_v58  ;;  %v1750_v39 = vld [vmem:[#allocation4 + $0x7e8] sm:$0xff]  ;;  %v1752_v40 = vld [vmem:[#allocation4 + $0x7f8] sm:$0xff]  ;;  %v1751_v44 = vld [vmem:[#allocation4 + $0x7f0] sm:$0xff] }
 0x904   :  { %1985 = vmatprep.subr.mxu1 %v1782_v18  ;;  %v1744_v46 = vld [vmem:[#allocation4 + $0x7b8] sm:$0xff]  ;;  %v1734_v57 = vld [vmem:[#allocation4 + $0x768] sm:$0xff]  ;;  %v1731_v58 = vld [vmem:[#allocation4 + $0x750] sm:$0xff] }
 0x905   :  { %1486 = vmatprep.mubr.f32.mxu0 %v1345_v47  ;;  %v1733_v54 = vld [vmem:[#allocation4 + $0x760] sm:$0xff] }
 0x906   :  { %1487 = vmatmul.mubr.f32.vlgmr.msra.gmra.mxu0 %v1344_v48  ;;  %v1701_v18 = vld [vmem:[#allocation4 + $0x660] sm:$0xff] }
 0x907   :  { %1915 = vmatpush1.msra.mxu0 %v1779_v17  ;;  %v1704_v17 = vld [vmem:[#allocation4 + $0x678] sm:$0xff] }
 0x908   :  { %1916 = vmatprep.subr.mxu0 %v1774_v20  ;;  %v1703_v20 = vld [vmem:[#allocation4 + $0x670] sm:$0xff] }
 0x909   :  { %1917 = vmatpush1.msra.mxu0 %v1773_v22  ;;  %v1698_v22 = vld [vmem:[#allocation4 + $0x648] sm:$0xff] }
 0x90a   :  { %1918 = vmatprep.subr.mxu0 %v1768_v24  ;;  %v1697_v24 = vld [vmem:[#allocation4 + $0x640] sm:$0xff] }
 0x90b   :  { %1919 = vmatpush1.msra.mxu0 %v1767_v26  ;;  %v1692_v26 = vld [vmem:[#allocation4 + $0x618] sm:$0xff] }
 0x90c   :  { %1920 = vmatprep.subr.mxu0 %v1762_v28  ;;  %v1691_v28 = vld [vmem:[#allocation4 + $0x610] sm:$0xff] }
 0x90d   :  { %1921 = vmatpush1.msra.mxu0 %v1761_v31  ;;  %v1875_v31 = vld [vmem:[#allocation4 + $0xbd0] sm:$0xff] }
 0x90e   :  { %1922 = vmatprep.subr.mxu0 %v1756_v33  ;;  %v1870_v33 = vld [vmem:[#allocation4 + $0xba8] sm:$0xff] }
 0x90f   :  { %1923 = vmatpush1.msra.mxu0 %v1755_v35  ;;  %v1869_v35 = vld [vmem:[#allocation4 + $0xba0] sm:$0xff] }
 0x910   :  { %1924 = vmatprep.subr.mxu0 %v1750_v39  ;;  %v1864_v39 = vld [vmem:[#allocation4 + $0xb78] sm:$0xff] }
 0x911   :  { %1925 = vmatpush1.msra.mxu0 %v1749_v41  ;;  %v1863_v41 = vld [vmem:[#allocation4 + $0xb70] sm:$0xff] }
 0x912   :  { %1926 = vmatprep.subr.mxu0 %v1744_v46  ;;  %v1858_v46 = vld [vmem:[#allocation4 + $0xb48] sm:$0xff] }
 0x9c6   :  { %v1488_v61 = vpop.f32.mrf.mxu0 }
 0x9c7   :  { %v1489_v62 = vadd.f32 %v1488_v61, %v1415_v59  ;;  %v1726_v59 = vld [vmem:[#allocation4 + $0x728] sm:$0xff]  ;;  %v1725_v61 = vld [vmem:[#allocation4 + $0x720] sm:$0xff] }
 0x9c8   :  { %v1490_v63 = vpop.f32.mrf.mxu0 }
 0x9c9   :  { %v1491_v19 = vadd.f32 %v1490_v63, %v1419_v60  ;;  %v1493_v2 = vmax.f32 %v1489_v62, 0.0  ;;  %v1728_v60 = vld [vmem:[#allocation4 + $0x738] sm:$0xff]  ;;  %v1727_v62 = vld [vmem:[#allocation4 + $0x730] sm:$0xff] }
 0x9ca   :  { %v1720_v63 = vld [vmem:[#allocation4 + $0x6f8] sm:$0xff] }
 0x9cb   :  { %v1494_v1 = vmax.f32 %v1491_v19, 0.0  ;;  %v1722_v19 = vld [vmem:[#allocation4 + $0x708] sm:$0xff] }
 0x9cd   :  { %1635 = vmatprep.mubr.f32.mxu1 %v1494_v1  ;;  %v1719_v1 = vld [vmem:[#allocation4 + $0x6f0] sm:$0xff] }
 0x9ce   :  { %1636 = vmatmul.mubr.f32.vlgmr.msra.gmra.mxu1 %v1493_v2  ;;  %v1721_v2 = vld [vmem:[#allocation4 + $0x700] sm:$0xff] }
 0x9cf   :  { %1986 = vmatpush1.msra.mxu1 %v1781_v21  ;;  %v1696_v21 = vld [vmem:[#allocation4 + $0x638] sm:$0xff] }
 0x9d0   :  { %1987 = vmatprep.subr.mxu1 %v1776_v23  ;;  %v1695_v23 = vld [vmem:[#allocation4 + $0x630] sm:$0xff] }
 0x9d1   :  { %1988 = vmatpush1.msra.mxu1 %v1775_v25  ;;  %v1690_v25 = vld [vmem:[#allocation4 + $0x608] sm:$0xff] }
 0x9d2   :  { %1989 = vmatprep.subr.mxu1 %v1770_v27  ;;  %v1689_v27 = vld [vmem:[#allocation4 + $0x600] sm:$0xff] }
 0x9d3   :  { %1990 = vmatpush1.msra.mxu1 %v1769_v29  ;;  %v1876_v29 = vld [vmem:[#allocation4 + $0xbd8] sm:$0xff] }
 0x9d4   :  { %1991 = vmatprep.subr.mxu1 %v1764_v30  ;;  %v1878_v30 = vld [vmem:[#allocation4 + $0xbe8] sm:$0xff] }
 0x9d5   :  { %1992 = vmatpush1.msra.mxu1 %v1763_v32  ;;  %v1877_v32 = vld [vmem:[#allocation4 + $0xbe0] sm:$0xff] }
 0x9d6   :  { %1993 = vmatprep.subr.mxu1 %v1758_v34  ;;  %v1872_v34 = vld [vmem:[#allocation4 + $0xbb8] sm:$0xff] }
 0x9d7   :  { %1994 = vmatpush1.msra.mxu1 %v1757_v36  ;;  %v1871_v36 = vld [vmem:[#allocation4 + $0xbb0] sm:$0xff] }
 0x9d8   :  { %1995 = vmatprep.subr.mxu1 %v1752_v40  ;;  %v1866_v40 = vld [vmem:[#allocation4 + $0xb88] sm:$0xff] }
 0x9d9   :  { %1996 = vmatpush1.msra.mxu1 %v1751_v44  ;;  %v1865_v44 = vld [vmem:[#allocation4 + $0xb80] sm:$0xff] }
 0xa8e   :  { %v1637_v6 = vpop.f32.mrf.mxu1 }
 0xa8f   :  { %v1638_v9 = vadd.f32 %v1637_v6, %v1564_v4  ;;  %v1716_v4 = vld [vmem:[#allocation4 + $0x6d8] sm:$0xff]  ;;  %v1715_v6 = vld [vmem:[#allocation4 + $0x6d0] sm:$0xff] }
 0xa90   :  { %v1639_v11 = vpop.f32.mrf.mxu1 }
 0xa91   :  { %v1640_v12 = vadd.f32 %v1639_v11, %v1568_v5  ;;  %v3815_v13 = vadd.f32 %v1638_v9, %v1344_v48  ;;  %v1743_v48 = vld [vmem:[#allocation4 + $0x7b0] sm:$0xff]  ;;  %v1713_v5 = vld [vmem:[#allocation4 + $0x6c0] sm:$0xff]  ;;  %v1708_v9 = vld [vmem:[#allocation4 + $0x698] sm:$0xff] }
 0xa92   :  { %1927 = vmatpush1.msra.mxu0 %v1743_v48  ;;  %v1710_v11 = vld [vmem:[#allocation4 + $0x6a8] sm:$0xff]  ;;  %v1857_v48 = vld [vmem:[#allocation4 + $0xb40] sm:$0xff] }
 0xa93   :  { %v3817_v14 = vadd.f32 %v1640_v12, %v1345_v47  ;;  %v1746_v47 = vld [vmem:[#allocation4 + $0x7c8] sm:$0xff]  ;;  %1928 = vmatprep.subr.mxu0 %v1738_v50  ;;  %v1707_v12 = vld [vmem:[#allocation4 + $0x690] sm:$0xff] }
 0xa94   :  { %1997 = vmatprep.subr.mxu1 %v1746_v47  ;;  %1929 = vmatpush1.msra.mxu0 %v1737_v53  ;;  %v1860_v47 = vld [vmem:[#allocation4 + $0xb58] sm:$0xff] }
 0xa95   :  { %v1646_v15 = vadd.f32 %v3817_v14, %v3815_v13  ;;  %1998 = vmatpush1.msra.mxu1 %v1745_v49  ;;  %1930 = vmatprep.subr.mxu0 %v1732_v56 }
 0xa96   :  { %1999 = vmatprep.subr.mxu1 %v1740_v51  ;;  %1931 = vmatpush1.msra.mxu0 %v1731_v58  ;;  %v1852_v58 = vld [vmem:[#allocation4 + $0xb18] sm:$0xff] }
 0xa97   :  { %1647 = vadd.xlane.f32.xlu0 %v1646_v15  ;;  %2000 = vmatpush1.msra.mxu1 %v1739_v55  ;;  %v1709_v15 = vld [vmem:[#allocation4 + $0x6a0] sm:$0xff] }
 0xa98   :  { %2001 = vmatprep.subr.mxu1 %v1734_v57  ;;  %1932 = vmatprep.subr.mxu0 %v1726_v59  ;;  %v1851_v59 = vld [vmem:[#allocation4 + $0xb10] sm:$0xff] }
 0xa99   :  { %2002 = vmatpush1.msra.mxu1 %v1733_v54  ;;  %1933 = vmatpush1.msra.mxu0 %v1725_v61  ;;  %v1859_v54 = vld [vmem:[#allocation4 + $0xb50] sm:$0xff]  ;;  %v1853_v61 = vld [vmem:[#allocation4 + $0xb20] sm:$0xff] }
 0xa9a   :  { %2003 = vmatprep.subr.mxu1 %v1728_v60  ;;  %1934 = vmatprep.subr.mxu0 %v1720_v63  ;;  %v1854_v60 = vld [vmem:[#allocation4 + $0xb28] sm:$0xff]  ;;  %v1840_v63 = vld [vmem:[#allocation4 + $0xab8] sm:$0xff] }
 0xa9b   :  { %2004 = vmatpush1.msra.mxu1 %v1727_v62  ;;  %1935 = vmatpush1.msra.mxu0 %v1719_v1  ;;  %v1848_v62 = vld [vmem:[#allocation4 + $0xaf8] sm:$0xff]  ;;  %v1839_v1 = vld [vmem:[#allocation4 + $0xab0] sm:$0xff] }
 0xa9c   :  { %2005 = vmatprep.subr.mxu1 %v1722_v19  ;;  %1936 = vmatprep.subr.mxu0 %v1714_v3  ;;  %v1847_v19 = vld [vmem:[#allocation4 + $0xaf0] sm:$0xff]  ;;  %v1834_v3 = vld [vmem:[#allocation4 + $0xa88] sm:$0xff] }
 0xa9d   :  { %2006 = vmatpush1.msra.mxu1 %v1721_v2  ;;  %1937 = vmatpush1.msra.mxu0 %v1713_v5  ;;  %v1842_v2 = vld [vmem:[#allocation4 + $0xac8] sm:$0xff]  ;;  %v1833_v5 = vld [vmem:[#allocation4 + $0xa80] sm:$0xff] }
 0xa9e   :  { %2007 = vmatprep.subr.mxu1 %v1716_v4  ;;  %1938 = vmatprep.subr.mxu0 %v1708_v9  ;;  %v1841_v4 = vld [vmem:[#allocation4 + $0xac0] sm:$0xff]  ;;  %v1828_v9 = vld [vmem:[#allocation4 + $0xa58] sm:$0xff] }
 0xa9f   :  { %2008 = vmatpush1.msra.mxu1 %v1715_v6  ;;  %1939 = vmatpush1.msra.mxu0 %v1707_v12  ;;  %v1836_v6 = vld [vmem:[#allocation4 + $0xa98] sm:$0xff]  ;;  %v1827_v12 = vld [vmem:[#allocation4 + $0xa50] sm:$0xff] }
 0xaa0   :  { %2009 = vmatprep.subr.mxu1 %v1710_v11  ;;  %1940 = vmatprep.subr.mxu0 %v1702_v16  ;;  %v1835_v11 = vld [vmem:[#allocation4 + $0xa90] sm:$0xff]  ;;  %v1822_v16 = vld [vmem:[#allocation4 + $0xa28] sm:$0xff] }
 0xaa1   :  { %2010 = vmatpush1.msra.mxu1 %v1709_v15  ;;  %1941 = vmatpush1.msra.mxu0 %v1701_v18  ;;  %v1830_v15 = vld [vmem:[#allocation4 + $0xa68] sm:$0xff]  ;;  %v1821_v18 = vld [vmem:[#allocation4 + $0xa20] sm:$0xff] }
 0xaa2   :  { %2011 = vmatprep.subr.mxu1 %v1704_v17  ;;  %1942 = vmatprep.subr.mxu0 %v1696_v21  ;;  %v1829_v17 = vld [vmem:[#allocation4 + $0xa60] sm:$0xff]  ;;  %v1816_v21 = vld [vmem:[#allocation4 + $0x9f8] sm:$0xff] }
 0xaa3   :  { %2012 = vmatpush1.msra.mxu1 %v1703_v20  ;;  %1943 = vmatpush1.msra.mxu0 %v1695_v23  ;;  %v1824_v20 = vld [vmem:[#allocation4 + $0xa38] sm:$0xff]  ;;  %v1815_v23 = vld [vmem:[#allocation4 + $0x9f0] sm:$0xff] }
 0xaa4   :  { %2013 = vmatprep.subr.mxu1 %v1698_v22  ;;  %1944 = vmatprep.subr.mxu0 %v1690_v25  ;;  %v1823_v22 = vld [vmem:[#allocation4 + $0xa30] sm:$0xff]  ;;  %v1810_v25 = vld [vmem:[#allocation4 + $0x9c8] sm:$0xff] }
 0xaa5   :  { %2014 = vmatpush1.msra.mxu1 %v1697_v24  ;;  %1945 = vmatpush1.msra.mxu0 %v1689_v27  ;;  %v1818_v24 = vld [vmem:[#allocation4 + $0xa08] sm:$0xff]  ;;  %v1809_v27 = vld [vmem:[#allocation4 + $0x9c0] sm:$0xff] }
 0xaa6   :  { %2015 = vmatprep.subr.mxu1 %v1692_v26  ;;  %1946 = vmatprep.subr.mxu0 %v1876_v29  ;;  %v1817_v26 = vld [vmem:[#allocation4 + $0xa00] sm:$0xff]  ;;  %v1804_v29 = vld [vmem:[#allocation4 + $0x998] sm:$0xff] }
 0xaa7   :  { %2016 = vmatpush1.msra.mxu1 %v1691_v28  ;;  %1947 = vmatpush2.msra.mxu0 %v1875_v31  ;;  %v1812_v28 = vld [vmem:[#allocation4 + $0x9d8] sm:$0xff]  ;;  %v1803_v31 = vld [vmem:[#allocation4 + $0x990] sm:$0xff] }
 0xaa8   :  { %2017 = vmatprep.subr.mxu1 %v1878_v30  ;;  %1948 = vmatprep.subr.mxu0 %v1870_v33  ;;  %v1811_v30 = vld [vmem:[#allocation4 + $0x9d0] sm:$0xff]  ;;  %v1798_v33 = vld [vmem:[#allocation4 + $0x968] sm:$0xff] }
 0xaa9   :  { %2018 = vmatpush2.msra.mxu1 %v1877_v32  ;;  %1949 = vmatpush2.msra.mxu0 %v1869_v35  ;;  %v1806_v32 = vld [vmem:[#allocation4 + $0x9a8] sm:$0xff]  ;;  %v1797_v35 = vld [vmem:[#allocation4 + $0x960] sm:$0xff] }
 0xaaa   :  { %2019 = vmatprep.subr.mxu1 %v1872_v34  ;;  %1950 = vmatprep.subr.mxu0 %v1864_v39  ;;  %v1805_v34 = vld [vmem:[#allocation4 + $0x9a0] sm:$0xff]  ;;  %v1792_v39 = vld [vmem:[#allocation4 + $0x938] sm:$0xff] }
 0xaab   :  { %2020 = vmatpush2.msra.mxu1 %v1871_v36  ;;  %1951 = vmatpush2.msra.mxu0 %v1863_v41  ;;  %v1800_v36 = vld [vmem:[#allocation4 + $0x978] sm:$0xff]  ;;  %v1791_v41 = vld [vmem:[#allocation4 + $0x930] sm:$0xff] }
 0xaac   :  { %2021 = vmatprep.subr.mxu1 %v1866_v40  ;;  %1952 = vmatprep.subr.mxu0 %v1858_v46  ;;  %v1799_v40 = vld [vmem:[#allocation4 + $0x970] sm:$0xff]  ;;  %v1786_v46 = vld [vmem:[#allocation4 + $0x908] sm:$0xff] }
 0xaad   :  { %2022 = vmatpush2.msra.mxu1 %v1865_v44  ;;  %1953 = vmatpush2.msra.mxu0 %v1857_v48  ;;  %v1794_v44 = vld [vmem:[#allocation4 + $0x948] sm:$0xff]  ;;  %v1785_v48 = vld [vmem:[#allocation4 + $0x900] sm:$0xff] }
 0xaae   :  { %2023 = vmatprep.subr.mxu1 %v1860_v47  ;;  %1954 = vmatprep.subr.mxu0 %v1852_v58  ;;  %v1793_v47 = vld [vmem:[#allocation4 + $0x940] sm:$0xff] }
 0xaaf   :  { %2024 = vmatpush2.msra.mxu1 %v1859_v54  ;;  %1955 = vmatpush2.msra.mxu0 %v1851_v59  ;;  %v1644_v54 = vld [vmem:[#allocation19] sm:$0x3]  ;;  %v1645_v59 = vld [vmem:[#allocation21] sm:$0x3] }
 0xab0   :  { %2025 = vmatprep.subr.mxu1 %v1854_v60  ;;  %v1670_v60 = vrot.slane %v1644_v54, %v3760_v8 }
 0xab1   :  { %2026 = vmatpush2.msra.mxu1 %v1853_v61 }
 0xab2   :  { %2027 = vmatprep.subr.mxu1 %v1848_v62  ;;  %v1683_v62 = vrot.slane %v1645_v59, %v3760_v8 }
 0xab3   :  { %2028 = vmatpush2.msra.mxu1 %v1847_v19  ;;  %v1679_v19 = vrot.slane %v1645_v59, %v3744_v45  ;;  %v1849_v59 = vld [vmem:[#allocation4 + $0xb00] sm:$0xff] }
 0xab4   :  { %2029 = vmatprep.subr.mxu1 %v1842_v2 }
 0xab5   :  { %2030 = vmatpush2.msra.mxu1 %v1841_v4 }
 0xab6   :  { %2031 = vmatprep.subr.mxu1 %v1836_v6  ;;  %v1778_v6 = vld [vmem:[#allocation4 + $0x8c8] sm:$0xff] }
 0xab7   :  { %2032 = vmatpush2.msra.mxu1 %v1835_v11  ;;  %v1766_v11 = vld [vmem:[#allocation4 + $0x868] sm:$0xff] }
 0xab8   :  { %2033 = vmatprep.subr.mxu1 %v1830_v15  ;;  %v1760_v15 = vld [vmem:[#allocation4 + $0x838] sm:$0xff] }
 0xab9   :  { %2034 = vmatpush2.msra.mxu1 %v1829_v17  ;;  %v1754_v17 = vld [vmem:[#allocation4 + $0x808] sm:$0xff] }
 0xaba   :  { %2035 = vmatprep.subr.mxu1 %v1824_v20  ;;  %v1748_v20 = vld [vmem:[#allocation4 + $0x7d8] sm:$0xff] }
 0xabb   :  { %2036 = vmatpush2.msra.mxu1 %v1823_v22  ;;  %v1742_v22 = vld [vmem:[#allocation4 + $0x7a8] sm:$0xff] }
 0xabc   :  { %2037 = vmatprep.subr.mxu1 %v1818_v24  ;;  %v1736_v24 = vld [vmem:[#allocation4 + $0x778] sm:$0xff] }
 0xabd   :  { %2038 = vmatpush2.msra.mxu1 %v1817_v26  ;;  %v1730_v26 = vld [vmem:[#allocation4 + $0x748] sm:$0xff] }
 0xabe   :  { %2039 = vmatprep.subr.mxu1 %v1812_v28  ;;  %v1724_v28 = vld [vmem:[#allocation4 + $0x718] sm:$0xff] }
 0xabf   :  { %2040 = vmatpush2.msra.mxu1 %v1811_v30  ;;  %v1718_v30 = vld [vmem:[#allocation4 + $0x6e8] sm:$0xff] }
 0xac0   :  { %2041 = vmatprep.subr.mxu1 %v1806_v32  ;;  %v1712_v32 = vld [vmem:[#allocation4 + $0x6b8] sm:$0xff] }
 0xac1   :  { %2042 = vmatpush2.msra.mxu1 %v1805_v34  ;;  %v1706_v34 = vld [vmem:[#allocation4 + $0x688] sm:$0xff] }
 0xac2   :  { %2043 = vmatprep.subr.mxu1 %v1800_v36  ;;  %v1700_v36 = vld [vmem:[#allocation4 + $0x658] sm:$0xff] }
 0xac3   :  { %2044 = vmatpush2.msra.mxu1 %v1799_v40  ;;  %v1694_v40 = vld [vmem:[#allocation4 + $0x628] sm:$0xff] }
 0xac4   :  { %2045 = vmatprep.subr.mxu1 %v1794_v44  ;;  %v1880_v44 = vld [vmem:[#allocation4 + $0xbf8] sm:$0xff] }
 0xac5   :  { %2046 = vmatpush2.msra.mxu1 %v1793_v47  ;;  %v1874_v47 = vld [vmem:[#allocation4 + $0xbc8] sm:$0xff] }
 0xb20   :  { %v1648_v49 = vpop.xlane.xlu0 %1647 }
 0xb21   :  { %v1649_v50 = vmul.f32 0.00390625, %v1648_v49  ;;  %v1788_v49 = vld [vmem:[#allocation4 + $0x918] sm:$0xff] }
 0xb22   :  { %2047 = vmatprep.subr.mxu1 %v1788_v49  ;;  %v1868_v49 = vld [vmem:[#allocation4 + $0xb98] sm:$0xff] }
 0xb23   :  { %v3822_v51 = vsub.f32 %v3815_v13, %v1649_v50  ;;  %v3825_v53 = vsub.f32 %v3817_v14, %v1649_v50  ;;  %v1846_v13 = vld [vmem:[#allocation4 + $0xae8] sm:$0xff]  ;;  %v1845_v14 = vld [vmem:[#allocation4 + $0xae0] sm:$0xff]  ;;  %v1787_v50 = vld [vmem:[#allocation4 + $0x910] sm:$0xff] }
 0xb24   :  { %1956 = vmatprep.subr.mxu0 %v1846_v13  ;;  %2048 = vmatpush2.msra.mxu1 %v1787_v50  ;;  %v1666_v13 = vrot.slane %v1644_v54, %v3744_v45  ;;  %v1867_v50 = vld [vmem:[#allocation4 + $0xb90] sm:$0xff]  ;;  %v1850_v54 = vld [vmem:[#allocation4 + $0xb08] sm:$0xff] }
 0xb25   :  { %v1652_v55 = vmul.f32 %v3822_v51, %v3822_v51  ;;  %v1653_v56 = vmul.f32 %v3825_v53, %v3825_v53  ;;  %1957 = vmatpush2.msra.mxu0 %v1845_v14  ;;  %3112 = vmatprep.subr.mxu1 %v3475_v0 }
 0xb26   :  { %1958 = vmatprep.subr.mxu0 %v1840_v63 }
 0xb27   :  { %v1654_v57 = vadd.f32 %v1653_v56, %v1652_v55  ;;  %1959 = vmatpush2.msra.mxu0 %v1839_v1  ;;  %v1784_v55 = vld [vmem:[#allocation4 + $0x8f8] sm:$0xff] }
 0xb28   :  { %1960 = vmatprep.subr.mxu0 %v1834_v3 }
 0xb29   :  { %1655 = vadd.xlane.f32.xlu1 %v1654_v57  ;;  %1961 = vmatpush2.msra.mxu0 %v1833_v5  ;;  %v1783_v5 = vld [vmem:[#allocation4 + $0x8f0] sm:$0xff] }
 0xb2a   :  { %1962 = vmatprep.subr.mxu0 %v1828_v9  ;;  %v1771_v9 = vld [vmem:[#allocation4 + $0x890] sm:$0xff] }
 0xb2b   :  { %1963 = vmatpush2.msra.mxu0 %v1827_v12  ;;  %v1765_v12 = vld [vmem:[#allocation4 + $0x860] sm:$0xff] }
 0xb2c   :  { %1964 = vmatprep.subr.mxu0 %v1822_v16  ;;  %v1759_v16 = vld [vmem:[#allocation4 + $0x830] sm:$0xff] }
 0xb2d   :  { %1965 = vmatpush2.msra.mxu0 %v1821_v18  ;;  %v1753_v18 = vld [vmem:[#allocation4 + $0x800] sm:$0xff] }
 0xb2e   :  { %1966 = vmatprep.subr.mxu0 %v1816_v21  ;;  %v1747_v21 = vld [vmem:[#allocation4 + $0x7d0] sm:$0xff] }
 0xb2f   :  { %1967 = vmatpush2.msra.mxu0 %v1815_v23  ;;  %v1741_v23 = vld [vmem:[#allocation4 + $0x7a0] sm:$0xff] }
 0xb30   :  { %1968 = vmatprep.subr.mxu0 %v1810_v25  ;;  %v1735_v25 = vld [vmem:[#allocation4 + $0x770] sm:$0xff] }
 0xb31   :  { %1969 = vmatpush2.msra.mxu0 %v1809_v27  ;;  %v1729_v27 = vld [vmem:[#allocation4 + $0x740] sm:$0xff] }
 0xb32   :  { %1970 = vmatprep.subr.mxu0 %v1804_v29  ;;  %v1723_v29 = vld [vmem:[#allocation4 + $0x710] sm:$0xff] }
 0xb33   :  { %1971 = vmatpush2.msra.mxu0 %v1803_v31  ;;  %v1717_v31 = vld [vmem:[#allocation4 + $0x6e0] sm:$0xff] }
 0xb34   :  { %1972 = vmatprep.subr.mxu0 %v1798_v33  ;;  %v1711_v33 = vld [vmem:[#allocation4 + $0x6b0] sm:$0xff] }
 0xb35   :  { %1973 = vmatpush2.msra.mxu0 %v1797_v35  ;;  %v1705_v35 = vld [vmem:[#allocation4 + $0x680] sm:$0xff] }
 0xb36   :  { %1974 = vmatprep.subr.mxu0 %v1792_v39  ;;  %v1699_v39 = vld [vmem:[#allocation4 + $0x650] sm:$0xff] }
 0xb37   :  { %1975 = vmatpush2.msra.mxu0 %v1791_v41  ;;  %v1693_v41 = vld [vmem:[#allocation4 + $0x620] sm:$0xff] }
 0xb38   :  { %1976 = vmatprep.subr.mxu0 %v1786_v46  ;;  %v1879_v46 = vld [vmem:[#allocation4 + $0xbf0] sm:$0xff] }
 0xb39   :  { %1977 = vmatpush2.msra.mxu0 %v1785_v48  ;;  %v1873_v48 = vld [vmem:[#allocation4 + $0xbc0] sm:$0xff] }
 0xb3a   :  { %2056 = vmatprep.subr.mxu0 %v1784_v55  ;;  %v1862_v55 = vld [vmem:[#allocation4 + $0xb68] sm:$0xff] }
 0xbb2   :  { %v1656_v56 = vpop.xlane.xlu1 %1655 }
 0xbb3   :  { %v1657_v57 = vmul.f32 0.00390625, %v1656_v56  ;;  %v1861_v56 = vld [vmem:[#allocation4 + $0xb60] sm:$0xff] }
 0xbb5   :  { %v1658_v58 = vadd.f32 1e-05, %v1657_v57  ;;  %v1856_v57 = vld [vmem:[#allocation4 + $0xb38] sm:$0xff] }
 0xbb7   :  { %3165 = vrsqrt.f32 %v1658_v58  ;;  %v1855_v58 = vld [vmem:[#allocation4 + $0xb30] sm:$0xff] }
 0xbc4   :  { %v3166_v61 = vpop.eup %3165 }
 0xbc5   :  { %v1661_v14 = vmul.f32 %v3166_v61, %v3825_v53  ;;  %v1660_v63 = vmul.f32 %v3166_v61, %v3822_v51  ;;  %v1777_v53 = vld [vmem:[#allocation4 + $0x8c0] sm:$0xff]  ;;  %v1772_v51 = vld [vmem:[#allocation4 + $0x898] sm:$0xff]  ;;  %v1838_v61 = vld [vmem:[#allocation4 + $0xaa8] sm:$0xff] }
 0xbc7   :  { %v1674_v1 = vmul.f32 %v1670_v60, %v1661_v14  ;;  %v1673_v2 = vmul.f32 %v1666_v13, %v1660_v63  ;;  %v1844_v60 = vld [vmem:[#allocation4 + $0xad8] sm:$0xff]  ;;  %v1843_v13 = vld [vmem:[#allocation4 + $0xad0] sm:$0xff]  ;;  %v1837_v14 = vld [vmem:[#allocation4 + $0xaa0] sm:$0xff] }
 0xbc8   :  { %v1831_v63 = vld [vmem:[#allocation4 + $0xa70] sm:$0xff] }
 0xbc9   :  { %v3838_v3 = vadd.f32 %v1683_v62, %v1674_v1  ;;  %v3840_v4 = vadd.f32 %v1679_v19, %v1673_v2  ;;  %v1832_v62 = vld [vmem:[#allocation4 + $0xa78] sm:$0xff]  ;;  %v1826_v19 = vld [vmem:[#allocation4 + $0xa48] sm:$0xff]  ;;  %v1825_v1 = vld [vmem:[#allocation4 + $0xa40] sm:$0xff] }
 0xbca   :  { %v1820_v2 = vld [vmem:[#allocation4 + $0xa18] sm:$0xff] }
 0xbcb   :  { %1978 = vmatprep.mubr.f32.mxu0 %v3838_v3  ;;  %2049 = vmatprep.mubr.f32.mxu1 %v3838_v3 }
 0xbcc   :  { %1979 = vmatmul.mubr.f32.vlgmr.msra.gmra.mxu0 %v3840_v4  ;;  %2050 = vmatmul.mubr.f32.vlgmr.msra.gmra.mxu1 %v3840_v4 }
 0xbcd   :  { %2057 = vmatpush1.msra.mxu0 %v1783_v5  ;;  %2120 = vmatprep.mubr.f32.mxu0 %v3838_v3  ;;  %v1819_v5 = vld [vmem:[#allocation4 + $0xa10] sm:$0xff] }
 0xbce   :  { %2058 = vmatprep.subr.mxu0 %v1778_v6  ;;  %3114 = vmatprep.mubr.msk.f32.mxu1 %vm3476_vm0, %v3475_v0  ;;  %v1814_v6 = vld [vmem:[#allocation4 + $0x9e8] sm:$0xff] }
 0xbcf   :  { %2059 = vmatpush1.msra.mxu0 %v1777_v53  ;;  %v1813_v53 = vld [vmem:[#allocation4 + $0x9e0] sm:$0xff] }
 0xbd0   :  { %2060 = vmatprep.subr.mxu0 %v1772_v51  ;;  %v1808_v51 = vld [vmem:[#allocation4 + $0x9b8] sm:$0xff] }
 0xbd1   :  { %2061 = vmatpush1.msra.mxu0 %v1771_v9  ;;  %v1807_v9 = vld [vmem:[#allocation4 + $0x9b0] sm:$0xff] }
 0xbd2   :  { %2062 = vmatprep.subr.mxu0 %v1766_v11  ;;  %v1802_v11 = vld [vmem:[#allocation4 + $0x988] sm:$0xff] }
 0xbd3   :  { %2063 = vmatpush1.msra.mxu0 %v1765_v12  ;;  %v1801_v12 = vld [vmem:[#allocation4 + $0x980] sm:$0xff] }
 0xbd4   :  { %2064 = vmatprep.subr.mxu0 %v1760_v15  ;;  %v1796_v15 = vld [vmem:[#allocation4 + $0x958] sm:$0xff] }
 0xbd5   :  { %2065 = vmatpush1.msra.mxu0 %v1759_v16  ;;  %v1795_v16 = vld [vmem:[#allocation4 + $0x950] sm:$0xff] }
 0xbd6   :  { %2066 = vmatprep.subr.mxu0 %v1754_v17  ;;  %v1790_v17 = vld [vmem:[#allocation4 + $0x928] sm:$0xff] }
 0xbd7   :  { %2067 = vmatpush1.msra.mxu0 %v1753_v18  ;;  %v1789_v18 = vld [vmem:[#allocation4 + $0x920] sm:$0xff] }
 0xbd8   :  { %2068 = vmatprep.subr.mxu0 %v1748_v20  ;;  %v3851_v20 = vld [vmem:[#allocation6 + $0x6] sm:$0x3f] }
 0xbd9   :  { %2069 = vmatpush1.msra.mxu0 %v1747_v21  ;;  %v1895_v21 = vrot.slane %v3851_v20, %v533_v43 }
 0xbda   :  { %2070 = vmatprep.subr.mxu0 %v1742_v22  ;;  %v1887_v22 = vrot.slane %v3851_v20, %v3744_v45 }
 0xbdb   :  { %2071 = vmatpush1.msra.mxu0 %v1741_v23 }
 0xbdc   :  { %2072 = vmatprep.subr.mxu0 %v1736_v24 }
 0xbdd   :  { %2073 = vmatpush1.msra.mxu0 %v1735_v25 }
 0xbde   :  { %2074 = vmatprep.subr.mxu0 %v1730_v26 }
 0xbdf   :  { %2075 = vmatpush1.msra.mxu0 %v1729_v27  ;;  %v1903_v27 = vrot.slane %v3851_v20, %v541_v52 }
 0xbe0   :  { %2076 = vmatprep.subr.mxu0 %v1724_v28 }
 0xbe1   :  { %2077 = vmatpush1.msra.mxu0 %v1723_v29 }
 0xbe2   :  { %2078 = vmatprep.subr.mxu0 %v1718_v30 }
 0xbe3   :  { %2079 = vmatpush1.msra.mxu0 %v1717_v31 }
 0xbe4   :  { %2080 = vmatprep.subr.mxu0 %v1712_v32 }
 0xbe5   :  { %2081 = vmatpush1.msra.mxu0 %v1711_v33 }
 0xbe6   :  { %2082 = vmatprep.subr.mxu0 %v1706_v34  ;;  %v3869_v34 = vld [vmem:[#allocation2] sm:$0xff] }
 0xbe7   :  { %2083 = vmatpush1.msra.mxu0 %v1705_v35 }
 0xbe8   :  { %2084 = vmatprep.subr.mxu0 %v1700_v36 }
 0xbe9   :  { %2085 = vmatpush1.msra.mxu0 %v1699_v39 }
 0xbea   :  { %2086 = vmatprep.subr.mxu0 %v1694_v40 }
 0xbeb   :  { %2087 = vmatpush1.msra.mxu0 %v1693_v41 }
 0xbec   :  { %2088 = vmatprep.subr.mxu0 %v1880_v44 }
 0xbed   :  { %2089 = vmatpush2.msra.mxu0 %v1879_v46  ;;  %v2159_v46 = vld [vmem:[#allocation7 + $0x2f8] sm:$0xff] }
 0xbee   :  { %2090 = vmatprep.subr.mxu0 %v1874_v47  ;;  %v2158_v47 = vld [vmem:[#allocation7 + $0x2f0] sm:$0xff] }
 0xbef   :  { %2091 = vmatpush2.msra.mxu0 %v1873_v48  ;;  %v2157_v48 = vld [vmem:[#allocation7 + $0x2e8] sm:$0xff] }
 0xbf0   :  { %2092 = vmatprep.subr.mxu0 %v1868_v49  ;;  %v2156_v49 = vld [vmem:[#allocation7 + $0x2e0] sm:$0xff] }
 0xbf1   :  { %2093 = vmatpush2.msra.mxu0 %v1867_v50  ;;  %v2155_v50 = vld [vmem:[#allocation7 + $0x2d8] sm:$0xff] }
 0xbf2   :  { %2094 = vmatprep.subr.mxu0 %v1862_v55  ;;  %v2154_v55 = vld [vmem:[#allocation7 + $0x2d0] sm:$0xff] }
 0xbf3   :  { %2095 = vmatpush2.msra.mxu0 %v1861_v56  ;;  %v2153_v56 = vld [vmem:[#allocation7 + $0x2c8] sm:$0xff] }
 0xbf4   :  { %2096 = vmatprep.subr.mxu0 %v1856_v57  ;;  %v2152_v57 = vld [vmem:[#allocation7 + $0x2c0] sm:$0xff] }
 0xbf5   :  { %2097 = vmatpush2.msra.mxu0 %v1855_v58  ;;  %v2151_v58 = vld [vmem:[#allocation7 + $0x2b8] sm:$0xff] }
 0xbf6   :  { %2098 = vmatprep.subr.mxu0 %v1850_v54  ;;  %v2150_v54 = vld [vmem:[#allocation7 + $0x2b0] sm:$0xff] }
 0xbf7   :  { %2099 = vmatpush2.msra.mxu0 %v1849_v59  ;;  %v2149_v59 = vld [vmem:[#allocation7 + $0x2a8] sm:$0xff] }
 0xbf8   :  { %2100 = vmatprep.subr.mxu0 %v1844_v60  ;;  %v2148_v60 = vld [vmem:[#allocation7 + $0x2a0] sm:$0xff] }
 0xbf9   :  { %2101 = vmatpush2.msra.mxu0 %v1843_v13  ;;  %v2147_v13 = vld [vmem:[#allocation7 + $0x298] sm:$0xff] }
 0xbfa   :  { %2102 = vmatprep.subr.mxu0 %v1838_v61  ;;  %v2146_v61 = vld [vmem:[#allocation7 + $0x290] sm:$0xff] }
 0xbfb   :  { %2103 = vmatpush2.msra.mxu0 %v1837_v14  ;;  %v2145_v14 = vld [vmem:[#allocation7 + $0x288] sm:$0xff] }
 0xbfc   :  { %2104 = vmatprep.subr.mxu0 %v1832_v62  ;;  %v2144_v62 = vld [vmem:[#allocation7 + $0x280] sm:$0xff] }
 0xbfd   :  { %2105 = vmatpush2.msra.mxu0 %v1831_v63  ;;  %v2143_v63 = vld [vmem:[#allocation7 + $0x278] sm:$0xff] }
 0xbfe   :  { %2106 = vmatprep.subr.mxu0 %v1826_v19  ;;  %v2142_v19 = vld [vmem:[#allocation7 + $0x270] sm:$0xff] }
 0xbff   :  { %2107 = vmatpush2.msra.mxu0 %v1825_v1  ;;  %v2141_v1 = vld [vmem:[#allocation7 + $0x268] sm:$0xff] }
 0xc00   :  { %2108 = vmatprep.subr.mxu0 %v1820_v2  ;;  %v2140_v2 = vld [vmem:[#allocation7 + $0x260] sm:$0xff] }
 0xc01   :  { %2109 = vmatpush2.msra.mxu0 %v1819_v5  ;;  %v2139_v5 = vld [vmem:[#allocation7 + $0x258] sm:$0xff] }
 0xc02   :  { %2110 = vmatprep.subr.mxu0 %v1814_v6  ;;  %v2138_v6 = vld [vmem:[#allocation7 + $0x250] sm:$0xff] }
 0xc03   :  { %2111 = vmatpush2.msra.mxu0 %v1813_v53  ;;  %v2137_v53 = vld [vmem:[#allocation7 + $0x248] sm:$0xff] }
 0xc04   :  { %2112 = vmatprep.subr.mxu0 %v1808_v51  ;;  %v2136_v51 = vld [vmem:[#allocation7 + $0x240] sm:$0xff] }
 0xc05   :  { %2113 = vmatpush2.msra.mxu0 %v1807_v9  ;;  %v2135_v9 = vld [vmem:[#allocation7 + $0x238] sm:$0xff] }
 0xc06   :  { %2114 = vmatprep.subr.mxu0 %v1802_v11  ;;  %v2134_v11 = vld [vmem:[#allocation7 + $0x230] sm:$0xff] }
 0xc07   :  { %2115 = vmatpush2.msra.mxu0 %v1801_v12  ;;  %v2133_v12 = vld [vmem:[#allocation7 + $0x228] sm:$0xff] }
 0xc08   :  { %2116 = vmatprep.subr.mxu0 %v1796_v15  ;;  %v2132_v15 = vld [vmem:[#allocation7 + $0x220] sm:$0xff] }
 0xc09   :  { %2117 = vmatpush2.msra.mxu0 %v1795_v16  ;;  %v2131_v16 = vld [vmem:[#allocation7 + $0x218] sm:$0xff] }
 0xc0a   :  { %2118 = vmatprep.subr.mxu0 %v1790_v17  ;;  %v2130_v17 = vld [vmem:[#allocation7 + $0x210] sm:$0xff] }
 0xc0b   :  { %2119 = vmatpush2.msra.mxu0 %v1789_v18  ;;  %v2129_v18 = vld [vmem:[#allocation7 + $0x208] sm:$0xff] }
 0xc0c   :  { %2121 = vmatmul.mubr.f32.vlgmr.msra.gmra.mxu0 %v3840_v4  ;;  %2575 = vmatprep.subr.mxu0 %v2159_v46 }
 0xc0d   :  { %2639 = vmatprep.mubr.f32.mxu0 %v3475_v0  ;;  %2576 = vmatpush1.msra.mxu0 %v2158_v47 }
 0xc0e   :  { %2577 = vmatprep.subr.mxu0 %v2157_v48  ;;  %v2190_v48 = vld [vmem:[#allocation7 + $0x3f0] sm:$0xff] }
 0xc0f   :  { %2578 = vmatpush1.msra.mxu0 %v2156_v49  ;;  %v2189_v49 = vld [vmem:[#allocation7 + $0x3e8] sm:$0xff] }
 0xc10   :  { %2579 = vmatprep.subr.mxu0 %v2155_v50  ;;  %v2187_v50 = vld [vmem:[#allocation7 + $0x3d8] sm:$0xff] }
 0xc11   :  { %2580 = vmatpush1.msra.mxu0 %v2154_v55  ;;  %v2186_v55 = vld [vmem:[#allocation7 + $0x3d0] sm:$0xff] }
 0xc12   :  { %2581 = vmatprep.subr.mxu0 %v2153_v56  ;;  %v2185_v56 = vld [vmem:[#allocation7 + $0x3c8] sm:$0xff] }
 0xc13   :  { %2582 = vmatpush1.msra.mxu0 %v2152_v57  ;;  %v2184_v57 = vld [vmem:[#allocation7 + $0x3c0] sm:$0xff] }
 0xc14   :  { %2583 = vmatprep.subr.mxu0 %v2151_v58  ;;  %v2183_v58 = vld [vmem:[#allocation7 + $0x3b8] sm:$0xff] }
 0xc15   :  { %2584 = vmatpush1.msra.mxu0 %v2150_v54  ;;  %v2182_v54 = vld [vmem:[#allocation7 + $0x3b0] sm:$0xff] }
 0xc16   :  { %2585 = vmatprep.subr.mxu0 %v2149_v59  ;;  %v2181_v59 = vld [vmem:[#allocation7 + $0x3a8] sm:$0xff] }
 0xc17   :  { %2586 = vmatpush1.msra.mxu0 %v2148_v60  ;;  %v2180_v60 = vld [vmem:[#allocation7 + $0x3a0] sm:$0xff] }
 0xc18   :  { %2587 = vmatprep.subr.mxu0 %v2147_v13  ;;  %v2179_v13 = vld [vmem:[#allocation7 + $0x398] sm:$0xff] }
 0xc19   :  { %2588 = vmatpush1.msra.mxu0 %v2146_v61  ;;  %v2178_v61 = vld [vmem:[#allocation7 + $0x390] sm:$0xff] }
 0xc1a   :  { %2589 = vmatprep.subr.mxu0 %v2145_v14  ;;  %v2176_v14 = vld [vmem:[#allocation7 + $0x380] sm:$0xff] }
 0xc1b   :  { %2590 = vmatpush1.msra.mxu0 %v2144_v62  ;;  %v2175_v62 = vld [vmem:[#allocation7 + $0x378] sm:$0xff] }
 0xc1c   :  { %2591 = vmatprep.subr.mxu0 %v2143_v63  ;;  %v2174_v63 = vld [vmem:[#allocation7 + $0x370] sm:$0xff] }
 0xc1d   :  { %2592 = vmatpush1.msra.mxu0 %v2142_v19  ;;  %v2173_v19 = vld [vmem:[#allocation7 + $0x368] sm:$0xff] }
 0xc1e   :  { %2593 = vmatprep.subr.mxu0 %v2141_v1  ;;  %v2172_v1 = vld [vmem:[#allocation7 + $0x360] sm:$0xff] }
 0xc1f   :  { %2594 = vmatpush1.msra.mxu0 %v2140_v2  ;;  %v2171_v2 = vld [vmem:[#allocation7 + $0x358] sm:$0xff] }
 0xc20   :  { %2595 = vmatprep.subr.mxu0 %v2139_v5  ;;  %v2170_v5 = vld [vmem:[#allocation7 + $0x350] sm:$0xff] }
 0xc21   :  { %2596 = vmatpush1.msra.mxu0 %v2138_v6  ;;  %v2169_v6 = vld [vmem:[#allocation7 + $0x348] sm:$0xff] }
 0xc22   :  { %2597 = vmatprep.subr.mxu0 %v2137_v53  ;;  %v2168_v53 = vld [vmem:[#allocation7 + $0x340] sm:$0xff] }
 0xc23   :  { %2598 = vmatpush1.msra.mxu0 %v2136_v51  ;;  %v2167_v51 = vld [vmem:[#allocation7 + $0x338] sm:$0xff] }
 0xc24   :  { %2599 = vmatprep.subr.mxu0 %v2135_v9  ;;  %v2166_v9 = vld [vmem:[#allocation7 + $0x330] sm:$0xff] }
 0xc25   :  { %2600 = vmatpush1.msra.mxu0 %v2134_v11  ;;  %v2165_v11 = vld [vmem:[#allocation7 + $0x328] sm:$0xff] }
 0xc26   :  { %2601 = vmatprep.subr.mxu0 %v2133_v12  ;;  %v2164_v12 = vld [vmem:[#allocation7 + $0x320] sm:$0xff] }
 0xc27   :  { %2602 = vmatpush1.msra.mxu0 %v2132_v15  ;;  %v2163_v15 = vld [vmem:[#allocation7 + $0x318] sm:$0xff] }
 0xc28   :  { %2603 = vmatprep.subr.mxu0 %v2131_v16  ;;  %v2162_v16 = vld [vmem:[#allocation7 + $0x310] sm:$0xff] }
 0xc29   :  { %2604 = vmatpush1.msra.mxu0 %v2130_v17  ;;  %v2161_v17 = vld [vmem:[#allocation7 + $0x308] sm:$0xff] }
 0xc2a   :  { %2605 = vmatprep.subr.mxu0 %v2129_v18  ;;  %v2160_v18 = vld [vmem:[#allocation7 + $0x300] sm:$0xff] }
 0xc2b   :  { %2606 = vmatpush1.msra.mxu0 %v2128_v42 }
 0xc8c   :  { %v2051_v23 = vpop.f32.mrf.mxu1  ;;  %v1980_v24 = vpop.f32.mrf.mxu0 }
 0xc8d   :  { %v2052_v25 = vadd.f32 %v2051_v23, %v1895_v21  ;;  %v1981_v26 = vadd.f32 %v1980_v24, %v1887_v22  ;;  %v1899_v22 = vrot.slane %v3851_v20, %v537_v7  ;;  %v1891_v24 = vrot.slane %v3851_v20, %v3760_v8 }
 0xc8e   :  { %v3864_v28 = vpop.f32.mrf.mxu0  ;;  %v3867_v30 = vpop.f32.mrf.mxu1 }
 0xc8f   :  { %3113 = vmatpush3.xpose.msra.mxu1 %v2052_v25  ;;  %v1983_v7 = vadd.f32 %v3864_v28, %v1891_v24 }
 0xc90   :  { %3117 = vmatprep.subr.mxu1 %v3475_v0 }
 0xc92   :  { %3115 = vmatmul.mubr.f32.vlgmr.msra.gmra.mxu1 %v1981_v26  ;;  %v2054_v26 = vadd.f32 %v3867_v30, %v1899_v22 }
 0xc93   :  { %3119 = vmatprep.mubr.msk.f32.mxu1 %vm3476_vm0, %v3475_v0 }
 0xccc   :  { %v2122_v43 = vpop.f32.mrf.mxu0 }
 0xccd   :  { %v2123_v29 = vadd.f32 %v2122_v43, %v1903_v27  ;;  %v1907_v27 = vrot.slane %v3851_v20, %v545_v10 }
 0xcce   :  { %v2124_v43 = vpop.f32.mrf.mxu0 }
 0xccf   :  { %3118 = vmatpush3.msra.mxu1 %v2123_v29  ;;  %v2125_v29 = vadd.f32 %v2124_v43, %v1907_v27 }
 0xcd0   :  { %3122 = vmatprep.subr.mxu1 %v3475_v0 }
 0xd52   :  { %v2258_v31 = vpop.f32.mrf.mxu1 }
 0xd53   :  { %v2262_v32 = vmul.f32 0.088388346, %v2258_v31 }
 0xd54   :  { %v3116_v33 = vpop.f32.mrf.mxu1 }
 0xd55   :  { %v2263_v35 = vadd.f32 %v3869_v34, %v2262_v32 }
 0xd57   :  { %v2264_v36 = vsel %vm902_vm1, %v2263_v35, -inf }
 0xd58   :  { %2265 = vmax.xlane.f32.xlu0 %v2264_v36 }
 0xde1   :  { %v2266_v52 = vpop.xlane.xlu0 %2265 }
 0xde2   :  { %v2267_v39 = vsub.f32 %v2263_v35, %v2266_v52 }
 0xde4   :  { %v2268_v40 = vmul.f32 1.442695, %v2267_v39 }
 0xde6   :  { %3167 = vpow2.f32 %v2268_v40 }
 0xdf3   :  { %v3873_v41 = vpop.eup %3167 }
 0xdf4   :  { %v2270_v44 = vsel %vm902_vm1, %v3873_v41, 0.0 }
 0xdf5   :  { %2271 = vadd.xlane.f32.xlu1 %v2270_v44 }
 0xe7e   :  { %v2272_v21 = vpop.xlane.xlu1 %2271 }
 0xe7f   :  { %3169 = vrcp.f32 %v2272_v21 }
 0xe8c   :  { %v3170_v23 = vpop.eup %3169 }
 0xe8d   :  { %v2274_v25 = vmul.f32 %v3170_v23, %v3873_v41  ;;  %v2191_v41 = vld [vmem:[#allocation7 + $0x3f8] sm:$0xff]  ;;  %v2647_v23 = vld [vmem:[#allocation9 + $0x2] sm:$0x3] }
 0xe8e   :  { %v2656_v43 = vrot.slane %v2647_v23, %v3760_v8 }
 0xe8f   :  { %3120 = vmatmul.mubr.msk.f32.vlgmr.msra.gmra.mxu1 %vm902_vm1, %v2274_v25  ;;  %v2652_v25 = vrot.slane %v2647_v23, %v3744_v45  ;;  %v2766_v23 = vld [vmem:[#allocation13 + $0x3c0] sm:$0xff] }
 0xe90   :  { %3123 = vmatpush3.xpose.msra.mxu1 %v2054_v26  ;;  %3124 = vmatprep.mubr.msk.f32.mxu1 %vm3476_vm0, %v3475_v0 }
 0xe91   :  { %3127 = vmatprep.subr.mxu1 %v3475_v0 }
 0xe93   :  { %3125 = vmatmul.mubr.f32.vlgmr.msra.gmra.mxu1 %v1983_v7 }
 0xe94   :  { %3128 = vmatpush3.msra.mxu1 %v2125_v29  ;;  %3129 = vmatprep.mubr.msk.f32.mxu1 %vm3476_vm0, %v3475_v0 }
 0xe95   :  { %2504 = vmatprep.subr.mxu1 %v2191_v41  ;;  %v2732_v41 = vld [vmem:[#allocation13 + $0x2b0] sm:$0xff] }
 0xf4f   :  { %v2344_v10 = vpop.f32.mrf.mxu1 }
 0xf50   :  { %2640 = vmatmul.mubr.f32.vlgmr.msra.gmra.mxu0 %v2344_v10 }
 0xf51   :  { %v3121_v20 = vpop.f32.mrf.mxu1 }
 0xf53   :  { %v2414_v30 = vpop.f32.mrf.mxu1 }
 0xf54   :  { %v2418_v31 = vmul.f32 0.088388346, %v2414_v30 }
 0xf55   :  { %v3126_v32 = vpop.f32.mrf.mxu1 }
 0xf56   :  { %v2419_v33 = vadd.f32 %v3869_v34, %v2418_v31  ;;  %v2188_v34 = vld [vmem:[#allocation7 + $0x3e0] sm:$0xff] }
 0xf58   :  { %v2420_v28 = vsel %vm902_vm1, %v2419_v33, -inf }
 0xf59   :  { %2421 = vmax.xlane.f32.xlu0 %v2420_v28  ;;  %v2740_v28 = vld [vmem:[#allocation13 + $0x2f0] sm:$0xff] }
 0xfe2   :  { %v2422_v35 = vpop.xlane.xlu0 %2421 }
 0xfe3   :  { %v2423_v36 = vsub.f32 %v2419_v33, %v2422_v35  ;;  %v2741_v33 = vld [vmem:[#allocation13 + $0x2f8] sm:$0xff]  ;;  %v2739_v35 = vld [vmem:[#allocation13 + $0x2e8] sm:$0xff] }
 0xfe5   :  { %v2424_v52 = vmul.f32 1.442695, %v2423_v36  ;;  %v2738_v36 = vld [vmem:[#allocation13 + $0x2e0] sm:$0xff] }
 0xfe7   :  { %3171 = vpow2.f32 %v2424_v52  ;;  %v2737_v52 = vld [vmem:[#allocation13 + $0x2d8] sm:$0xff] }
 0xff4   :  { %v3172_v39 = vpop.eup %3171 }
 0xff5   :  { %v2426_v40 = vsel %vm902_vm1, %v3172_v39, 0.0 }
 0xff6   :  { %2427 = vadd.xlane.f32.xlu1 %v2426_v40  ;;  %v2735_v40 = vld [vmem:[#allocation13 + $0x2c8] sm:$0xff] }
0x1010   :  { %v2641_v24 = vpop.f32.mrf.mxu0 }
0x1012   :  { %v2643_v7 = vpop.f32.mrf.mxu0 }
0x107f   :  { %v2428_v44 = vpop.xlane.xlu1 %2427 }
0x1080   :  { %3173 = vrcp.f32 %v2428_v44  ;;  %v2731_v44 = vld [vmem:[#allocation13 + $0x2a8] sm:$0xff] }
0x108d   :  { %v3174_v46 = vpop.eup %3173 }
0x108e   :  { %v2430_v47 = vmul.f32 %v3174_v46, %v3172_v39  ;;  %v2736_v39 = vld [vmem:[#allocation13 + $0x2d0] sm:$0xff]  ;;  %v2730_v46 = vld [vmem:[#allocation13 + $0x2a0] sm:$0xff] }
0x1090   :  { %3130 = vmatmul.mubr.msk.f32.vlgmr.msra.gmra.mxu1 %vm902_vm1, %v2430_v47  ;;  %v2729_v47 = vld [vmem:[#allocation13 + $0x298] sm:$0xff] }
0x1091   :  { %2505 = vmatpush1.msra.mxu1 %v2190_v48  ;;  %2568 = vmatprep.mubr.f32.mxu1 %v3475_v0  ;;  %v2177_v0 = vld [vmem:[#allocation7 + $0x388] sm:$0xff]  ;;  %v2728_v48 = vld [vmem:[#allocation13 + $0x290] sm:$0xff] }
0x1092   :  { %2506 = vmatprep.subr.mxu1 %v2189_v49  ;;  %v2727_v49 = vld [vmem:[#allocation13 + $0x288] sm:$0xff] }
0x1093   :  { %2507 = vmatpush1.msra.mxu1 %v2188_v34  ;;  %v2726_v34 = vld [vmem:[#allocation13 + $0x280] sm:$0xff] }
0x1094   :  { %2508 = vmatprep.subr.mxu1 %v2187_v50  ;;  %v2725_v50 = vld [vmem:[#allocation13 + $0x278] sm:$0xff] }
0x1095   :  { %2509 = vmatpush1.msra.mxu1 %v2186_v55  ;;  %v2724_v55 = vld [vmem:[#allocation13 + $0x270] sm:$0xff] }
0x1096   :  { %2510 = vmatprep.subr.mxu1 %v2185_v56  ;;  %v2723_v56 = vld [vmem:[#allocation13 + $0x268] sm:$0xff] }
0x1097   :  { %2511 = vmatpush1.msra.mxu1 %v2184_v57  ;;  %v2722_v57 = vld [vmem:[#allocation13 + $0x260] sm:$0xff] }
0x1098   :  { %2512 = vmatprep.subr.mxu1 %v2183_v58  ;;  %v2721_v58 = vld [vmem:[#allocation13 + $0x258] sm:$0xff] }
0x1099   :  { %2513 = vmatpush1.msra.mxu1 %v2182_v54  ;;  %v2720_v54 = vld [vmem:[#allocation13 + $0x250] sm:$0xff] }
0x109a   :  { %2514 = vmatprep.subr.mxu1 %v2181_v59  ;;  %v2719_v59 = vld [vmem:[#allocation13 + $0x248] sm:$0xff] }
0x109b   :  { %2515 = vmatpush1.msra.mxu1 %v2180_v60  ;;  %v2718_v60 = vld [vmem:[#allocation13 + $0x240] sm:$0xff] }
0x109c   :  { %2516 = vmatprep.subr.mxu1 %v2179_v13  ;;  %v2717_v13 = vld [vmem:[#allocation13 + $0x238] sm:$0xff] }
0x109d   :  { %2517 = vmatpush1.msra.mxu1 %v2178_v61  ;;  %v2716_v61 = vld [vmem:[#allocation13 + $0x230] sm:$0xff] }
0x109e   :  { %2518 = vmatprep.subr.mxu1 %v2177_v0  ;;  %v2715_v0 = vld [vmem:[#allocation13 + $0x228] sm:$0xff] }
0x109f   :  { %2519 = vmatpush1.msra.mxu1 %v2176_v14  ;;  %v2714_v14 = vld [vmem:[#allocation13 + $0x220] sm:$0xff] }
0x10a0   :  { %2520 = vmatprep.subr.mxu1 %v2175_v62  ;;  %v2713_v62 = vld [vmem:[#allocation13 + $0x218] sm:$0xff] }
0x10a1   :  { %2521 = vmatpush1.msra.mxu1 %v2174_v63  ;;  %v2712_v63 = vld [vmem:[#allocation13 + $0x210] sm:$0xff] }
0x10a2   :  { %2522 = vmatprep.subr.mxu1 %v2173_v19  ;;  %v2711_v19 = vld [vmem:[#allocation13 + $0x208] sm:$0xff] }
0x10a3   :  { %2523 = vmatpush1.msra.mxu1 %v2172_v1  ;;  %v2710_v1 = vld [vmem:[#allocation13 + $0x200] sm:$0xff] }
0x10a4   :  { %2524 = vmatprep.subr.mxu1 %v2171_v2  ;;  %v2773_v2 = vld [vmem:[#allocation13 + $0x3f8] sm:$0xff] }
0x10a5   :  { %2525 = vmatpush1.msra.mxu1 %v2170_v5  ;;  %v2772_v5 = vld [vmem:[#allocation13 + $0x3f0] sm:$0xff] }
0x10a6   :  { %2526 = vmatprep.subr.mxu1 %v2169_v6  ;;  %v2771_v6 = vld [vmem:[#allocation13 + $0x3e8] sm:$0xff] }
0x10a7   :  { %2527 = vmatpush1.msra.mxu1 %v2168_v53  ;;  %v2770_v53 = vld [vmem:[#allocation13 + $0x3e0] sm:$0xff] }
0x10a8   :  { %2528 = vmatprep.subr.mxu1 %v2167_v51  ;;  %v2769_v51 = vld [vmem:[#allocation13 + $0x3d8] sm:$0xff] }
0x10a9   :  { %2529 = vmatpush1.msra.mxu1 %v2166_v9  ;;  %v2768_v9 = vld [vmem:[#allocation13 + $0x3d0] sm:$0xff] }
0x10aa   :  { %2530 = vmatprep.subr.mxu1 %v2165_v11  ;;  %v2767_v11 = vld [vmem:[#allocation13 + $0x3c8] sm:$0xff] }
0x10ab   :  { %2531 = vmatpush1.msra.mxu1 %v2164_v12 }
0x10ac   :  { %2532 = vmatprep.subr.mxu1 %v2163_v15 }
0x10ad   :  { %2533 = vmatpush1.msra.mxu1 %v2162_v16 }
0x10ae   :  { %2534 = vmatprep.subr.mxu1 %v2161_v17 }
0x10af   :  { %2535 = vmatpush1.msra.mxu1 %v2160_v18 }
0x10b0   :  { %2787 = vmatprep.subr.mxu1 %v2741_v33  ;;  %v2752_v33 = vld [vmem:[#allocation13 + $0x350] sm:$0xff] }
0x1150   :  { %v2500_v21 = vpop.f32.mrf.mxu1 }
0x1151   :  { %2569 = vmatmul.mubr.f32.vlgmr.msra.gmra.mxu1 %v2500_v21 }
0x1152   :  { %v3131_v22 = vpop.f32.mrf.mxu1  ;;  %2788 = vmatpush1.msra.mxu1 %v2740_v28  ;;  %v2751_v28 = vld [vmem:[#allocation13 + $0x348] sm:$0xff] }
0x1153   :  { %2789 = vmatprep.subr.mxu1 %v2739_v35  ;;  %v2750_v35 = vld [vmem:[#allocation13 + $0x340] sm:$0xff] }
0x1154   :  { %2790 = vmatpush1.msra.mxu1 %v2738_v36  ;;  %v2749_v36 = vld [vmem:[#allocation13 + $0x338] sm:$0xff] }
0x1155   :  { %2791 = vmatprep.subr.mxu1 %v2737_v52  ;;  %v2748_v52 = vld [vmem:[#allocation13 + $0x330] sm:$0xff] }
0x1156   :  { %2792 = vmatpush1.msra.mxu1 %v2736_v39  ;;  %v2747_v39 = vld [vmem:[#allocation13 + $0x328] sm:$0xff] }
0x1157   :  { %2793 = vmatprep.subr.mxu1 %v2735_v40  ;;  %v2746_v40 = vld [vmem:[#allocation13 + $0x320] sm:$0xff] }
0x1211   :  { %v2570_v26 = vpop.f32.mrf.mxu1 }
0x1212   :  { %v2642_v27 = vadd.f32 %v2641_v24, %v2570_v26  ;;  %v2765_v24 = vld [vmem:[#allocation13 + $0x3b8] sm:$0xff]  ;;  %v2763_v26 = vld [vmem:[#allocation13 + $0x3a8] sm:$0xff] }
0x1213   :  { %v2572_v29 = vpop.f32.mrf.mxu1 }
0x1214   :  { %v2659_v42 = vadd.f32 %v2652_v25, %v2642_v27  ;;  %v2644_v10 = vadd.f32 %v2643_v7, %v2572_v29  ;;  %v2764_v25 = vld [vmem:[#allocation13 + $0x3b0] sm:$0xff]  ;;  %v2762_v27 = vld [vmem:[#allocation13 + $0x3a0] sm:$0xff]  ;;  %v2759_v29 = vld [vmem:[#allocation13 + $0x388] sm:$0xff] }
0x1215   :  { %v2760_v7 = vld [vmem:[#allocation13 + $0x390] sm:$0xff] }
0x1216   :  { %v2660_v20 = vadd.f32 %v2656_v43, %v2644_v10  ;;  %v3902_v30 = vadd.f32 %v2659_v42, %v3840_v4  ;;  %v2734_v4 = vld [vmem:[#allocation13 + $0x2c0] sm:$0xff]  ;;  %v2761_v43 = vld [vmem:[#allocation13 + $0x398] sm:$0xff] }
0x1217   :  { %2794 = vmatpush1.msra.mxu1 %v2734_v4  ;;  %v2758_v42 = vld [vmem:[#allocation13 + $0x380] sm:$0xff]  ;;  %v2757_v10 = vld [vmem:[#allocation13 + $0x378] sm:$0xff] }
0x1218   :  { %v3905_v31 = vadd.f32 %v2660_v20, %v3838_v3  ;;  %v2733_v3 = vld [vmem:[#allocation13 + $0x2b8] sm:$0xff]  ;;  %v2756_v20 = vld [vmem:[#allocation13 + $0x370] sm:$0xff] }
0x1219   :  { %2795 = vmatprep.subr.mxu1 %v2733_v3  ;;  %v2745_v4 = vld [vmem:[#allocation13 + $0x318] sm:$0xff]  ;;  %v2744_v3 = vld [vmem:[#allocation13 + $0x310] sm:$0xff] }
0x121a   :  { %v2667_v32 = vadd.f32 %v3905_v31, %v3902_v30  ;;  %2796 = vmatpush1.msra.mxu1 %v2732_v41  ;;  %v2743_v41 = vld [vmem:[#allocation13 + $0x308] sm:$0xff] }
0x121b   :  { %2797 = vmatprep.subr.mxu1 %v2731_v44  ;;  %v2742_v44 = vld [vmem:[#allocation13 + $0x300] sm:$0xff] }
0x121c   :  { %2668 = vadd.xlane.f32.xlu0 %v2667_v32  ;;  %2798 = vmatpush1.msra.mxu1 %v2730_v46  ;;  %v2753_v32 = vld [vmem:[#allocation13 + $0x358] sm:$0xff] }
0x121d   :  { %2799 = vmatprep.subr.mxu1 %v2729_v47  ;;  %v2892_v46 = vld [vmem:[#allocation16 + $0x2f8] sm:$0xff]  ;;  %v2891_v47 = vld [vmem:[#allocation16 + $0x2f0] sm:$0xff] }
0x121e   :  { %2800 = vmatpush1.msra.mxu1 %v2728_v48  ;;  %v2890_v48 = vld [vmem:[#allocation16 + $0x2e8] sm:$0xff]  ;;  %2938 = vmatprep.subr.mxu0 %v2892_v46 }
0x121f   :  { %2801 = vmatprep.subr.mxu1 %v2727_v49  ;;  %v2889_v49 = vld [vmem:[#allocation16 + $0x2e0] sm:$0xff]  ;;  %2939 = vmatpush1.msra.mxu0 %v2891_v47  ;;  %v2664_v47 = vld [vmem:[#allocation10 + $0x2] sm:$0x3] }
0x1220   :  { %2802 = vmatpush1.msra.mxu1 %v2726_v34  ;;  %v2888_v34 = vld [vmem:[#allocation16 + $0x2d8] sm:$0xff]  ;;  %2940 = vmatprep.subr.mxu0 %v2890_v48 }
0x1221   :  { %2803 = vmatprep.subr.mxu1 %v2725_v50  ;;  %v2887_v50 = vld [vmem:[#allocation16 + $0x2d0] sm:$0xff]  ;;  %2941 = vmatpush1.msra.mxu0 %v2889_v49  ;;  %v2666_v48 = vld [vmem:[#allocation12 + $0x2] sm:$0x3]  ;;  %v2687_v49 = vrot.slane %v2664_v47, %v3744_v45 }
0x1222   :  { %2804 = vmatpush1.msra.mxu1 %v2724_v55  ;;  %v2886_v55 = vld [vmem:[#allocation16 + $0x2c8] sm:$0xff]  ;;  %2942 = vmatprep.subr.mxu0 %v2888_v34  ;;  %v2691_v34 = vrot.slane %v2664_v47, %v3760_v8 }
0x1223   :  { %2805 = vmatprep.subr.mxu1 %v2723_v56  ;;  %v2885_v56 = vld [vmem:[#allocation16 + $0x2c0] sm:$0xff]  ;;  %2943 = vmatpush1.msra.mxu0 %v2887_v50 }
0x1224   :  { %2806 = vmatpush1.msra.mxu1 %v2722_v57  ;;  %v2884_v57 = vld [vmem:[#allocation16 + $0x2b8] sm:$0xff]  ;;  %2944 = vmatprep.subr.mxu0 %v2886_v55 }
0x1225   :  { %2807 = vmatprep.subr.mxu1 %v2721_v58  ;;  %v2883_v58 = vld [vmem:[#allocation16 + $0x2b0] sm:$0xff]  ;;  %2945 = vmatpush1.msra.mxu0 %v2885_v56  ;;  %v2700_v56 = vrot.slane %v2666_v48, %v3744_v45 }
0x1226   :  { %2808 = vmatpush1.msra.mxu1 %v2720_v54  ;;  %v2882_v54 = vld [vmem:[#allocation16 + $0x2a8] sm:$0xff]  ;;  %2946 = vmatprep.subr.mxu0 %v2884_v57  ;;  %v2704_v57 = vrot.slane %v2666_v48, %v3760_v8 }
0x1227   :  { %2809 = vmatprep.subr.mxu1 %v2719_v59  ;;  %v2881_v59 = vld [vmem:[#allocation16 + $0x2a0] sm:$0xff]  ;;  %2947 = vmatpush1.msra.mxu0 %v2883_v58 }
0x1228   :  { %2810 = vmatpush1.msra.mxu1 %v2718_v60  ;;  %v2880_v60 = vld [vmem:[#allocation16 + $0x298] sm:$0xff]  ;;  %2948 = vmatprep.subr.mxu0 %v2882_v54 }
0x1229   :  { %2811 = vmatprep.subr.mxu1 %v2717_v13  ;;  %v2879_v13 = vld [vmem:[#allocation16 + $0x290] sm:$0xff]  ;;  %2949 = vmatpush1.msra.mxu0 %v2881_v59 }
0x122a   :  { %2812 = vmatpush1.msra.mxu1 %v2716_v61  ;;  %v2878_v61 = vld [vmem:[#allocation16 + $0x288] sm:$0xff]  ;;  %2950 = vmatprep.subr.mxu0 %v2880_v60 }
0x122b   :  { %2813 = vmatprep.subr.mxu1 %v2715_v0  ;;  %v2877_v0 = vld [vmem:[#allocation16 + $0x280] sm:$0xff]  ;;  %2951 = vmatpush1.msra.mxu0 %v2879_v13 }
0x122c   :  { %2814 = vmatpush1.msra.mxu1 %v2714_v14  ;;  %v2876_v14 = vld [vmem:[#allocation16 + $0x278] sm:$0xff]  ;;  %2952 = vmatprep.subr.mxu0 %v2878_v61 }
0x122d   :  { %2815 = vmatprep.subr.mxu1 %v2713_v62  ;;  %v2875_v62 = vld [vmem:[#allocation16 + $0x270] sm:$0xff]  ;;  %2953 = vmatpush1.msra.mxu0 %v2877_v0  ;;  %v2900_v61 = vld [vmem:[#allocation16 + $0x338] sm:$0xff] }
0x122e   :  { %2816 = vmatpush1.msra.mxu1 %v2712_v63  ;;  %v2874_v63 = vld [vmem:[#allocation16 + $0x268] sm:$0xff]  ;;  %2954 = vmatprep.subr.mxu0 %v2876_v14  ;;  %v2899_v0 = vld [vmem:[#allocation16 + $0x330] sm:$0xff] }
0x122f   :  { %2817 = vmatprep.subr.mxu1 %v2711_v19  ;;  %v2873_v19 = vld [vmem:[#allocation16 + $0x260] sm:$0xff]  ;;  %2955 = vmatpush1.msra.mxu0 %v2875_v62  ;;  %v2898_v14 = vld [vmem:[#allocation16 + $0x328] sm:$0xff] }
0x1230   :  { %2818 = vmatpush1.msra.mxu1 %v2710_v1  ;;  %v2872_v1 = vld [vmem:[#allocation16 + $0x258] sm:$0xff]  ;;  %2956 = vmatprep.subr.mxu0 %v2874_v63  ;;  %v2897_v62 = vld [vmem:[#allocation16 + $0x320] sm:$0xff]  ;;  %v2895_v63 = vld [vmem:[#allocation16 + $0x310] sm:$0xff] }
0x1231   :  { %2819 = vmatprep.subr.mxu1 %v2773_v2  ;;  %v2871_v2 = vld [vmem:[#allocation16 + $0x250] sm:$0xff]  ;;  %2957 = vmatpush1.msra.mxu0 %v2873_v19  ;;  %v2894_v19 = vld [vmem:[#allocation16 + $0x308] sm:$0xff] }
0x1232   :  { %2820 = vmatpush2.msra.mxu1 %v2772_v5  ;;  %v2870_v5 = vld [vmem:[#allocation16 + $0x248] sm:$0xff]  ;;  %2958 = vmatprep.subr.mxu0 %v2872_v1  ;;  %v2893_v1 = vld [vmem:[#allocation16 + $0x300] sm:$0xff] }
0x1233   :  { %2821 = vmatprep.subr.mxu1 %v2771_v6  ;;  %v2869_v6 = vld [vmem:[#allocation16 + $0x240] sm:$0xff]  ;;  %2959 = vmatpush1.msra.mxu0 %v2871_v2 }
0x1234   :  { %2822 = vmatpush2.msra.mxu1 %v2770_v53  ;;  %v2868_v53 = vld [vmem:[#allocation16 + $0x238] sm:$0xff]  ;;  %2960 = vmatprep.subr.mxu0 %v2870_v5 }
0x1235   :  { %2823 = vmatprep.subr.mxu1 %v2769_v51  ;;  %v2867_v51 = vld [vmem:[#allocation16 + $0x230] sm:$0xff]  ;;  %2961 = vmatpush1.msra.mxu0 %v2869_v6 }
0x1236   :  { %2824 = vmatpush2.msra.mxu1 %v2768_v9  ;;  %v2866_v9 = vld [vmem:[#allocation16 + $0x228] sm:$0xff]  ;;  %2962 = vmatprep.subr.mxu0 %v2868_v53 }
0x1237   :  { %2825 = vmatprep.subr.mxu1 %v2767_v11  ;;  %v2865_v11 = vld [vmem:[#allocation16 + $0x220] sm:$0xff]  ;;  %2963 = vmatpush1.msra.mxu0 %v2867_v51 }
0x1238   :  { %2826 = vmatpush2.msra.mxu1 %v2766_v23  ;;  %2964 = vmatprep.subr.mxu0 %v2866_v9  ;;  %v2923_v23 = vld [vmem:[#allocation16 + $0x3f0] sm:$0xff] }
0x1239   :  { %2827 = vmatprep.subr.mxu1 %v2765_v24  ;;  %2965 = vmatpush1.msra.mxu0 %v2865_v11  ;;  %v2922_v24 = vld [vmem:[#allocation16 + $0x3e8] sm:$0xff] }
0x123a   :  { %2828 = vmatpush2.msra.mxu1 %v2764_v25  ;;  %v2921_v25 = vld [vmem:[#allocation16 + $0x3e0] sm:$0xff] }
0x123b   :  { %2829 = vmatprep.subr.mxu1 %v2763_v26  ;;  %v2920_v26 = vld [vmem:[#allocation16 + $0x3d8] sm:$0xff] }
0x123c   :  { %2830 = vmatpush2.msra.mxu1 %v2762_v27  ;;  %v2919_v27 = vld [vmem:[#allocation16 + $0x3d0] sm:$0xff] }
0x123d   :  { %2831 = vmatprep.subr.mxu1 %v2761_v43  ;;  %v2918_v43 = vld [vmem:[#allocation16 + $0x3c8] sm:$0xff] }
0x123e   :  { %2832 = vmatpush2.msra.mxu1 %v2760_v7  ;;  %v2917_v7 = vld [vmem:[#allocation16 + $0x3c0] sm:$0xff] }
0x123f   :  { %2833 = vmatprep.subr.mxu1 %v2759_v29  ;;  %v2916_v29 = vld [vmem:[#allocation16 + $0x3b8] sm:$0xff] }
0x1240   :  { %2834 = vmatpush2.msra.mxu1 %v2758_v42  ;;  %v2915_v42 = vld [vmem:[#allocation16 + $0x3b0] sm:$0xff] }
0x1241   :  { %2835 = vmatprep.subr.mxu1 %v2757_v10  ;;  %v2914_v10 = vld [vmem:[#allocation16 + $0x3a8] sm:$0xff] }
0x1242   :  { %2836 = vmatpush2.msra.mxu1 %v2756_v20  ;;  %v2913_v20 = vld [vmem:[#allocation16 + $0x3a0] sm:$0xff] }
0x12a5   :  { %v2669_v12 = vpop.xlane.xlu0 %2668 }
0x12a6   :  { %v2670_v15 = vmul.f32 0.00390625, %v2669_v12  ;;  %v2864_v12 = vld [vmem:[#allocation16 + $0x218] sm:$0xff] }
0x12a7   :  { %2966 = vmatprep.subr.mxu0 %v2864_v12 }
0x12a8   :  { %v3910_v16 = vsub.f32 %v3902_v30, %v2670_v15  ;;  %v3913_v17 = vsub.f32 %v3905_v31, %v2670_v15  ;;  %v2755_v30 = vld [vmem:[#allocation13 + $0x368] sm:$0xff]  ;;  %v2754_v31 = vld [vmem:[#allocation13 + $0x360] sm:$0xff]  ;;  %v2863_v15 = vld [vmem:[#allocation16 + $0x210] sm:$0xff] }
0x12a9   :  { %2837 = vmatprep.subr.mxu1 %v2755_v30  ;;  %2967 = vmatpush1.msra.mxu0 %v2863_v15  ;;  %v2912_v30 = vld [vmem:[#allocation16 + $0x398] sm:$0xff]  ;;  %v2926_v15 = vld [vmem:[#allocation18 + $0x2] sm:$0x3] }
0x12aa   :  { %v2673_v18 = vmul.f32 %v3910_v16, %v3910_v16  ;;  %v2674_v21 = vmul.f32 %v3913_v17, %v3913_v17  ;;  %2838 = vmatpush2.msra.mxu1 %v2754_v31  ;;  %v2911_v31 = vld [vmem:[#allocation16 + $0x390] sm:$0xff] }
0x12ab   :  { %2839 = vmatprep.subr.mxu1 %v2753_v32  ;;  %v2910_v32 = vld [vmem:[#allocation16 + $0x388] sm:$0xff] }
0x12ac   :  { %v2675_v22 = vadd.f32 %v2674_v21, %v2673_v18  ;;  %2840 = vmatpush2.msra.mxu1 %v2752_v33  ;;  %v2862_v18 = vld [vmem:[#allocation16 + $0x208] sm:$0xff]  ;;  %v2861_v21 = vld [vmem:[#allocation16 + $0x200] sm:$0xff] }
0x12ad   :  { %2841 = vmatprep.subr.mxu1 %v2751_v28  ;;  %2968 = vmatprep.subr.mxu0 %v2862_v18  ;;  %v2909_v33 = vld [vmem:[#allocation16 + $0x380] sm:$0xff]  ;;  %v2908_v28 = vld [vmem:[#allocation16 + $0x378] sm:$0xff]  ;;  %v2931_v18 = vrot.slane %v2926_v15, %v3744_v45 }
0x12ae   :  { %2676 = vadd.xlane.f32.xlu1 %v2675_v22  ;;  %2842 = vmatpush2.msra.mxu1 %v2750_v35  ;;  %v2924_v22 = vld [vmem:[#allocation16 + $0x3f8] sm:$0xff]  ;;  %v2907_v35 = vld [vmem:[#allocation16 + $0x370] sm:$0xff] }
0x12af   :  { %2843 = vmatprep.subr.mxu1 %v2749_v36  ;;  %2969 = vmatpush1.msra.mxu0 %v2861_v21  ;;  %v2906_v36 = vld [vmem:[#allocation16 + $0x368] sm:$0xff]  ;;  %v2935_v21 = vrot.slane %v2926_v15, %v3760_v8 }
0x12b0   :  { %2844 = vmatpush2.msra.mxu1 %v2748_v52  ;;  %2970 = vmatprep.subr.mxu0 %v2924_v22  ;;  %v2905_v52 = vld [vmem:[#allocation16 + $0x360] sm:$0xff] }
0x12b1   :  { %2845 = vmatprep.subr.mxu1 %v2747_v39  ;;  %2971 = vmatpush2.msra.mxu0 %v2923_v23  ;;  %v2904_v39 = vld [vmem:[#allocation16 + $0x358] sm:$0xff] }
0x12b2   :  { %2846 = vmatpush2.msra.mxu1 %v2746_v40  ;;  %2972 = vmatprep.subr.mxu0 %v2922_v24  ;;  %v2903_v40 = vld [vmem:[#allocation16 + $0x350] sm:$0xff] }
0x12b3   :  { %2847 = vmatprep.subr.mxu1 %v2745_v4  ;;  %2973 = vmatpush2.msra.mxu0 %v2921_v25  ;;  %v2902_v4 = vld [vmem:[#allocation16 + $0x348] sm:$0xff] }
0x12b4   :  { %2848 = vmatpush2.msra.mxu1 %v2744_v3  ;;  %2974 = vmatprep.subr.mxu0 %v2920_v26  ;;  %v2901_v3 = vld [vmem:[#allocation16 + $0x340] sm:$0xff] }
0x12b5   :  { %2849 = vmatprep.subr.mxu1 %v2743_v41  ;;  %2975 = vmatpush2.msra.mxu0 %v2919_v27 }
0x12b6   :  { %2850 = vmatpush2.msra.mxu1 %v2742_v44  ;;  %2976 = vmatprep.subr.mxu0 %v2918_v43 }
0x12b7   :  { %2977 = vmatpush2.msra.mxu0 %v2917_v7 }
0x12b8   :  { %2978 = vmatprep.subr.mxu0 %v2916_v29 }
0x12b9   :  { %2979 = vmatpush2.msra.mxu0 %v2915_v42 }
0x12ba   :  { %2980 = vmatprep.subr.mxu0 %v2914_v10 }
0x12bb   :  { %2981 = vmatpush2.msra.mxu0 %v2913_v20 }
0x12bc   :  { %2982 = vmatprep.subr.mxu0 %v2912_v30 }
0x12bd   :  { %2983 = vmatpush2.msra.mxu0 %v2911_v31 }
0x12be   :  { %2984 = vmatprep.subr.mxu0 %v2910_v32 }
0x12bf   :  { %2985 = vmatpush2.msra.mxu0 %v2909_v33 }
0x12c0   :  { %2986 = vmatprep.subr.mxu0 %v2908_v28 }
0x12c1   :  { %2987 = vmatpush2.msra.mxu0 %v2907_v35  ;;  %v3012_v35 = vld [vmem:[#allocation19 + $0x2] sm:$0x3] }
0x12c2   :  { %2988 = vmatprep.subr.mxu0 %v2906_v36  ;;  %v3014_v36 = vld [vmem:[#allocation21 + $0x2] sm:$0x3] }
0x12c3   :  { %2989 = vmatpush2.msra.mxu0 %v2905_v52  ;;  %v3035_v52 = vrot.slane %v3012_v35, %v3744_v45 }
0x12c4   :  { %2990 = vmatprep.subr.mxu0 %v2904_v39  ;;  %v3039_v39 = vrot.slane %v3012_v35, %v3760_v8 }
0x12c5   :  { %2991 = vmatpush2.msra.mxu0 %v2903_v40 }
0x12c6   :  { %2992 = vmatprep.subr.mxu0 %v2902_v4  ;;  %v3048_v4 = vrot.slane %v3014_v36, %v3744_v45 }
0x12c7   :  { %2993 = vmatpush2.msra.mxu0 %v2901_v3  ;;  %v3052_v3 = vrot.slane %v3014_v36, %v3760_v8 }
0x12c8   :  { %2994 = vmatprep.subr.mxu0 %v2900_v61 }
0x12c9   :  { %2995 = vmatpush2.msra.mxu0 %v2899_v0 }
0x12ca   :  { %2996 = vmatprep.subr.mxu0 %v2898_v14 }
0x12cb   :  { %2997 = vmatpush2.msra.mxu0 %v2897_v62 }
0x1337   :  { %v2677_v41 = vpop.xlane.xlu1 %2676 }
0x1338   :  { %v2678_v44 = vmul.f32 0.00390625, %v2677_v41 }
0x133a   :  { %v2679_v46 = vadd.f32 1e-05, %v2678_v44 }
0x133c   :  { %3175 = vrsqrt.f32 %v2679_v46 }
0x1349   :  { %v3176_v50 = vpop.eup %3175 }
0x134a   :  { %v2682_v55 = vmul.f32 %v3176_v50, %v3913_v17  ;;  %v2681_v58 = vmul.f32 %v3176_v50, %v3910_v16  ;;  %v2896_v17 = vld [vmem:[#allocation16 + $0x318] sm:$0xff] }
0x134b   :  { %2998 = vmatprep.subr.mxu0 %v2896_v17  ;;  %v2775_v16 = vld [vmem:[#allocation15 + $0x2] sm:$0x3] }
0x134c   :  { %v2695_v54 = vmul.f32 %v2691_v34, %v2682_v55  ;;  %v2694_v59 = vmul.f32 %v2687_v49, %v2681_v58  ;;  %2999 = vmatpush2.msra.mxu0 %v2895_v63  ;;  %v2780_v2 = vrot.slane %v2775_v16, %v3744_v45  ;;  %v2784_v5 = vrot.slane %v2775_v16, %v3760_v8 }
0x134d   :  { %3000 = vmatprep.subr.mxu0 %v2894_v19 }
0x134e   :  { %v2708_v60 = vadd.f32 %v2704_v57, %v2695_v54  ;;  %v2707_v13 = vadd.f32 %v2700_v56, %v2694_v59  ;;  %3001 = vmatpush2.msra.mxu0 %v2893_v1 }
0x1350   :  { %2851 = vmatprep.mubr.f32.mxu1 %v2708_v60 }
0x1351   :  { %2852 = vmatmul.mubr.f32.vlgmr.msra.gmra.mxu1 %v2707_v13 }
0x1411   :  { %v2853_v6 = vpop.f32.mrf.mxu1 }
0x1412   :  { %v2854_v53 = vadd.f32 %v2853_v6, %v2780_v2 }
0x1413   :  { %v2855_v51 = vpop.f32.mrf.mxu1 }
0x1414   :  { %v2856_v9 = vadd.f32 %v2855_v51, %v2784_v5  ;;  %v2858_v12 = vmax.f32 %v2854_v53, 0.0 }
0x1416   :  { %v2859_v11 = vmax.f32 %v2856_v9, 0.0 }
0x1418   :  { %3002 = vmatprep.mubr.f32.mxu0 %v2859_v11 }
0x1419   :  { %3003 = vmatmul.mubr.f32.vlgmr.msra.gmra.mxu0 %v2858_v12 }
0x14d9   :  { %v3004_v22 = vpop.f32.mrf.mxu0 }
0x14da   :  { %v3005_v23 = vadd.f32 %v3004_v22, %v2931_v18 }
0x14db   :  { %v3006_v24 = vpop.f32.mrf.mxu0 }
0x14dc   :  { %v3007_v25 = vadd.f32 %v3006_v24, %v2935_v21  ;;  %v3009_v26 = vadd.f32 %v3005_v23, %v2707_v13 }
0x14de   :  { %v3010_v27 = vadd.f32 %v3007_v25, %v2708_v60 }
0x14e0   :  { %v3015_v43 = vadd.f32 %v3010_v27, %v3009_v26 }
0x14e2   :  { %3016 = vadd.xlane.f32.xlu0 %v3015_v43 }
0x156b   :  { %v3017_v7 = vpop.xlane.xlu0 %3016 }
0x156c   :  { %v3018_v29 = vmul.f32 0.00390625, %v3017_v7 }
0x156e   :  { %v3019_v42 = vsub.f32 %v3009_v26, %v3018_v29  ;;  %v3020_v10 = vsub.f32 %v3010_v27, %v3018_v29 }
0x1570   :  { %v3021_v20 = vmul.f32 %v3019_v42, %v3019_v42  ;;  %v3022_v30 = vmul.f32 %v3020_v10, %v3020_v10 }
0x1572   :  { %v3023_v31 = vadd.f32 %v3022_v30, %v3021_v20 }
0x1574   :  { %3024 = vadd.xlane.f32.xlu1 %v3023_v31 }
0x15fd   :  { %v3025_v32 = vpop.xlane.xlu1 %3024 }
0x15fe   :  { %v3026_v33 = vmul.f32 0.00390625, %v3025_v32 }
0x1600   :  { %v3027_v28 = vadd.f32 1e-05, %v3026_v33 }
0x1602   :  { %3177 = vrsqrt.f32 %v3027_v28 }
0x160f   :  { %v3178_v40 = vpop.eup %3177 }
0x1610   :  { %v3029_v41 = vmul.f32 %v3178_v40, %v3019_v42  ;;  %v3030_v44 = vmul.f32 %v3178_v40, %v3020_v10 }
0x1612   :  { %v3042_v46 = vmul.f32 %v3035_v52, %v3029_v41  ;;  %v3043_v47 = vmul.f32 %v3039_v39, %v3030_v44 }
0x1614   :  { %v3055_v48 = vadd.f32 %v3048_v4, %v3042_v46  ;;  %v3056_v49 = vadd.f32 %v3052_v3, %v3043_v47 }
0x1616   :  { %v3057_v34 = vadd.f32 %v3055_v48, %v3726_v37  ;;  %v3058_v50 = vadd.f32 %v3056_v49, %v3728_v38 }
0x1618   :  { %3059 = vst [vmem:[%s3956_s15] sm:$0xff] %v3057_v34  ;;  %3060 = vst [vmem:[%s3956_s15 + $0x8] sm:$0xff] %v3058_v50 }
0x1619   :  { %3065 = vsyncpa [#allocation3], 1 }
0x161a   :  { %3066 = vsyncpa [#allocation5], 1 }
0x161b   :  { %3067 = vsyncpa [#allocation8], 1 }
0x161c   :  { %3068 = vsyncpa [#allocation11], 1 }
0x161d   :  { %3069 = vsyncpa [#allocation14], 1 }
0x161e   :  { %3070 = vsyncpa [#allocation17], 1 }
0x161f   :  { %3071 = vsyncpa [#allocation20], 1 }

</bundles_post_ra>
